<compile_context>
chip_gen: v7x
topology: tpu7x:2x2x1
jax: 0.10.0
libtpu: 0.0.40
codegen_flags: <defaults>
</compile_context>

<pallas_src>
import functools

import jax
import jax.numpy as jnp
from jax import lax
from jax.experimental import pallas as pl
from jax.experimental.pallas import tpu as pltpu

NUM_CLASSES = 10
MAX_TILE_B = 32  # images per grid step (upper bound)

# conv1-output row ordering (per image, 32 rows incl. 4 pad rows), chosen so that
# max(rows 0..15, rows 16..31) yields pool1 rows ordered [even pooled rows | odd pooled rows]:
#   rows  0.. 7 -> conv1 rows 0,4,...,28      rows  8..15 -> conv1 rows 2,6,...,30
#   rows 16..23 -> conv1 rows 1,5,...,29      rows 24..31 -> conv1 rows 3,7,...,31
_CONV1_ROW_ORDER = ([4 * r for r in range(8)] + [4 * r + 2 for r in range(8)] +
                    [4 * r + 1 for r in range(8)] + [4 * r + 3 for r in range(8)])


# ------------------------------------------------------------------ kernel --
def _convnet_kernel(x3_ref, a1_ref, b1_ref, a2_ref, b2_ref, wl_ref, bl_ref,
                    logits_ref, probas_ref):
    tb = x3_ref.shape[0]
    f32 = jnp.float32
    bf16 = jnp.bfloat16

    # ---- conv1 (+bias+relu): one full-width band matmul, f32 on the MXU. ----
    # x3[b, r, di*30+j] = padded_image[b, conv1_row(r)+di, j]; A1 is the banded 3x3 kernel.
    x3 = x3_ref[...].reshape(tb * 32, 90)                        # free (32 % 8 == 0)
    h1 = jnp.dot(x3, a1_ref[...], preferred_element_type=f32)    # (tb*32, 256), lane = w*8+c
    h1 = jnp.maximum(h1 + b1_ref[...], 0.0)

    # ---- pool1 vertical: rows were emitted in parity order -> max of the two halves. ----
    h1 = h1.reshape(tb, 2, 16, 256)                              # free split
    p = jnp.maximum(h1[:, 0], h1[:, 1])                          # (tb, 16, 256)
    # ---- pool1 horizontal (uncompacted): max with lanes shifted left by one column. ----
    psh = jnp.concatenate([p[:, :, 8:], p[:, :, :8]], axis=-1)
    hm1 = jnp.maximum(p, psh).astype(bf16)                       # valid at even conv1 columns

    # ---- conv2 (+bias+relu): three band matmuls per output-row parity (bf16 in, f32 acc). --
    e = hm1[:, 0:8, :]                                           # pooled rows 0,2,...,14
    o = hm1[:, 8:16, :]                                          # pooled rows 1,3,...,15
    zrow = jnp.zeros((tb, 1, 256), bf16)
    o_dn = jnp.concatenate([zrow, o[:, 0:7, :]], axis=1)         # pooled rows 2p-1 (zero top pad)
    e_up = jnp.concatenate([e[:, 1:7, :], zrow, zrow], axis=1)   # pooled rows 2p+2 (zero bottom pad)

    def band(u, k):                                              # (tb,8,256) @ A2[k] -> (tb*8,256)
        return jnp.dot(u.reshape(tb * 8, 256), a2_ref[k], preferred_element_type=f32)

    b2 = b2_ref[...]
    h2e = jnp.maximum(band(o_dn, 0) + band(e, 1) + band(o, 2) + b2, 0.0)   # conv2 rows 2p
    h2o = jnp.maximum(band(e, 0) + band(o, 1) + band(e_up, 2) + b2, 0.0)   # conv2 rows 2p+1

    # ---- pool2 (uncompacted; row/column selection is folded into the linear weights). ----
    vm2 = jnp.maximum(h2e, h2o)                                  # (tb*8, 256), rows = (b, qi)
    vsh = jnp.concatenate([vm2[:, 16:], vm2[:, :16]], axis=-1)   # shift by one conv2 column
    hm2 = jnp.maximum(vm2, vsh).astype(bf16).reshape(tb, 8, 256)

    # ---- linear (pool2 selection folded into wl) + softmax (exact divide). ----
    acc = jnp.zeros((tb, NUM_CLASSES), f32)
    for qi in range(7):
        acc = acc + jnp.dot(hm2[:, qi, :], wl_ref[qi * 256:(qi + 1) * 256, :],
                            preferred_element_type=f32)
    logits = acc + bl_ref[...]
    logits_ref[...] = logits
    m = jnp.max(logits, axis=-1, keepdims=True)
    ez = jnp.exp(logits - m)
    probas_ref[...] = ez / jnp.sum(ez, axis=-1, keepdims=True)


# ----------------------------------------------------- wrapper-side folding --
def _build_x3(x_nchw):
    """(B,1,28,28) -> (B,32,90): per conv1-output row, the 3 needed padded-input rows."""
    B = x_nchw.shape[0]
    x = x_nchw.astype(jnp.float32).reshape(B, 28, 28)            # squeeze channel
    xp = jnp.pad(x, ((0, 0), (1, 5), (1, 1)))                    # (B, 34, 30): 'same' pad + tail pad
    rows = jnp.asarray(_CONV1_ROW_ORDER)[:, None] + jnp.arange(3)[None, :]   # (32, 3)
    g = xp[:, rows, :]                                           # (B, 32, 3, 30)
    return g.reshape(B, 32, 90)


def _prep_operands(params):
    f32, bf16 = jnp.float32, jnp.bfloat16

    # conv1 band matrix A1[(di*30+j), (w*8+co)] = w1[co,0,di,j-w] for 0<=j-w<=2, w<28.
    w1 = params["conv1_w"].astype(f32)                           # (8,1,3,3)
    di = (jnp.arange(90) // 30)[:, None]
    j = (jnp.arange(90) % 30)[:, None]
    w = (jnp.arange(256) // 8)[None, :]
    co = (jnp.arange(256) % 8)[None, :]
    dj = j - w
    valid = (dj >= 0) & (dj <= 2) & (w < 28)
    a1 = jnp.where(valid, w1[:, 0][co, di, jnp.clip(dj, 0, 2)], 0.0).astype(f32)
    b1t = jnp.where(jnp.arange(256) // 8 < 28,
                    params["conv1_b"].astype(f32)[jnp.arange(256) % 8], 0.0)[None, :]

    # conv2 band matrices A2[di][(2*pj)*8+ci, j2*16+c2o] = w2[c2o,ci,di,pj-j2+1]
    # (odd/out-of-range input lanes get zero weight -> horizontal pool compaction + 'same'
    #  horizontal padding are folded in here).
    w2 = params["conv2_w"].astype(f32)                           # (16,8,3,3)
    rw = (jnp.arange(256) // 8)[:, None]
    rci = (jnp.arange(256) % 8)[:, None]
    cj2 = (jnp.arange(256) // 16)[None, :]
    cco = (jnp.arange(256) % 16)[None, :]
    pj = rw // 2
    ddj = pj - cj2 + 1
    valid2 = (rw % 2 == 0) & (pj <= 13) & (cj2 <= 13) & (ddj >= 0) & (ddj <= 2)
    a2 = jnp.stack(
        [jnp.where(valid2, w2[cco, rci, d, jnp.clip(ddj, 0, 2)], 0.0) for d in range(3)],
        axis=0).astype(bf16)                                     # (3, 256, 256)
    b2t = jnp.where(jnp.arange(256) // 16 < 14,
                    params["conv2_b"].astype(f32)[jnp.arange(256) % 16], 0.0)[None, :]

    # linear weights with pool2 selection folded in: wl[qi*256 + (2*qj)*16 + c2o, cls].
    lw = params["lin_w"].astype(f32)                             # (10, 784), feature = c*49+qi*7+qj
    lane = jnp.arange(256)
    j2l, cch = lane // 16, lane % 16
    lane_ok = (j2l % 2 == 0) & (j2l // 2 <= 6)
    qj = j2l // 2
    feat = cch[None, :] * 49 + jnp.arange(7)[:, None] * 7 + qj[None, :]     # (7, 256)
    vals = jnp.transpose(jnp.take(lw, jnp.clip(feat, 0, 783), axis=1), (1, 2, 0))   # (7,256,10)
    wlf = jnp.where(lane_ok[None, :, None], vals, 0.0).reshape(7 * 256, NUM_CLASSES).astype(bf16)
    blt = params["lin_b"].astype(f32).reshape(1, NUM_CLASSES)
    return a1, b1t, a2, b2t, wlf, blt


@functools.partial(jax.jit, static_argnames=("tile_b",))
def convnet_forward(x_nchw, params, tile_b=None):
    B = x_nchw.shape[0]
    if tile_b is None:
        # cap at ceil(B/2) (rounded to 8) so big batches keep >=2 grid steps for v7x's 2 TCs
        tile_b = min(MAX_TILE_B, max(8, (-(-B // 2) + 7) // 8 * 8))
    tile_b = max(8, (int(tile_b) + 7) // 8 * 8)
    nb = (B + tile_b - 1) // tile_b
    bp = nb * tile_b

    x3 = jnp.pad(_build_x3(x_nchw), ((0, bp - B), (0, 0), (0, 0)))       # f32, no bf16 input cast
    a1, b1t, a2, b2t, wlf, blt = _prep_operands(params)

    grid_spec = pltpu.PrefetchScalarGridSpec(
        num_scalar_prefetch=0,
        grid=(nb,),
        in_specs=[
            pl.BlockSpec((tile_b, 32, 90), lambda i: (i, 0, 0)),         # batch-tiled input rows
            pl.BlockSpec((90, 256), lambda i: (0, 0)),                   # resident conv1 band
            pl.BlockSpec((1, 256), lambda i: (0, 0)),
            pl.BlockSpec((3, 256, 256), lambda i: (0, 0, 0)),            # resident conv2 bands
            pl.BlockSpec((1, 256), lambda i: (0, 0)),
            pl.BlockSpec((7 * 256, NUM_CLASSES), lambda i: (0, 0)),      # resident folded linear
            pl.BlockSpec((1, NUM_CLASSES), lambda i: (0, 0)),
        ],
        out_specs=(
            pl.BlockSpec((tile_b, NUM_CLASSES), lambda i: (i, 0)),
            pl.BlockSpec((tile_b, NUM_CLASSES), lambda i: (i, 0)),
        ),
    )
    logits, probas = pl.pallas_call(
        _convnet_kernel,
        out_shape=(jax.ShapeDtypeStruct((bp, NUM_CLASSES), jnp.float32),
                   jax.ShapeDtypeStruct((bp, NUM_CLASSES), jnp.float32)),
        grid_spec=grid_spec,
        compiler_params=pltpu.CompilerParams(
            dimension_semantics=("parallel",),          # batch tiles are independent
            vmem_limit_bytes=32 * 1024 * 1024),         # generous; fits v5e/v6e/v7x
    )(x3, a1, b1t, a2, b2t, wlf, blt)
    return logits[:B], probas[:B]


# ------------------------------------------------------- reference & params --
def convnet_reference(x_nchw, params):
    """Pure-JAX f32 reference of the PyTorch module (independent of the kernel math)."""
    dn = ("NCHW", "OIHW", "NCHW")
    hp = lax.Precision.HIGHEST
    h = lax.conv_general_dilated(x_nchw.astype(jnp.float32), params["conv1_w"],
                                 (1, 1), ((1, 1), (1, 1)), dimension_numbers=dn, precision=hp)
    h = jax.nn.relu(h + params["conv1_b"].reshape(1, 8, 1, 1))
    h = lax.reduce_window(h, -jnp.inf, lax.max, (1, 1, 2, 2), (1, 1, 2, 2), "VALID")
    h = lax.conv_general_dilated(h, params["conv2_w"], (1, 1), ((1, 1), (1, 1)),
                                 dimension_numbers=dn, precision=hp)
    h = jax.nn.relu(h + params["conv2_b"].reshape(1, 16, 1, 1))
    h = lax.reduce_window(h, -jnp.inf, lax.max, (1, 1, 2, 2), (1, 1, 2, 2), "VALID")
    feat = h.reshape(h.shape[0], 7 * 7 * 16)                     # NCHW flatten (c, h, w)
    logits = jnp.dot(feat, params["lin_w"].T, precision=hp) + params["lin_b"]
    return logits, jax.nn.softmax(logits, axis=-1)


def init_params(key):
    k1, k2, k3 = jax.random.split(key, 3)
    # weight ~ N(0, 0.01), bias = 0  (matches the module's custom init)
    return {
        "conv1_w": 0.01 * jax.random.normal(k1, (8, 1, 3, 3), jnp.float32),
        "conv1_b": jnp.zeros((8,), jnp.float32),
        "conv2_w": 0.01 * jax.random.normal(k2, (16, 8, 3, 3), jnp.float32),
        "conv2_b": jnp.zeros((16,), jnp.float32),
        "lin_w": 0.01 * jax.random.normal(k3, (NUM_CLASSES, 7 * 7 * 16), jnp.float32),
        "lin_b": jnp.zeros((NUM_CLASSES,), jnp.float32),
    }


if __name__ == "__main__":
    key = jax.random.PRNGKey(0)
    pkey, xkey = jax.random.split(key)
    params = init_params(pkey)
    # 28x28 single-channel input is required by linear_1 (7*7*16 after two 2x2 pools)
    x = jax.random.normal(xkey, (2, 1, 28, 28), jnp.float32)

    logits, probas = convnet_forward(x, params)
    logits, probas = jax.block_until_ready((logits, probas))

    assert logits.shape == (2, NUM_CLASSES) and probas.shape == (2, NUM_CLASSES)
    assert bool(jnp.all(jnp.abs(jnp.sum(probas, axis=1) - 1.0) < 1e-3))

    ref_logits, ref_probas = convnet_reference(x, params)
    assert bool(jnp.max(jnp.abs(logits - ref_logits)) < 5e-4)
    assert bool(jnp.max(jnp.abs(probas - ref_probas)) < 5e-3)
    print("KERNEL_OK")
</pallas_src>

<mosaic_0001>
module attributes {stable_mosaic.version = 11 : i64} {
  func.func @_convnet_kernel(%arg0: i32, %arg1: memref<8x32x90xf32, #tpu.memory_space<vmem>>, %arg2: memref<90x256xf32, #tpu.memory_space<vmem>>, %arg3: memref<1x256xf32, #tpu.memory_space<vmem>>, %arg4: memref<3x256x256xbf16, #tpu.memory_space<vmem>>, %arg5: memref<1x256xf32, #tpu.memory_space<vmem>>, %arg6: memref<1792x10xbf16, #tpu.memory_space<vmem>>, %arg7: memref<1x10xf32, #tpu.memory_space<vmem>>, %arg8: memref<8x10xf32, #tpu.memory_space<vmem>>, %arg9: memref<8x10xf32, #tpu.memory_space<vmem>>) attributes {dimension_semantics = [#tpu.dimension_semantics<parallel>], iteration_bounds = array<i64: 1>, scalar_prefetch = 0 : i64, scratch_operands = 0 : i64, tpu.core_type = #tpu.core_type<tc>, window_params = [{transform_indices = @transform_0, window_bounds = array<i64: 8, 32, 90>}, {pipeline_mode = #tpu.pipeline_mode<synchronous>, transform_indices = @transform_1, window_bounds = array<i64: 90, 256>}, {pipeline_mode = #tpu.pipeline_mode<synchronous>, transform_indices = @transform_2, window_bounds = array<i64: 1, 256>}, {pipeline_mode = #tpu.pipeline_mode<synchronous>, transform_indices = @transform_3, window_bounds = array<i64: 3, 256, 256>}, {pipeline_mode = #tpu.pipeline_mode<synchronous>, transform_indices = @transform_4, window_bounds = array<i64: 1, 256>}, {pipeline_mode = #tpu.pipeline_mode<synchronous>, transform_indices = @transform_5, window_bounds = array<i64: 1792, 10>}, {pipeline_mode = #tpu.pipeline_mode<synchronous>, transform_indices = @transform_6, window_bounds = array<i64: 1, 10>}, {transform_indices = @transform_7, window_bounds = array<i64: 8, 10>}, {transform_indices = @transform_8, window_bounds = array<i64: 8, 10>}]} {
    %c0 = arith.constant 0 : index
    %c0_0 = arith.constant 0 : index
    %c0_1 = arith.constant 0 : index
    %0 = vector.load %arg1[%c0, %c0_0, %c0_1] : memref<8x32x90xf32, #tpu.memory_space<vmem>>, vector<8x32x90xf32>
    %1 = vector.shape_cast %0 : vector<8x32x90xf32> to vector<256x90xf32>
    %c0_2 = arith.constant 0 : index
    %c0_3 = arith.constant 0 : index
    %2 = vector.load %arg2[%c0_2, %c0_3] : memref<90x256xf32, #tpu.memory_space<vmem>>, vector<90x256xf32>
    %cst = arith.constant dense<0.000000e+00> : vector<256x256xf32>
    %3 = tpu.matmul %1, %2, %cst {dimension_numbers = #tpu.dot_dimension_numbers<[1], [0], [0], [1], [0, 0, 1, 1], [], []>} : vector<256x90xf32>, vector<90x256xf32>, vector<256x256xf32> -> vector<256x256xf32>
    %c0_4 = arith.constant 0 : index
    %c0_5 = arith.constant 0 : index
    %4 = vector.load %arg3[%c0_4, %c0_5] : memref<1x256xf32, #tpu.memory_space<vmem>>, vector<1x256xf32>
    %5 = vector.broadcast %4 : vector<1x256xf32> to vector<256x256xf32>
    %6 = arith.addf %3, %5 : vector<256x256xf32>
    %cst_6 = arith.constant 0.000000e+00 : f32
    %7 = vector.broadcast %cst_6 : f32 to vector<256x256xf32>
    %8 = arith.maximumf %6, %7 : vector<256x256xf32>
    %9 = vector.shape_cast %8 : vector<256x256xf32> to vector<8x2x16x256xf32>
    %10 = vector.extract_strided_slice %9 {offsets = [0, 0, 0, 0], sizes = [8, 1, 16, 256], strides = [1, 1, 1, 1]} : vector<8x2x16x256xf32> to vector<8x1x16x256xf32>
    %11 = vector.shape_cast %10 : vector<8x1x16x256xf32> to vector<8x16x256xf32>
    %12 = vector.extract_strided_slice %9 {offsets = [0, 1, 0, 0], sizes = [8, 1, 16, 256], strides = [1, 1, 1, 1]} : vector<8x2x16x256xf32> to vector<8x1x16x256xf32>
    %13 = vector.shape_cast %12 : vector<8x1x16x256xf32> to vector<8x16x256xf32>
    %14 = arith.maximumf %11, %13 : vector<8x16x256xf32>
    %15 = vector.extract_strided_slice %14 {offsets = [0, 0, 8], sizes = [8, 16, 248], strides = [1, 1, 1]} : vector<8x16x256xf32> to vector<8x16x248xf32>
    %16 = vector.extract_strided_slice %14 {offsets = [0, 0, 0], sizes = [8, 16, 8], strides = [1, 1, 1]} : vector<8x16x256xf32> to vector<8x16x8xf32>
    %17 = tpu.concatenate %15, %16 in 2 : vector<8x16x248xf32>, vector<8x16x8xf32> -> vector<8x16x256xf32>
    %18 = arith.maximumf %14, %17 : vector<8x16x256xf32>
    %19 = arith.truncf %18 : vector<8x16x256xf32> to vector<8x16x256xbf16>
    %20 = vector.extract_strided_slice %19 {offsets = [0, 0, 0], sizes = [8, 8, 256], strides = [1, 1, 1]} : vector<8x16x256xbf16> to vector<8x8x256xbf16>
    %21 = vector.extract_strided_slice %19 {offsets = [0, 8, 0], sizes = [8, 8, 256], strides = [1, 1, 1]} : vector<8x16x256xbf16> to vector<8x8x256xbf16>
    %cst_7 = arith.constant 0.000000e+00 : bf16
    %22 = vector.broadcast %cst_7 : bf16 to vector<8x1x256xbf16>
    %23 = vector.extract_strided_slice %21 {offsets = [0, 0, 0], sizes = [8, 7, 256], strides = [1, 1, 1]} : vector<8x8x256xbf16> to vector<8x7x256xbf16>
    %24 = tpu.concatenate %22, %23 in 1 : vector<8x1x256xbf16>, vector<8x7x256xbf16> -> vector<8x8x256xbf16>
    %25 = vector.extract_strided_slice %20 {offsets = [0, 1, 0], sizes = [8, 6, 256], strides = [1, 1, 1]} : vector<8x8x256xbf16> to vector<8x6x256xbf16>
    %26 = tpu.concatenate %25, %22, %22 in 1 : vector<8x6x256xbf16>, vector<8x1x256xbf16>, vector<8x1x256xbf16> -> vector<8x8x256xbf16>
    %c0_8 = arith.constant 0 : index
    %c0_9 = arith.constant 0 : index
    %27 = vector.load %arg5[%c0_8, %c0_9] : memref<1x256xf32, #tpu.memory_space<vmem>>, vector<1x256xf32>
    %28 = vector.shape_cast %24 : vector<8x8x256xbf16> to vector<64x256xbf16>
    %c0_10 = arith.constant 0 : index
    %c0_11 = arith.constant 0 : index
    %c0_12 = arith.constant 0 : index
    %29 = vector.load %arg4[%c0_10, %c0_11, %c0_12] : memref<3x256x256xbf16, #tpu.memory_space<vmem>>, vector<1x256x256xbf16>
    %30 = vector.shape_cast %29 : vector<1x256x256xbf16> to vector<256x256xbf16>
    %cst_13 = arith.constant dense<0.000000e+00> : vector<64x256xf32>
    %31 = tpu.matmul %28, %30, %cst_13 {dimension_numbers = #tpu.dot_dimension_numbers<[1], [0], [0], [1], [0, 0, 1, 1], [], []>} : vector<64x256xbf16>, vector<256x256xbf16>, vector<64x256xf32> -> vector<64x256xf32>
    %32 = vector.shape_cast %20 : vector<8x8x256xbf16> to vector<64x256xbf16>
    %c1 = arith.constant 1 : index
    %c0_14 = arith.constant 0 : index
    %c0_15 = arith.constant 0 : index
    %33 = vector.load %arg4[%c1, %c0_14, %c0_15] : memref<3x256x256xbf16, #tpu.memory_space<vmem>>, vector<1x256x256xbf16>
    %34 = vector.shape_cast %33 : vector<1x256x256xbf16> to vector<256x256xbf16>
    %cst_16 = arith.constant dense<0.000000e+00> : vector<64x256xf32>
    %35 = tpu.matmul %32, %34, %cst_16 {dimension_numbers = #tpu.dot_dimension_numbers<[1], [0], [0], [1], [0, 0, 1, 1], [], []>} : vector<64x256xbf16>, vector<256x256xbf16>, vector<64x256xf32> -> vector<64x256xf32>
    %36 = arith.addf %31, %35 : vector<64x256xf32>
    %37 = vector.shape_cast %21 : vector<8x8x256xbf16> to vector<64x256xbf16>
    %c2 = arith.constant 2 : index
    %c0_17 = arith.constant 0 : index
    %c0_18 = arith.constant 0 : index
    %38 = vector.load %arg4[%c2, %c0_17, %c0_18] : memref<3x256x256xbf16, #tpu.memory_space<vmem>>, vector<1x256x256xbf16>
    %39 = vector.shape_cast %38 : vector<1x256x256xbf16> to vector<256x256xbf16>
    %cst_19 = arith.constant dense<0.000000e+00> : vector<64x256xf32>
    %40 = tpu.matmul %37, %39, %cst_19 {dimension_numbers = #tpu.dot_dimension_numbers<[1], [0], [0], [1], [0, 0, 1, 1], [], []>} : vector<64x256xbf16>, vector<256x256xbf16>, vector<64x256xf32> -> vector<64x256xf32>
    %41 = arith.addf %36, %40 : vector<64x256xf32>
    %42 = vector.broadcast %27 : vector<1x256xf32> to vector<64x256xf32>
    %43 = arith.addf %41, %42 : vector<64x256xf32>
    %cst_20 = arith.constant 0.000000e+00 : f32
    %44 = vector.broadcast %cst_20 : f32 to vector<64x256xf32>
    %45 = arith.maximumf %43, %44 : vector<64x256xf32>
    %46 = vector.shape_cast %20 : vector<8x8x256xbf16> to vector<64x256xbf16>
    %c0_21 = arith.constant 0 : index
    %c0_22 = arith.constant 0 : index
    %c0_23 = arith.constant 0 : index
    %47 = vector.load %arg4[%c0_21, %c0_22, %c0_23] : memref<3x256x256xbf16, #tpu.memory_space<vmem>>, vector<1x256x256xbf16>
    %48 = vector.shape_cast %47 : vector<1x256x256xbf16> to vector<256x256xbf16>
    %cst_24 = arith.constant dense<0.000000e+00> : vector<64x256xf32>
    %49 = tpu.matmul %46, %48, %cst_24 {dimension_numbers = #tpu.dot_dimension_numbers<[1], [0], [0], [1], [0, 0, 1, 1], [], []>} : vector<64x256xbf16>, vector<256x256xbf16>, vector<64x256xf32> -> vector<64x256xf32>
    %50 = vector.shape_cast %21 : vector<8x8x256xbf16> to vector<64x256xbf16>
    %c1_25 = arith.constant 1 : index
    %c0_26 = arith.constant 0 : index
    %c0_27 = arith.constant 0 : index
    %51 = vector.load %arg4[%c1_25, %c0_26, %c0_27] : memref<3x256x256xbf16, #tpu.memory_space<vmem>>, vector<1x256x256xbf16>
    %52 = vector.shape_cast %51 : vector<1x256x256xbf16> to vector<256x256xbf16>
    %cst_28 = arith.constant dense<0.000000e+00> : vector<64x256xf32>
    %53 = tpu.matmul %50, %52, %cst_28 {dimension_numbers = #tpu.dot_dimension_numbers<[1], [0], [0], [1], [0, 0, 1, 1], [], []>} : vector<64x256xbf16>, vector<256x256xbf16>, vector<64x256xf32> -> vector<64x256xf32>
    %54 = arith.addf %49, %53 : vector<64x256xf32>
    %55 = vector.shape_cast %26 : vector<8x8x256xbf16> to vector<64x256xbf16>
    %c2_29 = arith.constant 2 : index
    %c0_30 = arith.constant 0 : index
    %c0_31 = arith.constant 0 : index
    %56 = vector.load %arg4[%c2_29, %c0_30, %c0_31] : memref<3x256x256xbf16, #tpu.memory_space<vmem>>, vector<1x256x256xbf16>
    %57 = vector.shape_cast %56 : vector<1x256x256xbf16> to vector<256x256xbf16>
    %cst_32 = arith.constant dense<0.000000e+00> : vector<64x256xf32>
    %58 = tpu.matmul %55, %57, %cst_32 {dimension_numbers = #tpu.dot_dimension_numbers<[1], [0], [0], [1], [0, 0, 1, 1], [], []>} : vector<64x256xbf16>, vector<256x256xbf16>, vector<64x256xf32> -> vector<64x256xf32>
    %59 = arith.addf %54, %58 : vector<64x256xf32>
    %60 = vector.broadcast %27 : vector<1x256xf32> to vector<64x256xf32>
    %61 = arith.addf %59, %60 : vector<64x256xf32>
    %cst_33 = arith.constant 0.000000e+00 : f32
    %62 = vector.broadcast %cst_33 : f32 to vector<64x256xf32>
    %63 = arith.maximumf %61, %62 : vector<64x256xf32>
    %64 = arith.maximumf %45, %63 : vector<64x256xf32>
    %65 = vector.extract_strided_slice %64 {offsets = [0, 16], sizes = [64, 240], strides = [1, 1]} : vector<64x256xf32> to vector<64x240xf32>
    %66 = vector.extract_strided_slice %64 {offsets = [0, 0], sizes = [64, 16], strides = [1, 1]} : vector<64x256xf32> to vector<64x16xf32>
    %67 = tpu.concatenate %65, %66 in 1 : vector<64x240xf32>, vector<64x16xf32> -> vector<64x256xf32>
    %68 = arith.maximumf %64, %67 : vector<64x256xf32>
    %69 = arith.truncf %68 : vector<64x256xf32> to vector<64x256xbf16>
    %70 = vector.shape_cast %69 : vector<64x256xbf16> to vector<8x8x256xbf16>
    %cst_34 = arith.constant 0.000000e+00 : f32
    %71 = vector.broadcast %cst_34 : f32 to vector<8x10xf32>
    %72 = vector.extract_strided_slice %70 {offsets = [0, 0, 0], sizes = [8, 1, 256], strides = [1, 1, 1]} : vector<8x8x256xbf16> to vector<8x1x256xbf16>
    %73 = vector.shape_cast %72 : vector<8x1x256xbf16> to vector<8x256xbf16>
    %c0_35 = arith.constant 0 : index
    %c0_36 = arith.constant 0 : index
    %74 = vector.load %arg6[%c0_35, %c0_36] : memref<1792x10xbf16, #tpu.memory_space<vmem>>, vector<256x10xbf16>
    %cst_37 = arith.constant dense<0.000000e+00> : vector<8x10xf32>
    %75 = tpu.matmul %73, %74, %cst_37 {dimension_numbers = #tpu.dot_dimension_numbers<[1], [0], [0], [1], [0, 0, 1, 1], [], []>} : vector<8x256xbf16>, vector<256x10xbf16>, vector<8x10xf32> -> vector<8x10xf32>
    %76 = arith.addf %71, %75 : vector<8x10xf32>
    %77 = vector.extract_strided_slice %70 {offsets = [0, 1, 0], sizes = [8, 1, 256], strides = [1, 1, 1]} : vector<8x8x256xbf16> to vector<8x1x256xbf16>
    %78 = vector.shape_cast %77 : vector<8x1x256xbf16> to vector<8x256xbf16>
    %c256 = arith.constant 256 : index
    %c0_38 = arith.constant 0 : index
    %79 = vector.load %arg6[%c256, %c0_38] : memref<1792x10xbf16, #tpu.memory_space<vmem>>, vector<256x10xbf16>
    %cst_39 = arith.constant dense<0.000000e+00> : vector<8x10xf32>
    %80 = tpu.matmul %78, %79, %cst_39 {dimension_numbers = #tpu.dot_dimension_numbers<[1], [0], [0], [1], [0, 0, 1, 1], [], []>} : vector<8x256xbf16>, vector<256x10xbf16>, vector<8x10xf32> -> vector<8x10xf32>
    %81 = arith.addf %76, %80 : vector<8x10xf32>
    %82 = vector.extract_strided_slice %70 {offsets = [0, 2, 0], sizes = [8, 1, 256], strides = [1, 1, 1]} : vector<8x8x256xbf16> to vector<8x1x256xbf16>
    %83 = vector.shape_cast %82 : vector<8x1x256xbf16> to vector<8x256xbf16>
    %c512 = arith.constant 512 : index
    %c0_40 = arith.constant 0 : index
    %84 = vector.load %arg6[%c512, %c0_40] : memref<1792x10xbf16, #tpu.memory_space<vmem>>, vector<256x10xbf16>
    %cst_41 = arith.constant dense<0.000000e+00> : vector<8x10xf32>
    %85 = tpu.matmul %83, %84, %cst_41 {dimension_numbers = #tpu.dot_dimension_numbers<[1], [0], [0], [1], [0, 0, 1, 1], [], []>} : vector<8x256xbf16>, vector<256x10xbf16>, vector<8x10xf32> -> vector<8x10xf32>
    %86 = arith.addf %81, %85 : vector<8x10xf32>
    %87 = vector.extract_strided_slice %70 {offsets = [0, 3, 0], sizes = [8, 1, 256], strides = [1, 1, 1]} : vector<8x8x256xbf16> to vector<8x1x256xbf16>
    %88 = vector.shape_cast %87 : vector<8x1x256xbf16> to vector<8x256xbf16>
    %c768 = arith.constant 768 : index
    %c0_42 = arith.constant 0 : index
    %89 = vector.load %arg6[%c768, %c0_42] : memref<1792x10xbf16, #tpu.memory_space<vmem>>, vector<256x10xbf16>
    %cst_43 = arith.constant dense<0.000000e+00> : vector<8x10xf32>
    %90 = tpu.matmul %88, %89, %cst_43 {dimension_numbers = #tpu.dot_dimension_numbers<[1], [0], [0], [1], [0, 0, 1, 1], [], []>} : vector<8x256xbf16>, vector<256x10xbf16>, vector<8x10xf32> -> vector<8x10xf32>
    %91 = arith.addf %86, %90 : vector<8x10xf32>
    %92 = vector.extract_strided_slice %70 {offsets = [0, 4, 0], sizes = [8, 1, 256], strides = [1, 1, 1]} : vector<8x8x256xbf16> to vector<8x1x256xbf16>
    %93 = vector.shape_cast %92 : vector<8x1x256xbf16> to vector<8x256xbf16>
    %c1024 = arith.constant 1024 : index
    %c0_44 = arith.constant 0 : index
    %94 = vector.load %arg6[%c1024, %c0_44] : memref<1792x10xbf16, #tpu.memory_space<vmem>>, vector<256x10xbf16>
    %cst_45 = arith.constant dense<0.000000e+00> : vector<8x10xf32>
    %95 = tpu.matmul %93, %94, %cst_45 {dimension_numbers = #tpu.dot_dimension_numbers<[1], [0], [0], [1], [0, 0, 1, 1], [], []>} : vector<8x256xbf16>, vector<256x10xbf16>, vector<8x10xf32> -> vector<8x10xf32>
    %96 = arith.addf %91, %95 : vector<8x10xf32>
    %97 = vector.extract_strided_slice %70 {offsets = [0, 5, 0], sizes = [8, 1, 256], strides = [1, 1, 1]} : vector<8x8x256xbf16> to vector<8x1x256xbf16>
    %98 = vector.shape_cast %97 : vector<8x1x256xbf16> to vector<8x256xbf16>
    %c1280 = arith.constant 1280 : index
    %c0_46 = arith.constant 0 : index
    %99 = vector.load %arg6[%c1280, %c0_46] : memref<1792x10xbf16, #tpu.memory_space<vmem>>, vector<256x10xbf16>
    %cst_47 = arith.constant dense<0.000000e+00> : vector<8x10xf32>
    %100 = tpu.matmul %98, %99, %cst_47 {dimension_numbers = #tpu.dot_dimension_numbers<[1], [0], [0], [1], [0, 0, 1, 1], [], []>} : vector<8x256xbf16>, vector<256x10xbf16>, vector<8x10xf32> -> vector<8x10xf32>
    %101 = arith.addf %96, %100 : vector<8x10xf32>
    %102 = vector.extract_strided_slice %70 {offsets = [0, 6, 0], sizes = [8, 1, 256], strides = [1, 1, 1]} : vector<8x8x256xbf16> to vector<8x1x256xbf16>
    %103 = vector.shape_cast %102 : vector<8x1x256xbf16> to vector<8x256xbf16>
    %c1536 = arith.constant 1536 : index
    %c0_48 = arith.constant 0 : index
    %104 = vector.load %arg6[%c1536, %c0_48] : memref<1792x10xbf16, #tpu.memory_space<vmem>>, vector<256x10xbf16>
    %cst_49 = arith.constant dense<0.000000e+00> : vector<8x10xf32>
    %105 = tpu.matmul %103, %104, %cst_49 {dimension_numbers = #tpu.dot_dimension_numbers<[1], [0], [0], [1], [0, 0, 1, 1], [], []>} : vector<8x256xbf16>, vector<256x10xbf16>, vector<8x10xf32> -> vector<8x10xf32>
    %106 = arith.addf %101, %105 : vector<8x10xf32>
    %c0_50 = arith.constant 0 : index
    %c0_51 = arith.constant 0 : index
    %107 = vector.load %arg7[%c0_50, %c0_51] : memref<1x10xf32, #tpu.memory_space<vmem>>, vector<1x10xf32>
    %108 = vector.broadcast %107 : vector<1x10xf32> to vector<8x10xf32>
    %109 = arith.addf %106, %108 : vector<8x10xf32>
    %c0_52 = arith.constant 0 : index
    %c0_53 = arith.constant 0 : index
    %110 = vector.load %arg8[%c0_52, %c0_53] : memref<8x10xf32, #tpu.memory_space<vmem>>, vector<8x10xf32>
    tpu.vector_store %arg8[%c0_52, %c0_53], %109 {strides = array<i32>} : memref<8x10xf32, #tpu.memory_space<vmem>>, vector<8x10xf32>,
    %cst_54 = arith.constant dense<0xFF800000> : vector<8xf32>
    %111 = vector.multi_reduction <maximumf>, %109, %cst_54 [1] : vector<8x10xf32> to vector<8xf32>
    %112 = vector.shape_cast %111 : vector<8xf32> to vector<8x1xf32>
    %113 = vector.broadcast %112 : vector<8x1xf32> to vector<8x10xf32>
    %114 = arith.subf %109, %113 : vector<8x10xf32>
    %115 = math.exp %114 : vector<8x10xf32>
    %cst_55 = arith.constant dense<0.000000e+00> : vector<8xf32>
    %116 = vector.multi_reduction <add>, %115, %cst_55 [1] : vector<8x10xf32> to vector<8xf32>
    %117 = vector.shape_cast %116 : vector<8xf32> to vector<8x1xf32>
    %118 = vector.broadcast %117 : vector<8x1xf32> to vector<8x10xf32>
    %119 = arith.divf %115, %118 : vector<8x10xf32>
    %c0_56 = arith.constant 0 : index
    %c0_57 = arith.constant 0 : index
    %120 = vector.load %arg9[%c0_56, %c0_57] : memref<8x10xf32, #tpu.memory_space<vmem>>, vector<8x10xf32>
    tpu.vector_store %arg9[%c0_56, %c0_57], %119 {strides = array<i32>} : memref<8x10xf32, #tpu.memory_space<vmem>>, vector<8x10xf32>,
    return
  }
  func.func @transform_0(%arg0: i32) -> (i32, i32, i32) {
    %c0_i32 = arith.constant 0 : i32
    %c0_i32_0 = arith.constant 0 : i32
    %c0_i32_1 = arith.constant 0 : i32
    return %arg0, %c0_i32, %c0_i32_0 : i32, i32, i32
  }
  func.func @transform_1(%arg0: i32) -> (i32, i32) {
    %c0_i32 = arith.constant 0 : i32
    %c0_i32_0 = arith.constant 0 : i32
    %c0_i32_1 = arith.constant 0 : i32
    return %c0_i32, %c0_i32_0 : i32, i32
  }
  func.func @transform_2(%arg0: i32) -> (i32, i32) {
    %c0_i32 = arith.constant 0 : i32
    %c0_i32_0 = arith.constant 0 : i32
    %c0_i32_1 = arith.constant 0 : i32
    return %c0_i32, %c0_i32_0 : i32, i32
  }
  func.func @transform_3(%arg0: i32) -> (i32, i32, i32) {
    %c0_i32 = arith.constant 0 : i32
    %c0_i32_0 = arith.constant 0 : i32
    %c0_i32_1 = arith.constant 0 : i32
    %c0_i32_2 = arith.constant 0 : i32
    return %c0_i32, %c0_i32_0, %c0_i32_1 : i32, i32, i32
  }
  func.func @transform_4(%arg0: i32) -> (i32, i32) {
    %c0_i32 = arith.constant 0 : i32
    %c0_i32_0 = arith.constant 0 : i32
    %c0_i32_1 = arith.constant 0 : i32
    return %c0_i32, %c0_i32_0 : i32, i32
  }
  func.func @transform_5(%arg0: i32) -> (i32, i32) {
    %c0_i32 = arith.constant 0 : i32
    %c0_i32_0 = arith.constant 0 : i32
    %c0_i32_1 = arith.constant 0 : i32
    return %c0_i32, %c0_i32_0 : i32, i32
  }
  func.func @transform_6(%arg0: i32) -> (i32, i32) {
    %c0_i32 = arith.constant 0 : i32
    %c0_i32_0 = arith.constant 0 : i32
    %c0_i32_1 = arith.constant 0 : i32
    return %c0_i32, %c0_i32_0 : i32, i32
  }
  func.func @transform_7(%arg0: i32) -> (i32, i32) {
    %c0_i32 = arith.constant 0 : i32
    %c0_i32_0 = arith.constant 0 : i32
    return %arg0, %c0_i32 : i32, i32
  }
  func.func @transform_8(%arg0: i32) -> (i32, i32) {
    %c0_i32 = arith.constant 0 : i32
    %c0_i32_0 = arith.constant 0 : i32
    return %arg0, %c0_i32 : i32, i32
  }
}

</mosaic_0001>

<bundles_post_ra>
// kernel: convnet_forward.1
= control target key start
LH: loop header
LB: loop body
LE: loop exit
PB: predicated region body
PF: predicated region fallthrough
CT: control target
= control target key end

     0   :  { %v4985_v3 = vmov 0.0   ;;  %vm194_vm0 = vcmask 1041408   ;;  %vm4986_vm1 = vmmov 1   ;;  %vm97_vm3 = vcmask 736256   ;;  %s4987_s12 = smov 120   ;;  %s4988_s30 = smov 112   ;;  %s6874_s1 = inlined_call_operand.vmem [shape: f32[90,256], index: 1, kind: input, shape index: {}]   ;;  %s6875_s0 = inlined_call_operand.vmem [shape: f32[8,32,90], index: 0, kind: input, shape index: {}]   ;;  %s6876_s3 = inlined_call_operand.vmem [shape: bf16[3,256,256], index: 3, kind: input, shape index: {}]   ;;  %s6877_s2 = inlined_call_operand.vmem [shape: f32[1,256], index: 2, kind: input, shape index: {}]   ;;  %s6878_s4 = inlined_call_operand.vmem [shape: f32[1,256], index: 4, kind: input, shape index: {}]   ;;  %s6879_s5 = inlined_call_operand.vmem [shape: bf16[1792,10], index: 5, kind: input, shape index: {}]   ;;  %s6880_s6 = inlined_call_operand.vmem [shape: f32[1,10], index: 6, kind: input, shape index: {}]   ;;  %s6881_s7 = inlined_call_operand.vmem [shape: f32[8,10], index: 7, kind: output, shape index: {0}]   ;;  %s6882_s8 = inlined_call_operand.vmem [shape: f32[8,10], index: 8, kind: output, shape index: {1}]  }
   0x1   :  { %v62_v0 = vld [vmem:[%s6874_s1 + $0x8] sm:$0xff]  ;;  %v64_v1 = vld [vmem:[%s6874_s1 + $0x18] sm:$0xff]  ;;  %v61_v2 = vld [vmem:[%s6874_s1] sm:$0xff]  ;;  %265 = vmatprep.mubr.f32.mxu0 %v4985_v3  ;;  %vm650_vm4 = vcmask 982016   ;;  %vm923_vm5 = vcmask 1040384   ;;  %vm974_vm7 = vcmask 1042432  }
   0x2   :  { %v4511_v4 = vpack.c.bf16 %v64_v1, %v62_v0  ;;  %v63_v5 = vld [vmem:[%s6874_s1 + $0x10] sm:$0xff]  ;;  %v66_v6 = vld [vmem:[%s6874_s1 + $0x28] sm:$0xff]  ;;  %v68_v7 = vld [vmem:[%s6874_s1 + $0x38] sm:$0xff]  ;;  %vm924_vm6 = vsmask.f32 256  ;;  %vm1024_vm8 = vcmask 1043456  }
   0x3   :  { %v4513_v8 = vpack.c.bf16 %v63_v5, %v61_v2  ;;  %v4515_v9 = vpack.c.bf16 %v68_v7, %v66_v6  ;;  %v65_v10 = vld [vmem:[%s6874_s1 + $0x20] sm:$0xff]  ;;  %v67_v11 = vld [vmem:[%s6874_s1 + $0x30] sm:$0xff]  ;;  %v70_v12 = vld [vmem:[%s6874_s1 + $0x48] sm:$0xff]  ;;  %vm1025_vm9 = vsmask.f32 3328  ;;  %vm2407_vm12 = vcmask 916480  }
   0x4   :  { %4512 = vmatprep.subr.bf16.mxu0 %v4511_v4  ;;  %v72_v13 = vld [vmem:[%s6874_s1 + $0x58] sm:$0xff]  ;;  %v4517_v14 = vpack.c.bf16 %v67_v11, %v65_v10  ;;  %v69_v16 = vld [vmem:[%s6874_s1 + $0x40] sm:$0xff]  ;;  %v71_v17 = vld [vmem:[%s6874_s1 + $0x50] sm:$0xff]  ;;  %vm2593_vm13 = vcmask 1041409   ;;  %vm2596_vm14 = vcmask 1042434   ;;  %vm2599_vm15 = vcmask 1043459  }
   0x5   :  { %4514 = vmatpush1.bf16.msra.mxu0 %v4513_v8  ;;  %v4519_v15 = vpack.c.bf16 %v72_v13, %v70_v12  ;;  %v74_v18 = vld [vmem:[%s6874_s1 + $0x68] sm:$0xff]  ;;  %v76_v19 = vld [vmem:[%s6874_s1 + $0x78] sm:$0xff]  ;;  %v4521_v20 = vpack.c.bf16 %v71_v17, %v69_v16  ;;  %v73_v22 = vld [vmem:[%s6874_s1 + $0x60] sm:$0xff] }
   0x6   :  { %4516 = vmatprep.subr.bf16.mxu0 %v4515_v9  ;;  %v4523_v21 = vpack.c.bf16 %v76_v19, %v74_v18  ;;  %v75_v23 = vld [vmem:[%s6874_s1 + $0x70] sm:$0xff]  ;;  %v78_v24 = vld [vmem:[%s6874_s1 + $0x88] sm:$0xff]  ;;  %v80_v25 = vld [vmem:[%s6874_s1 + $0x98] sm:$0xff]  ;;  %v87_v19 = vlaneseq }
   0x7   :  { %v4525_v26 = vpack.c.bf16 %v75_v23, %v73_v22  ;;  %v4527_v27 = vpack.c.bf16 %v80_v25, %v78_v24  ;;  %v77_v28 = vld [vmem:[%s6874_s1 + $0x80] sm:$0xff]  ;;  %v79_v29 = vld [vmem:[%s6874_s1 + $0x90] sm:$0xff]  ;;  %v82_v30 = vld [vmem:[%s6874_s1 + $0xa8] sm:$0xff] }
   0x8   :  { %v84_v31 = vld [vmem:[%s6874_s1 + $0xb8] sm:$0x3]  ;;  %v4529_v32 = vpack.c.bf16 %v79_v29, %v77_v28  ;;  %v81_v34 = vld [vmem:[%s6874_s1 + $0xa0] sm:$0xff]  ;;  %v83_v35 = vld [vmem:[%s6874_s1 + $0xb0] sm:$0x3]  ;;  %v5314_v22 = vshrl.u32 %v87_v19, 7 }
   0x9   :  { %4518 = vmatpush1.bf16.msra.mxu0 %v4517_v14  ;;  %v4531_v33 = vpack.c.bf16 %v84_v31, %v82_v30  ;;  %vm4532_vm2 = vmpackc.low %vm194_vm0, %vm4986_vm1  ;;  %v4534_v36 = vpack.c.bf16 %v83_v35, %v81_v34  ;;  %v29_v37 = vld [vmem:[%s6875_s0] sm:$0xff]  ;;  %v30_v38 = vld [vmem:[%s6875_s0 + $0x8] sm:$0xff]  ;;  %vm2602_vm0 = vcmask 1044484   ;;  %vm2605_vm1 = vcmask 1045509  }
   0xa   :  { %4520 = vmatprep.subr.bf16.mxu0 %v4519_v15  ;;  %v31_v39 = vld [vmem:[%s6875_s0 + $0x10] sm:$0xff]  ;;  %v32_v40 = vld [vmem:[%s6875_s0 + $0x18] sm:$0xff]  ;;  %v33_v41 = vld [vmem:[%s6875_s0 + $0x20] sm:$0xff]  ;;  %v6884_v25 = vsub.s32 0, %v5314_v22 }
   0xb   :  { %v34_v42 = vld [vmem:[%s6875_s0 + $0x28] sm:$0xff]  ;;  %v35_v43 = vld [vmem:[%s6875_s0 + $0x30] sm:$0xff]  ;;  %v36_v44 = vld [vmem:[%s6875_s0 + $0x38] sm:$0xff] }
   0xc   :  { %v37_v45 = vld [vmem:[%s6875_s0 + $0x40] sm:$0xff]  ;;  %v38_v46 = vld [vmem:[%s6875_s0 + $0x48] sm:$0xff]  ;;  %v39_v47 = vld [vmem:[%s6875_s0 + $0x50] sm:$0xff] }
   0xd   :  { %4522 = vmatpush1.bf16.msra.mxu0 %v4521_v20  ;;  %v40_v48 = vld [vmem:[%s6875_s0 + $0x58] sm:$0xff]  ;;  %v41_v49 = vld [vmem:[%s6875_s0 + $0x60] sm:$0xff]  ;;  %v42_v50 = vld [vmem:[%s6875_s0 + $0x68] sm:$0xff] }
   0xe   :  { %4524 = vmatprep.subr.bf16.mxu0 %v4523_v21  ;;  %v43_v51 = vld [vmem:[%s6875_s0 + $0x70] sm:$0xff]  ;;  %v44_v52 = vld [vmem:[%s6875_s0 + $0x78] sm:$0xff]  ;;  %v45_v53 = vld [vmem:[%s6875_s0 + $0x80] sm:$0xff] }
   0xf   :  { %v46_v54 = vld [vmem:[%s6875_s0 + $0x88] sm:$0xff]  ;;  %v47_v55 = vld [vmem:[%s6875_s0 + $0x90] sm:$0xff]  ;;  %v48_v56 = vld [vmem:[%s6875_s0 + $0x98] sm:$0xff] }
  0x10   :  { %v49_v57 = vld [vmem:[%s6875_s0 + $0xa0] sm:$0xff]  ;;  %v50_v58 = vld [vmem:[%s6875_s0 + $0xa8] sm:$0xff]  ;;  %v51_v59 = vld [vmem:[%s6875_s0 + $0xb0] sm:$0xff] }
  0x11   :  { %4526 = vmatpush1.bf16.msra.mxu0 %v4525_v26  ;;  %v52_v60 = vld [vmem:[%s6875_s0 + $0xb8] sm:$0xff]  ;;  %v53_v61 = vld [vmem:[%s6875_s0 + $0xc0] sm:$0xff]  ;;  %v54_v62 = vld [vmem:[%s6875_s0 + $0xc8] sm:$0xff]  ;;  %v6883_v26 = vsub.s32 1, %v5314_v22 }
  0x12   :  { %4528 = vmatprep.subr.bf16.mxu0 %v4527_v27  ;;  %v55_v63 = vld [vmem:[%s6875_s0 + $0xd0] sm:$0xff]  ;;  %v56_v0 = vld [vmem:[%s6875_s0 + $0xd8] sm:$0xff]  ;;  %v57_v1 = vld [vmem:[%s6875_s0 + $0xe0] sm:$0xff] }
  0x13   :  { %v58_v2 = vld [vmem:[%s6875_s0 + $0xe8] sm:$0xff]  ;;  %v59_v4 = vld [vmem:[%s6875_s0 + $0xf0] sm:$0xff]  ;;  %v60_v5 = vld [vmem:[%s6875_s0 + $0xf8] sm:$0xff] }
  0x14   :  { %v4725_v6 = vld [vmem:[%s6876_s3 + $0x100] ss:$8 sps:$4 sm:$0xff]   ;;  %v4727_v7 = vld [vmem:[%s6876_s3 + $0x104] ss:$8 sps:$4 sm:$0xff]   ;;  %v4730_v8 = vld [vmem:[%s6876_s3 + $0x114] ss:$8 sps:$4 sm:$0xff]  }
  0x15   :  { %4530 = vmatpush1.bf16.msra.mxu0 %v4529_v32  ;;  %1349 = vmatprep.subr.bf16.mxu1 %v4727_v7  ;;  %v4731_v9 = vld [vmem:[%s6876_s3 + $0x120] ss:$8 sps:$4 sm:$0xff]   ;;  %v4733_v10 = vld [vmem:[%s6876_s3 + $0x124] ss:$8 sps:$4 sm:$0xff]   ;;  %v4734_v11 = vld [vmem:[%s6876_s3 + $0x130] ss:$8 sps:$4 sm:$0xff]  }
  0x16   :  { %4533 = vmatprep.subr.msk.bf16.mxu0 %vm4532_vm2, %v4531_v33  ;;  %1350 = vmatpush1.bf16.msra.mxu1 %v4725_v6  ;;  %v4736_v12 = vld [vmem:[%s6876_s3 + $0x134] ss:$8 sps:$4 sm:$0xff]   ;;  %v4739_v13 = vld [vmem:[%s6876_s3 + $0x144] ss:$8 sps:$4 sm:$0xff]   ;;  %v4737_v14 = vld [vmem:[%s6876_s3 + $0x140] ss:$8 sps:$4 sm:$0xff]  }
  0x17   :  { %1351 = vmatprep.subr.bf16.mxu1 %v4730_v8  ;;  %v4742_v15 = vld [vmem:[%s6876_s3 + $0x154] ss:$8 sps:$4 sm:$0xff]   ;;  %v4740_v16 = vld [vmem:[%s6876_s3 + $0x150] ss:$8 sps:$4 sm:$0xff]   ;;  %v4743_v17 = vld [vmem:[%s6876_s3 + $0x164] ss:$8 sps:$4 sm:$0xff]  }
  0x18   :  { %v4745_v18 = vld [vmem:[%s6876_s3 + $0x160] ss:$8 sps:$4 sm:$0xff]   ;;  %v4746_v20 = vld [vmem:[%s6876_s3 + $0x174] ss:$8 sps:$4 sm:$0xff]   ;;  %v4748_v21 = vld [vmem:[%s6876_s3 + $0x170] ss:$8 sps:$4 sm:$0xff]  }
  0x19   :  { %4536 = vmatpush1.bf16.msk.msra.mxu0 %vm4532_vm2, %v4534_v36  ;;  %v4749_v23 = vld [vmem:[%s6876_s3 + $0x184] ss:$8 sps:$4 sm:$0xff]   ;;  %v4751_v24 = vld [vmem:[%s6876_s3 + $0x180] ss:$8 sps:$4 sm:$0xff]   ;;  %v4752_v27 = vld [vmem:[%s6876_s3 + $0x194] ss:$8 sps:$4 sm:$0xff]  }
  0x1a   :  { %2028 = vmatprep.subr.bf16.mxu0 %v4727_v7  ;;  %v85_v28 = vld [vmem:[%s6877_s2] sm:$0x3]  ;;  %v4754_v30 = vld [vmem:[%s6876_s3 + $0x190] ss:$8 sps:$4 sm:$0xff]   ;;  %v4755_v34 = vld [vmem:[%s6876_s3 + $0x1a4] ss:$8 sps:$4 sm:$0xff]  }
  0x1b   :  { %v5335_v32 = vrot.slane %v85_v28, %v6884_v25  ;;  %v5339_v33 = vrot.slane %v85_v28, %v6883_v26  ;;  %v4757_v36 = vld [vmem:[%s6876_s3 + $0x1a0] ss:$8 sps:$4 sm:$0xff]   ;;  %vm5606_vm10 = vmand %vm923_vm5, %vm924_vm6  ;;  %vm2608_vm2 = vcmask 1046534  }
  0x1c   :  { %3972 = vmatmul.mubr.msk.f32.vlgmr.msra.gmra.mrb[0].mxu0 %vm97_vm3, %v29_v37  ;;  %vm5613_vm11 = vmand %vm1024_vm8, %vm1025_vm9 }
  0x1d   :  { %271 = vmatprep.mubr.f32.mxu0 %v4985_v3  ;;  %2029 = vmatpush1.bf16.msra.mxu0 %v4725_v6 }
  0x1e   :  { %2030 = vmatprep.subr.bf16.mxu0 %v4730_v8 }
  0x20   :  { %3973 = vmatmul.mubr.msk.f32.gmra.mrb[2].mxu0 %vm97_vm3, %v30_v38 }
  0x21   :  { %277 = vmatprep.mubr.f32.mxu0 %v4985_v3 }
  0x24   :  { %3974 = vmatmul.mubr.msk.f32.gmra.mrb[4].mxu0 %vm97_vm3, %v31_v39 }
  0x25   :  { %283 = vmatprep.mubr.f32.mxu0 %v4985_v3 }
  0x28   :  { %3975 = vmatmul.mubr.msk.f32.gmra.mrb[6].mxu0 %vm97_vm3, %v32_v40  ;;  %v4758_v40 = vld [vmem:[%s6876_s3 + $0x1b4] ss:$8 sps:$4 sm:$0xff]  }
  0x29   :  { %289 = vmatprep.mubr.f32.mxu0 %v4985_v3 }
  0x2c   :  { %3976 = vmatmul.mubr.msk.f32.gmra.mrb[8].mxu0 %vm97_vm3, %v33_v41 }
  0x2d   :  { %295 = vmatprep.mubr.f32.mxu0 %v4985_v3 }
  0x30   :  { %3977 = vmatmul.mubr.msk.f32.gmra.mrb[10].mxu0 %vm97_vm3, %v34_v42  ;;  %v4760_v42 = vld [vmem:[%s6876_s3 + $0x1b0] ss:$8 sps:$4 sm:$0xff]  }
  0x31   :  { %301 = vmatprep.mubr.f32.mxu0 %v4985_v3 }
  0x34   :  { %3978 = vmatmul.mubr.msk.f32.gmra.mrb[12].mxu0 %vm97_vm3, %v35_v43 }
  0x35   :  { %307 = vmatprep.mubr.f32.mxu0 %v4985_v3 }
  0x38   :  { %3979 = vmatmul.mubr.msk.f32.gmra.mrb[14].mxu0 %vm97_vm3, %v36_v44 }
  0x39   :  { %313 = vmatprep.mubr.f32.mxu0 %v4985_v3 }
  0x3c   :  { %3980 = vmatmul.mubr.msk.f32.gmra.mrb[16].mxu0 %vm97_vm3, %v37_v45 }
  0x3d   :  { %319 = vmatprep.mubr.f32.mxu0 %v4985_v3 }
  0x40   :  { %3981 = vmatmul.mubr.msk.f32.gmra.mrb[18].mxu0 %vm97_vm3, %v38_v46 }
  0x41   :  { %325 = vmatprep.mubr.f32.mxu0 %v4985_v3 }
  0x44   :  { %3982 = vmatmul.mubr.msk.f32.gmra.mrb[20].mxu0 %vm97_vm3, %v39_v47 }
  0x45   :  { %331 = vmatprep.mubr.f32.mxu0 %v4985_v3 }
  0x48   :  { %3983 = vmatmul.mubr.msk.f32.gmra.mrb[22].mxu0 %vm97_vm3, %v40_v48 }
  0x49   :  { %337 = vmatprep.mubr.f32.mxu0 %v4985_v3 }
  0x4c   :  { %3984 = vmatmul.mubr.msk.f32.gmra.mrb[24].mxu0 %vm97_vm3, %v41_v49 }
  0x4d   :  { %343 = vmatprep.mubr.f32.mxu0 %v4985_v3 }
  0x50   :  { %3985 = vmatmul.mubr.msk.f32.gmra.mrb[26].mxu0 %vm97_vm3, %v42_v50  ;;  %v4761_v50 = vld [vmem:[%s6876_s3 + $0x1c4] ss:$8 sps:$4 sm:$0xff]  }
  0x51   :  { %349 = vmatprep.mubr.f32.mxu0 %v4985_v3 }
  0x54   :  { %3986 = vmatmul.mubr.msk.f32.gmra.mrb[28].mxu0 %vm97_vm3, %v43_v51 }
  0x55   :  { %355 = vmatprep.mubr.f32.mxu0 %v4985_v3 }
  0x58   :  { %3987 = vmatmul.mubr.msk.f32.gmra.mrb[30].mxu0 %vm97_vm3, %v44_v52 }
  0x59   :  { %361 = vmatprep.mubr.f32.mxu0 %v4985_v3 }
  0x5c   :  { %3988 = vmatmul.mubr.msk.f32.gmra.mrb[32].mxu0 %vm97_vm3, %v45_v53 }
  0x5d   :  { %367 = vmatprep.mubr.f32.mxu0 %v4985_v3 }
  0x60   :  { %3989 = vmatmul.mubr.msk.f32.gmra.mrb[34].mxu0 %vm97_vm3, %v46_v54  ;;  %v4763_v54 = vld [vmem:[%s6876_s3 + $0x1c0] ss:$8 sps:$4 sm:$0xff]  }
  0x61   :  { %373 = vmatprep.mubr.f32.mxu0 %v4985_v3 }
  0x64   :  { %3990 = vmatmul.mubr.msk.f32.gmra.mrb[36].mxu0 %vm97_vm3, %v47_v55  ;;  %v4764_v55 = vld [vmem:[%s6876_s3 + $0x1d4] ss:$8 sps:$4 sm:$0xff]  }
  0x65   :  { %379 = vmatprep.mubr.f32.mxu0 %v4985_v3 }
  0x68   :  { %3991 = vmatmul.mubr.msk.f32.gmra.mrb[38].mxu0 %vm97_vm3, %v48_v56 }
  0x69   :  { %385 = vmatprep.mubr.f32.mxu0 %v4985_v3 }
  0x6c   :  { %3992 = vmatmul.mubr.msk.f32.gmra.mrb[40].mxu0 %vm97_vm3, %v49_v57 }
  0x6d   :  { %391 = vmatprep.mubr.f32.mxu0 %v4985_v3 }
  0x70   :  { %3993 = vmatmul.mubr.msk.f32.gmra.mrb[42].mxu0 %vm97_vm3, %v50_v58 }
  0x71   :  { %397 = vmatprep.mubr.f32.mxu0 %v4985_v3 }
  0x74   :  { %3994 = vmatmul.mubr.msk.f32.gmra.mrb[44].mxu0 %vm97_vm3, %v51_v59 }
  0x75   :  { %403 = vmatprep.mubr.f32.mxu0 %v4985_v3 }
  0x78   :  { %3995 = vmatmul.mubr.msk.f32.gmra.mrb[46].mxu0 %vm97_vm3, %v52_v60 }
  0x79   :  { %409 = vmatprep.mubr.f32.mxu0 %v4985_v3 }
  0x7c   :  { %3996 = vmatmul.mubr.msk.f32.gmra.mrb[48].mxu0 %vm97_vm3, %v53_v61  ;;  %v4766_v61 = vld [vmem:[%s6876_s3 + $0x1d0] ss:$8 sps:$4 sm:$0xff]  }
  0x7d   :  { %415 = vmatprep.mubr.f32.mxu0 %v4985_v3 }
  0x80   :  { %3997 = vmatmul.mubr.msk.f32.gmra.mrb[50].mxu0 %vm97_vm3, %v54_v62 }
  0x81   :  { %421 = vmatprep.mubr.f32.mxu0 %v4985_v3 }
  0x84   :  { %3998 = vmatmul.mubr.msk.f32.gmra.mrb[52].mxu0 %vm97_vm3, %v55_v63 }
  0x85   :  { %427 = vmatprep.mubr.f32.mxu0 %v4985_v3 }
  0x88   :  { %3999 = vmatmul.mubr.msk.f32.gmra.mrb[54].mxu0 %vm97_vm3, %v56_v0 }
  0x89   :  { %433 = vmatprep.mubr.f32.mxu0 %v4985_v3 }
  0x8c   :  { %4000 = vmatmul.mubr.msk.f32.gmra.mrb[56].mxu0 %vm97_vm3, %v57_v1 }
  0x8d   :  { %439 = vmatprep.mubr.f32.mxu0 %v4985_v3 }
  0x90   :  { %4001 = vmatmul.mubr.msk.f32.gmra.mrb[58].mxu0 %vm97_vm3, %v58_v2 }
  0x91   :  { %445 = vmatprep.mubr.f32.mxu0 %v4985_v3 }
  0x94   :  { %4002 = vmatmul.mubr.msk.f32.gmra.mrb[60].mxu0 %vm97_vm3, %v59_v4 }
  0x95   :  { %451 = vmatprep.mubr.f32.mxu0 %v4985_v3  ;;  %v4728_v3 = vld [vmem:[%s6876_s3 + $0x110] ss:$8 sps:$4 sm:$0xff]  }
  0x96   :  { %2031 = vmatpush1.bf16.msra.mxu0 %v4728_v3  ;;  %1352 = vmatpush1.bf16.msra.mxu1 %v4728_v3  ;;  %v4767_v3 = vld [vmem:[%s6876_s3 + $0x1e4] ss:$8 sps:$4 sm:$0xff]  }
  0x97   :  { %2032 = vmatprep.subr.bf16.mxu0 %v4733_v10  ;;  %1353 = vmatprep.subr.bf16.mxu1 %v4733_v10  ;;  %v4769_v10 = vld [vmem:[%s6876_s3 + $0x1e0] ss:$8 sps:$4 sm:$0xff]  }
  0x98   :  { %4003 = vmatmul.mubr.msk.f32.gmra.mrb[62].mxu0 %vm97_vm3, %v60_v5  ;;  %vm2611_vm3 = vcmask 1047559  }
  0x9a   :  { %2033 = vmatpush1.bf16.msra.mxu0 %v4731_v9  ;;  %1354 = vmatpush1.bf16.msra.mxu1 %v4731_v9 }
  0x9b   :  { %2034 = vmatprep.subr.bf16.mxu0 %v4736_v12  ;;  %1355 = vmatprep.subr.bf16.mxu1 %v4736_v12 }
  0x9e   :  { %2035 = vmatpush1.bf16.msra.mxu0 %v4734_v11  ;;  %1356 = vmatpush1.bf16.msra.mxu1 %v4734_v11 }
  0x9f   :  { %2036 = vmatprep.subr.bf16.mxu0 %v4739_v13  ;;  %1357 = vmatprep.subr.bf16.mxu1 %v4739_v13  ;;  %v4770_v13 = vld [vmem:[%s6876_s3 + $0x1f4] ss:$8 sps:$4 sm:$0xff]  }
  0xa2   :  { %2037 = vmatpush1.bf16.msra.mxu0 %v4737_v14  ;;  %1358 = vmatpush1.bf16.msra.mxu1 %v4737_v14 }
  0xa3   :  { %2038 = vmatprep.subr.bf16.mxu0 %v4742_v15  ;;  %1359 = vmatprep.subr.bf16.mxu1 %v4742_v15 }
  0xa6   :  { %2039 = vmatpush1.bf16.msra.mxu0 %v4740_v16  ;;  %1360 = vmatpush1.bf16.msra.mxu1 %v4740_v16  ;;  %v4772_v16 = vld [vmem:[%s6876_s3 + $0x1f0] ss:$8 sps:$4 sm:$0xff]  }
  0xa7   :  { %1361 = vmatprep.subr.bf16.mxu1 %v4743_v17  ;;  %2040 = vmatprep.subr.bf16.mxu0 %v4743_v17 }
  0xaa   :  { %1362 = vmatpush1.bf16.msra.mxu1 %v4745_v18  ;;  %2041 = vmatpush1.bf16.msra.mxu0 %v4745_v18 }
  0xab   :  { %1363 = vmatprep.subr.bf16.mxu1 %v4746_v20  ;;  %2042 = vmatprep.subr.bf16.mxu0 %v4746_v20 }
  0xae   :  { %1364 = vmatpush1.bf16.msra.mxu1 %v4748_v21  ;;  %2043 = vmatpush1.bf16.msra.mxu0 %v4748_v21 }
  0xaf   :  { %1365 = vmatprep.subr.bf16.mxu1 %v4749_v23  ;;  %2044 = vmatprep.subr.bf16.mxu0 %v4749_v23 }
  0xb2   :  { %1366 = vmatpush1.bf16.msra.mxu1 %v4751_v24  ;;  %2045 = vmatpush1.bf16.msra.mxu0 %v4751_v24 }
  0xb3   :  { %1367 = vmatprep.subr.bf16.mxu1 %v4752_v27  ;;  %2046 = vmatprep.subr.bf16.mxu0 %v4752_v27 }
  0xb6   :  { %1368 = vmatpush1.bf16.msra.mxu1 %v4754_v30  ;;  %2047 = vmatpush1.bf16.msra.mxu0 %v4754_v30 }
  0xb7   :  { %1369 = vmatprep.subr.bf16.mxu1 %v4755_v34  ;;  %2048 = vmatprep.subr.bf16.mxu0 %v4755_v34 }
  0xba   :  { %1370 = vmatpush1.bf16.msra.mxu1 %v4757_v36  ;;  %2049 = vmatpush1.bf16.msra.mxu0 %v4757_v36 }
  0xbb   :  { %1371 = vmatprep.subr.bf16.mxu1 %v4758_v40  ;;  %2050 = vmatprep.subr.bf16.mxu0 %v4758_v40 }
  0xbe   :  { %1372 = vmatpush1.bf16.msra.mxu1 %v4760_v42  ;;  %2051 = vmatpush1.bf16.msra.mxu0 %v4760_v42 }
  0xbf   :  { %1373 = vmatprep.subr.bf16.mxu1 %v4761_v50  ;;  %2052 = vmatprep.subr.bf16.mxu0 %v4761_v50 }
  0xc2   :  { %1374 = vmatpush1.bf16.msra.mxu1 %v4763_v54  ;;  %2053 = vmatpush1.bf16.msra.mxu0 %v4763_v54 }
  0xc3   :  { %1375 = vmatprep.subr.bf16.mxu1 %v4764_v55  ;;  %2054 = vmatprep.subr.bf16.mxu0 %v4764_v55 }
  0xc6   :  { %1376 = vmatpush1.bf16.msra.mxu1 %v4766_v61  ;;  %2055 = vmatpush1.bf16.msra.mxu0 %v4766_v61 }
  0xc7   :  { %1377 = vmatprep.subr.bf16.mxu1 %v4767_v3  ;;  %2056 = vmatprep.subr.bf16.mxu0 %v4767_v3 }
  0xca   :  { %1378 = vmatpush1.bf16.msra.mxu1 %v4769_v10  ;;  %2057 = vmatpush1.bf16.msra.mxu0 %v4769_v10 }
  0xcb   :  { %1379 = vmatprep.subr.bf16.mxu1 %v4770_v13  ;;  %2058 = vmatprep.subr.bf16.mxu0 %v4770_v13 }
  0xce   :  { %1380 = vmatpush1.bf16.msra.mxu1 %v4772_v16  ;;  %2059 = vmatpush1.bf16.msra.mxu0 %v4772_v16 }
  0xef   :  { %v267_v29 = vpop.f32.mrb[0].mxu0 }
  0xf0   :  { %v269_v31 = vpop.f32.mrb[1].mxu0  ;;  %v268_v38 = vadd.f32 %v267_v29, %v5335_v32 }
  0xf1   :  { %v270_v39 = vadd.f32 %v269_v31, %v5339_v33 }
  0xf2   :  { %v458_v46 = vmax.f32 %v268_v38, 0.0 }
  0xf3   :  { %v273_v35 = vpop.f32.mrb[2].mxu0  ;;  %v459_v47 = vmax.f32 %v270_v39, 0.0 }
  0xf4   :  { %v275_v37 = vpop.f32.mrb[3].mxu0  ;;  %v274_v48 = vadd.f32 %v273_v35, %v5335_v32 }
  0xf5   :  { %v276_v51 = vadd.f32 %v275_v37, %v5339_v33 }
  0xf6   :  { %v460_v62 = vmax.f32 %v274_v48, 0.0 }
  0xf7   :  { %v279_v41 = vpop.f32.mrb[4].mxu0  ;;  %v461_v0 = vmax.f32 %v276_v51, 0.0 }
  0xf8   :  { %v280_v43 = vadd.f32 %v279_v41, %v5335_v32  ;;  %v281_v44 = vpop.f32.mrb[5].mxu0 }
  0xf9   :  { %v282_v45 = vadd.f32 %v281_v44, %v5339_v33 }
  0xfa   :  { %v462_v49 = vmax.f32 %v280_v43, 0.0 }
  0xfb   :  { %v463_v52 = vmax.f32 %v282_v45, 0.0  ;;  %v285_v53 = vpop.f32.mrb[6].mxu0 }
  0xfc   :  { %v5368_v56 = vmax.f32 %v458_v46, %v462_v49  ;;  %v286_v57 = vadd.f32 %v285_v53, %v5335_v32  ;;  %v287_v58 = vpop.f32.mrb[7].mxu0 }
  0xfd   :  { %v5371_v59 = vmax.f32 %v459_v47, %v463_v52  ;;  %v288_v60 = vadd.f32 %v287_v58, %v5339_v33 }
  0xfe   :  { %v464_v63 = vmax.f32 %v286_v57, 0.0 }
  0xff   :  { %v465_v1 = vmax.f32 %v288_v60, 0.0  ;;  %v291_v2 = vpop.f32.mrb[8].mxu0  ;;  %v4605_v4 = vpack.i.bf16 %v5371_v59, %v5368_v56 }
 0x100   :  { %v5379_v5 = vmax.f32 %v460_v62, %v464_v63  ;;  %v293_v6 = vpop.f32.mrb[9].mxu0  ;;  %v292_v12 = vadd.f32 %v291_v2, %v5335_v32 }
 0x101   :  { %v5381_v7 = vmax.f32 %v461_v0, %v465_v1  ;;  %4606 = vrot.lane.b32.xlu0 %v4605_v4, %s4987_s12  ;;  %v294_v14 = vadd.f32 %v293_v6, %v5339_v33 }
 0x102   :  { %v466_v20 = vmax.f32 %v292_v12, 0.0 }
 0x103   :  { %v297_v8 = vpop.f32.mrb[10].mxu0  ;;  %v4610_v9 = vpack.i.bf16 %v5381_v7, %v5379_v5  ;;  %v467_v24 = vmax.f32 %v294_v14, 0.0 }
 0x104   :  { %v299_v11 = vpop.f32.mrb[11].mxu0  ;;  %v298_v21 = vadd.f32 %v297_v8, %v5335_v32 }
 0x105   :  { %4611 = vrot.lane.b32.xlu0 %v4610_v9, %s4987_s12  ;;  %v300_v27 = vadd.f32 %v299_v11, %v5339_v33 }
 0x106   :  { %v468_v37 = vmax.f32 %v298_v21, 0.0 }
 0x107   :  { %v303_v15 = vpop.f32.mrb[12].mxu0  ;;  %v469_v39 = vmax.f32 %v300_v27, 0.0 }
 0x108   :  { %v304_v17 = vadd.f32 %v303_v15, %v5335_v32  ;;  %v305_v18 = vpop.f32.mrb[13].mxu0 }
 0x109   :  { %v306_v19 = vadd.f32 %v305_v18, %v5339_v33 }
 0x10a   :  { %v470_v23 = vmax.f32 %v304_v17, 0.0 }
 0x10b   :  { %v471_v28 = vmax.f32 %v306_v19, 0.0  ;;  %v309_v29 = vpop.f32.mrb[14].mxu0 }
 0x10c   :  { %v5405_v30 = vmax.f32 %v466_v20, %v470_v23  ;;  %v310_v31 = vadd.f32 %v309_v29, %v5335_v32  ;;  %v311_v34 = vpop.f32.mrb[15].mxu0 }
 0x10d   :  { %v5408_v35 = vmax.f32 %v467_v24, %v471_v28  ;;  %v312_v36 = vadd.f32 %v311_v34, %v5339_v33 }
 0x10e   :  { %v472_v38 = vmax.f32 %v310_v31, 0.0 }
 0x10f   :  { %v473_v40 = vmax.f32 %v312_v36, 0.0  ;;  %v315_v41 = vpop.f32.mrb[16].mxu0  ;;  %v4615_v42 = vpack.i.bf16 %v5408_v35, %v5405_v30 }
 0x110   :  { %v5413_v43 = vmax.f32 %v468_v37, %v472_v38  ;;  %v317_v44 = vpop.f32.mrb[17].mxu0  ;;  %v316_v49 = vadd.f32 %v315_v41, %v5335_v32 }
 0x111   :  { %v5415_v45 = vmax.f32 %v469_v39, %v473_v40  ;;  %4616 = vrot.lane.b32.xlu1 %v4615_v42, %s4987_s12  ;;  %v318_v50 = vadd.f32 %v317_v44, %v5339_v33 }
 0x112   :  { %v474_v55 = vmax.f32 %v316_v49, 0.0 }
 0x113   :  { %v321_v46 = vpop.f32.mrb[18].mxu0  ;;  %v4620_v47 = vpack.i.bf16 %v5415_v45, %v5413_v43  ;;  %v475_v60 = vmax.f32 %v318_v50, 0.0 }
 0x114   :  { %v323_v48 = vpop.f32.mrb[19].mxu0  ;;  %v322_v57 = vadd.f32 %v321_v46, %v5335_v32 }
 0x115   :  { %4621 = vrot.lane.b32.xlu1 %v4620_v47, %s4987_s12  ;;  %v324_v61 = vadd.f32 %v323_v48, %v5339_v33 }
 0x116   :  { %v476_v3 = vmax.f32 %v322_v57, 0.0 }
 0x117   :  { %v327_v51 = vpop.f32.mrb[20].mxu0  ;;  %v477_v9 = vmax.f32 %v324_v61, 0.0 }
 0x118   :  { %v328_v52 = vadd.f32 %v327_v51, %v5335_v32  ;;  %v329_v53 = vpop.f32.mrb[21].mxu0 }
 0x119   :  { %v330_v54 = vadd.f32 %v329_v53, %v5339_v33 }
 0x11a   :  { %v478_v58 = vmax.f32 %v328_v52, 0.0 }
 0x11b   :  { %v479_v62 = vmax.f32 %v330_v54, 0.0  ;;  %v333_v63 = vpop.f32.mrb[22].mxu0  ;;  %v4775_v54 = vld [vmem:[%s6876_s3 + $0x4] ss:$8 sps:$4 sm:$0xff]  }
 0x11c   :  { %v5427_v0 = vmax.f32 %v474_v55, %v478_v58  ;;  %v334_v1 = vadd.f32 %v333_v63, %v5335_v32  ;;  %v335_v2 = vpop.f32.mrb[23].mxu0  ;;  %1598 = vmatprep.subr.bf16.mxu1 %v4775_v54  ;;  %2101 = vmatprep.subr.bf16.mxu0 %v4775_v54 }
 0x11d   :  { %v5430_v4 = vmax.f32 %v475_v60, %v479_v62  ;;  %v336_v6 = vadd.f32 %v335_v2, %v5339_v33 }
 0x11e   :  { %v480_v8 = vmax.f32 %v334_v1, 0.0 }
 0x11f   :  { %v481_v10 = vmax.f32 %v336_v6, 0.0  ;;  %v339_v11 = vpop.f32.mrb[24].mxu0  ;;  %v4625_v12 = vpack.i.bf16 %v5430_v4, %v5427_v0 }
 0x120   :  { %v5435_v13 = vmax.f32 %v476_v3, %v480_v8  ;;  %v341_v14 = vpop.f32.mrb[25].mxu0  ;;  %v340_v19 = vadd.f32 %v339_v11, %v5335_v32 }
 0x121   :  { %v5437_v15 = vmax.f32 %v477_v9, %v481_v10  ;;  %4626 = vrot.lane.b32.xlu0 %v4625_v12, %s4987_s12  ;;  %v342_v20 = vadd.f32 %v341_v14, %v5339_v33 }
 0x122   :  { %v482_v28 = vmax.f32 %v340_v19, 0.0 }
 0x123   :  { %v345_v16 = vpop.f32.mrb[26].mxu0  ;;  %v4630_v17 = vpack.i.bf16 %v5437_v15, %v5435_v13  ;;  %v483_v34 = vmax.f32 %v342_v20, 0.0 }
 0x124   :  { %v347_v18 = vpop.f32.mrb[27].mxu0  ;;  %v346_v29 = vadd.f32 %v345_v16, %v5335_v32 }
 0x125   :  { %4631 = vrot.lane.b32.xlu1 %v4630_v17, %s4987_s12  ;;  %v348_v36 = vadd.f32 %v347_v18, %v5339_v33 }
 0x126   :  { %v484_v46 = vmax.f32 %v346_v29, 0.0 }
 0x127   :  { %v351_v21 = vpop.f32.mrb[28].mxu0  ;;  %v485_v48 = vmax.f32 %v348_v36, 0.0 }
 0x128   :  { %v352_v23 = vadd.f32 %v351_v21, %v5335_v32  ;;  %v353_v24 = vpop.f32.mrb[29].mxu0 }
 0x129   :  { %v354_v27 = vadd.f32 %v353_v24, %v5339_v33 }
 0x12a   :  { %v486_v31 = vmax.f32 %v352_v23, 0.0 }
 0x12b   :  { %v487_v37 = vmax.f32 %v354_v27, 0.0  ;;  %v357_v38 = vpop.f32.mrb[30].mxu0 }
 0x12c   :  { %v5449_v39 = vmax.f32 %v482_v28, %v486_v31  ;;  %v358_v40 = vadd.f32 %v357_v38, %v5335_v32  ;;  %v359_v41 = vpop.f32.mrb[31].mxu0 }
 0x12d   :  { %v5452_v42 = vmax.f32 %v483_v34, %v487_v37  ;;  %v360_v44 = vadd.f32 %v359_v41, %v5339_v33 }
 0x12e   :  { %v488_v47 = vmax.f32 %v358_v40, 0.0 }
 0x12f   :  { %v489_v49 = vmax.f32 %v360_v44, 0.0  ;;  %v363_v50 = vpop.f32.mrb[32].mxu0  ;;  %v4635_v51 = vpack.i.bf16 %v5452_v42, %v5449_v39 }
 0x130   :  { %v5457_v52 = vmax.f32 %v484_v46, %v488_v47  ;;  %v365_v53 = vpop.f32.mrb[33].mxu0  ;;  %v364_v61 = vadd.f32 %v363_v50, %v5335_v32 }
 0x131   :  { %v5462_v55 = vmax.f32 %v485_v48, %v489_v49  ;;  %4636 = vrot.lane.b32.xlu0 %v4635_v51, %s4987_s12  ;;  %v366_v62 = vadd.f32 %v365_v53, %v5339_v33 }
 0x132   :  { %v490_v3 = vmax.f32 %v364_v61, 0.0 }
 0x133   :  { %v369_v57 = vpop.f32.mrb[34].mxu0  ;;  %v4640_v58 = vpack.i.bf16 %v5462_v55, %v5457_v52  ;;  %v491_v10 = vmax.f32 %v366_v62, 0.0 }
 0x134   :  { %v371_v60 = vpop.f32.mrb[35].mxu0  ;;  %v370_v8 = vadd.f32 %v369_v57, %v5335_v32 }
 0x135   :  { %4641 = vrot.lane.b32.xlu1 %v4640_v58, %s4987_s12  ;;  %v372_v11 = vadd.f32 %v371_v60, %v5339_v33 }
 0x136   :  { %v492_v21 = vmax.f32 %v370_v8, 0.0 }
 0x137   :  { %v375_v63 = vpop.f32.mrb[36].mxu0  ;;  %v493_v24 = vmax.f32 %v372_v11, 0.0 }
 0x138   :  { %v376_v1 = vadd.f32 %v375_v63, %v5335_v32  ;;  %v377_v2 = vpop.f32.mrb[37].mxu0 }
 0x139   :  { %v378_v6 = vadd.f32 %v377_v2, %v5339_v33 }
 0x13a   :  { %v494_v9 = vmax.f32 %v376_v1, 0.0 }
 0x13b   :  { %v495_v12 = vmax.f32 %v378_v6, 0.0  ;;  %v381_v14 = vpop.f32.mrb[38].mxu0 }
 0x13c   :  { %v5474_v16 = vmax.f32 %v490_v3, %v494_v9  ;;  %v382_v17 = vadd.f32 %v381_v14, %v5335_v32  ;;  %v383_v18 = vpop.f32.mrb[39].mxu0 }
 0x13d   :  { %v5477_v19 = vmax.f32 %v491_v10, %v495_v12  ;;  %v384_v20 = vadd.f32 %v383_v18, %v5339_v33 }
 0x13e   :  { %v496_v23 = vmax.f32 %v382_v17, 0.0 }
 0x13f   :  { %v497_v27 = vmax.f32 %v384_v20, 0.0  ;;  %v387_v28 = vpop.f32.mrb[40].mxu0  ;;  %v4645_v29 = vpack.i.bf16 %v5477_v19, %v5474_v16 }
 0x140   :  { %v5482_v31 = vmax.f32 %v492_v21, %v496_v23  ;;  %v389_v34 = vpop.f32.mrb[41].mxu0  ;;  %v388_v41 = vadd.f32 %v387_v28, %v5335_v32 }
 0x141   :  { %v5484_v36 = vmax.f32 %v493_v24, %v497_v27  ;;  %4646 = vrot.lane.b32.xlu0 %v4645_v29, %s4987_s12  ;;  %v390_v44 = vadd.f32 %v389_v34, %v5339_v33 }
 0x142   :  { %v498_v50 = vmax.f32 %v388_v41, 0.0 }
 0x143   :  { %v393_v37 = vpop.f32.mrb[42].mxu0  ;;  %v4650_v38 = vpack.i.bf16 %v5484_v36, %v5482_v31  ;;  %v499_v54 = vmax.f32 %v390_v44, 0.0 }
 0x144   :  { %v395_v40 = vpop.f32.mrb[43].mxu0  ;;  %v394_v51 = vadd.f32 %v393_v37, %v5335_v32 }
 0x145   :  { %4651 = vrot.lane.b32.xlu1 %v4650_v38, %s4987_s12  ;;  %v396_v57 = vadd.f32 %v395_v40, %v5339_v33 }
 0x146   :  { %v500_v6 = vmax.f32 %v394_v51, 0.0 }
 0x147   :  { %v399_v46 = vpop.f32.mrb[44].mxu0  ;;  %v501_v8 = vmax.f32 %v396_v57, 0.0 }
 0x148   :  { %v400_v47 = vadd.f32 %v399_v46, %v5335_v32  ;;  %v401_v48 = vpop.f32.mrb[45].mxu0 }
 0x149   :  { %v402_v49 = vadd.f32 %v401_v48, %v5339_v33 }
 0x14a   :  { %v502_v53 = vmax.f32 %v400_v47, 0.0 }
 0x14b   :  { %v503_v58 = vmax.f32 %v402_v49, 0.0  ;;  %v405_v60 = vpop.f32.mrb[46].mxu0 }
 0x14c   :  { %v5496_v61 = vmax.f32 %v498_v50, %v502_v53  ;;  %v406_v62 = vadd.f32 %v405_v60, %v5335_v32  ;;  %v407_v63 = vpop.f32.mrb[47].mxu0 }
 0x14d   :  { %v5499_v1 = vmax.f32 %v499_v54, %v503_v58  ;;  %v408_v2 = vadd.f32 %v407_v63, %v5339_v33 }
 0x14e   :  { %v504_v3 = vmax.f32 %v406_v62, 0.0 }
 0x14f   :  { %v505_v9 = vmax.f32 %v408_v2, 0.0  ;;  %v411_v10 = vpop.f32.mrb[48].mxu0  ;;  %v4655_v11 = vpack.i.bf16 %v5499_v1, %v5496_v61 }
 0x150   :  { %v5504_v12 = vmax.f32 %v500_v6, %v504_v3  ;;  %v413_v14 = vpop.f32.mrb[49].mxu0  ;;  %v412_v23 = vadd.f32 %v411_v10, %v5335_v32 }
 0x151   :  { %v5506_v17 = vmax.f32 %v501_v8, %v505_v9  ;;  %4656 = vrot.lane.b32.xlu0 %v4655_v11, %s4987_s12  ;;  %v414_v24 = vadd.f32 %v413_v14, %v5339_v33 }
 0x152   :  { %v506_v37 = vmax.f32 %v412_v23, 0.0 }
 0x153   :  { %v417_v18 = vpop.f32.mrb[50].mxu0  ;;  %v4660_v20 = vpack.i.bf16 %v5506_v17, %v5504_v12  ;;  %v507_v41 = vmax.f32 %v414_v24, 0.0 }
 0x154   :  { %v419_v21 = vpop.f32.mrb[51].mxu0  ;;  %v418_v38 = vadd.f32 %v417_v18, %v5335_v32 }
 0x155   :  { %4661 = vrot.lane.b32.xlu1 %v4660_v20, %s4987_s12  ;;  %v420_v44 = vadd.f32 %v419_v21, %v5339_v33 }
 0x156   :  { %v508_v54 = vmax.f32 %v418_v38, 0.0 }
 0x157   :  { %v423_v27 = vpop.f32.mrb[52].mxu0  ;;  %v509_v58 = vmax.f32 %v420_v44, 0.0 }
 0x158   :  { %v424_v28 = vadd.f32 %v423_v27, %v5335_v32  ;;  %v425_v29 = vpop.f32.mrb[53].mxu0 }
 0x159   :  { %v426_v34 = vadd.f32 %v425_v29, %v5339_v33 }
 0x15a   :  { %v510_v40 = vmax.f32 %v424_v28, 0.0 }
 0x15b   :  { %v511_v46 = vmax.f32 %v426_v34, 0.0  ;;  %v429_v47 = vpop.f32.mrb[54].mxu0 }
 0x15c   :  { %v5518_v48 = vmax.f32 %v506_v37, %v510_v40  ;;  %v430_v49 = vadd.f32 %v429_v47, %v5335_v32  ;;  %v431_v50 = vpop.f32.mrb[55].mxu0 }
 0x15d   :  { %v5521_v51 = vmax.f32 %v507_v41, %v511_v46  ;;  %v432_v53 = vadd.f32 %v431_v50, %v5339_v33 }
 0x15e   :  { %v512_v57 = vmax.f32 %v430_v49, 0.0 }
 0x15f   :  { %v513_v60 = vmax.f32 %v432_v53, 0.0  ;;  %v435_v62 = vpop.f32.mrb[56].mxu0  ;;  %v4665_v63 = vpack.i.bf16 %v5521_v51, %v5518_v48 }
 0x160   :  { %v5526_v2 = vmax.f32 %v508_v54, %v512_v57  ;;  %v437_v6 = vpop.f32.mrb[57].mxu0  ;;  %v436_v11 = vadd.f32 %v435_v62, %v5335_v32 }
 0x161   :  { %v5528_v3 = vmax.f32 %v509_v58, %v513_v60  ;;  %4666 = vrot.lane.b32.xlu0 %v4665_v63, %s4987_s12  ;;  %v438_v14 = vadd.f32 %v437_v6, %v5339_v33 }
 0x162   :  { %v514_v24 = vmax.f32 %v436_v11, 0.0 }
 0x163   :  { %v441_v8 = vpop.f32.mrb[58].mxu0  ;;  %v4670_v9 = vpack.i.bf16 %v5528_v3, %v5526_v2  ;;  %v515_v29 = vmax.f32 %v438_v14, 0.0 }
 0x164   :  { %v443_v10 = vpop.f32.mrb[59].mxu0  ;;  %v442_v27 = vadd.f32 %v441_v8, %v5335_v32 }
 0x165   :  { %4671 = vrot.lane.b32.xlu1 %v4670_v9, %s4987_s12  ;;  %v444_v34 = vadd.f32 %v443_v10, %v5339_v33 }
 0x166   :  { %v516_v49 = vmax.f32 %v442_v27, 0.0 }
 0x167   :  { %v447_v18 = vpop.f32.mrb[60].mxu0  ;;  %v517_v53 = vmax.f32 %v444_v34, 0.0 }
 0x168   :  { %v448_v20 = vadd.f32 %v447_v18, %v5335_v32  ;;  %v449_v21 = vpop.f32.mrb[61].mxu0 }
 0x169   :  { %v450_v23 = vadd.f32 %v449_v21, %v5339_v33 }
 0x16a   :  { %v518_v28 = vmax.f32 %v448_v20, 0.0 }
 0x16b   :  { %v519_v37 = vmax.f32 %v450_v23, 0.0  ;;  %v453_v38 = vpop.f32.mrb[62].mxu0 }
 0x16c   :  { %v5540_v40 = vmax.f32 %v514_v24, %v518_v28  ;;  %v454_v41 = vadd.f32 %v453_v38, %v5335_v32  ;;  %v455_v44 = vpop.f32.mrb[63].mxu0 }
 0x16d   :  { %v5543_v46 = vmax.f32 %v515_v29, %v519_v37  ;;  %v456_v47 = vadd.f32 %v455_v44, %v5339_v33 }
 0x16e   :  { %v520_v50 = vmax.f32 %v454_v41, 0.0 }
 0x16f   :  { %v521_v54 = vmax.f32 %v456_v47, 0.0  ;;  %v4675_v57 = vpack.i.bf16 %v5543_v46, %v5540_v40 }
 0x170   :  { %v5548_v58 = vmax.f32 %v516_v49, %v520_v50 }
 0x171   :  { %v5550_v60 = vmax.f32 %v517_v53, %v521_v54  ;;  %4676 = vrot.lane.b32.xlu0 %v4675_v57, %s4987_s12 }
 0x173   :  { %v4607_v62 = vpop.permute.xlu0 %4606  ;;  %v4680_v32 = vpack.i.bf16 %v5550_v60, %v5548_v58 }
 0x174   :  { %v4609_v63 = vunpack.i.h.bf16 %v4607_v62  ;;  %v4608_v6 = vunpack.i.l.bf16 %v4607_v62 }
 0x175   :  { %4681 = vrot.lane.b32.xlu1 %v4680_v32, %s4987_s12  ;;  %v4773_v32 = vld [vmem:[%s6876_s3] ss:$8 sps:$4 sm:$0xff]  }
 0x176   :  { %v651_v8 = vsel %vm650_vm4, %v4608_v6, %v4609_v63  ;;  %v715_v11 = vsel %vm650_vm4, %v4609_v63, %v4608_v6 }
 0x177   :  { %v4612_v33 = vpop.permute.xlu0 %4611  ;;  %v732_v23 = vmax.f32 %v5371_v59, %v715_v11  ;;  %v731_v24 = vmax.f32 %v5368_v56, %v651_v8 }
 0x178   :  { %v4614_v9 = vunpack.i.h.bf16 %v4612_v33  ;;  %v4613_v10 = vunpack.i.l.bf16 %v4612_v33 }
 0x17a   :  { %v652_v14 = vsel %vm650_vm4, %v4613_v10, %v4614_v9  ;;  %v716_v18 = vsel %vm650_vm4, %v4614_v9, %v4613_v10 }
 0x17b   :  { %v733_v20 = vmax.f32 %v5379_v5, %v652_v14  ;;  %v734_v21 = vmax.f32 %v5381_v7, %v716_v18 }
 0x17d   :  { %v764_v27 = vpack.c.bf16 %v734_v21, %v732_v23  ;;  %v763_v28 = vpack.c.bf16 %v733_v20, %v731_v24 }
 0x17f   :  { %v783_v29 = vshll.u32 %v763_v28, 16  ;;  %v780_v34 = vshrl.u32 %v763_v28, 16  ;;  %v791_v50 = vshll.u32 %v764_v27, 16  ;;  %v788_v33 = vshrl.u32 %v764_v27, 16 }
 0x181   :  { %v942_v37 = vrot.slane %v783_v29, 1  ;;  %v944_v8 = vrot.slane %v791_v50, 1  ;;  %v782_v10 = vrot.slane %v780_v34, 3  ;;  %v785_v11 = vrot.slane %v783_v29, 4 }
 0x182   :  { %v790_v27 = vrot.slane %v788_v33, 3  ;;  %v793_v28 = vrot.slane %v791_v50, 4  ;;  %v4779_v50 = vld [vmem:[%s6876_s3 + $0x20] ss:$8 sps:$4 sm:$0xff]  }
 0x183   :  { %v4617_v38 = vpop.permute.xlu1 %4616  ;;  %v5564_v41 = vor.u32 %v942_v37, %v780_v34  ;;  %v945_v29 = vor.u32 %v944_v8, %v788_v33 }
 0x184   :  { %v4619_v44 = vunpack.i.h.bf16 %v4617_v38  ;;  %v4618_v47 = vunpack.i.l.bf16 %v4617_v38 }
 0x185   :  { %v980_v8 = vsel %vm974_vm7, %v945_v29, 0 }
 0x186   :  { %v653_v49 = vsel %vm650_vm4, %v4618_v47, %v4619_v44  ;;  %v717_v5 = vsel %vm650_vm4, %v4619_v44, %v4618_v47 }
 0x187   :  { %v4622_v7 = vpop.permute.xlu1 %4621  ;;  %v736_v59 = vmax.f32 %v5408_v35, %v717_v5  ;;  %v735_v56 = vmax.f32 %v5405_v30, %v653_v49  ;;  %v4778_v30 = vld [vmem:[%s6876_s3 + $0x14] ss:$8 sps:$4 sm:$0xff]  }
 0x188   :  { %v4624_v53 = vunpack.i.h.bf16 %v4622_v7  ;;  %v4623_v54 = vunpack.i.l.bf16 %v4622_v7  ;;  %v4784_v7 = vld [vmem:[%s6876_s3 + $0x34] ss:$8 sps:$4 sm:$0xff]  }
 0x189   :  { %v5570_v57 = vpack.c.bf16 %v736_v59, %v732_v23  ;;  %v5572_v62 = vpack.c.bf16 %v735_v56, %v731_v24 }
 0x18a   :  { %v654_v63 = vsel %vm650_vm4, %v4623_v54, %v4624_v53  ;;  %v718_v6 = vsel %vm650_vm4, %v4624_v53, %v4623_v54  ;;  %v4847_v54 = vld [vmem:[%s6876_s3 + $0x284] ss:$8 sps:$4 sm:$0xff]  }
 0x18b   :  { %v737_v35 = vmax.f32 %v5413_v43, %v654_v63  ;;  %v738_v9 = vmax.f32 %v5415_v45, %v718_v6  ;;  %1381 = vmatprep.mubr.bf16.mxu1 %v5570_v57  ;;  %v4776_v43 = vld [vmem:[%s6876_s3 + $0x10] ss:$8 sps:$4 sm:$0xff]   ;;  %v4781_v45 = vld [vmem:[%s6876_s3 + $0x24] ss:$8 sps:$4 sm:$0xff]  }
 0x18c   :  { %1382 = vmatmul.mubr.bf16.vlgmr.msra.gmra.mrb[0].mxu1 %v5572_v62 }
 0x18d   :  { %v5586_v14 = vpack.c.bf16 %v737_v35, %v733_v20  ;;  %v766_v18 = vpack.c.bf16 %v738_v9, %v736_v59  ;;  %v765_v23 = vpack.c.bf16 %v737_v35, %v735_v56  ;;  %v5588_v24 = vpack.c.bf16 %v738_v9, %v734_v21  ;;  %1599 = vmatpush1.bf16.msra.mxu1 %v4773_v32 }
 0x18e   :  { %1600 = vmatprep.subr.bf16.mxu1 %v4778_v30  ;;  %v786_v21 = vor.u32 %v785_v11, %v782_v10  ;;  %v794_v59 = vor.u32 %v793_v28, %v790_v27  ;;  %v4782_v11 = vld [vmem:[%s6876_s3 + $0x30] ss:$8 sps:$4 sm:$0xff]   ;;  %v977_v28 = vsel %vm974_vm7, %v5564_v41, 0  ;;  %v1028_v41 = vsel %vm5613_vm11, %v980_v8, 0 }
 0x18f   :  { %v804_v20 = vshrl.u32 %v766_v18, 16  ;;  %v807_v34 = vshll.u32 %v766_v18, 16  ;;  %v796_v37 = vshrl.u32 %v765_v23, 16  ;;  %v799_v38 = vshll.u32 %v765_v23, 16  ;;  %2060 = vmatprep.mubr.bf16.mxu0 %v5588_v24 }
 0x190   :  { %2061 = vmatmul.mubr.bf16.vlgmr.msra.gmra.mrb[64].mxu0 %v5586_v14  ;;  %v5622_v18 = vsel %vm5606_vm10, 0, %v786_v21  ;;  %v5636_v29 = vsel %vm5606_vm10, 0, %v794_v59 }
 0x191   :  { %v948_v44 = vrot.slane %v807_v34, 1  ;;  %v798_v47 = vrot.slane %v796_v37, 3  ;;  %v801_v49 = vrot.slane %v799_v38, 4  ;;  %v946_v5 = vrot.slane %v799_v38, 1  ;;  %1601 = vmatpush1.bf16.msra.mxu1 %v4776_v43  ;;  %2102 = vmatpush1.bf16.msra.mxu0 %v4773_v32 }
 0x192   :  { %1602 = vmatprep.subr.bf16.mxu1 %v4781_v45  ;;  %2103 = vmatprep.subr.bf16.mxu0 %v4778_v30  ;;  %v806_v56 = vrot.slane %v804_v20, 3  ;;  %v809_v53 = vrot.slane %v807_v34, 4 }
 0x193   :  { %v802_v32 = vor.u32 %v801_v49, %v798_v47  ;;  %v947_v63 = vor.u32 %v946_v5, %v796_v37  ;;  %v4627_v6 = vpop.permute.xlu0 %4626  ;;  %v949_v33 = vor.u32 %v948_v44, %v804_v20 }
 0x194   :  { %v4629_v35 = vunpack.i.h.bf16 %v4627_v6  ;;  %v4628_v9 = vunpack.i.l.bf16 %v4627_v6  ;;  %v810_v10 = vor.u32 %v809_v53, %v806_v56  ;;  %v4785_v56 = vld [vmem:[%s6876_s3 + $0x40] ss:$8 sps:$4 sm:$0xff]   ;;  %v1027_v53 = vsel %vm5613_vm11, %v977_v28, 0 }
 0x195   :  { %1603 = vmatpush1.bf16.msra.mxu1 %v4779_v50  ;;  %2104 = vmatpush1.bf16.msra.mxu0 %v4776_v43  ;;  %v5626_v23 = vsel %vm5606_vm10, 0, %v802_v32  ;;  %v986_v27 = vsel %vm974_vm7, %v949_v33, 0  ;;  %v4787_v43 = vld [vmem:[%s6876_s3 + $0x44] ss:$8 sps:$4 sm:$0xff]   ;;  %v983_v59 = vsel %vm974_vm7, %v947_v63, 0 }
 0x196   :  { %1604 = vmatprep.subr.bf16.mxu1 %v4784_v7  ;;  %2105 = vmatprep.subr.bf16.mxu0 %v4781_v45  ;;  %v5640_v20 = vsel %vm5606_vm10, 0, %v810_v10  ;;  %v655_v45 = vsel %vm650_vm4, %v4628_v9, %v4629_v35  ;;  %v719_v37 = vsel %vm650_vm4, %v4629_v35, %v4628_v9  ;;  %v1030_v44 = vsel %vm5613_vm11, %v986_v27, 0 }
 0x197   :  { %v4632_v38 = vpop.permute.xlu1 %4631  ;;  %v4077_v21 = vcombine.low %v5636_v29, %v5640_v20  ;;  %v5652_v5 = vcombine.low %v1028_v41, %v1030_v44  ;;  %v1029_v32 = vsel %vm5613_vm11, %v983_v59, 0  ;;  %v740_v8 = vmax.f32 %v5430_v4, %v719_v37  ;;  %v4793_v4 = vld [vmem:[%s6876_s3 + $0x64] ss:$8 sps:$4 sm:$0xff]  }
 0x198   :  { %v4634_v47 = vunpack.i.h.bf16 %v4632_v38  ;;  %v4633_v49 = vunpack.i.l.bf16 %v4632_v38  ;;  %v5667_v63 = vcombine.low %v1027_v53, %v1029_v32  ;;  %v739_v35 = vmax.f32 %v5427_v0, %v655_v45 }
 0x199   :  { %1605 = vmatpush1.bf16.msra.mxu1 %v4782_v11  ;;  %2106 = vmatpush1.bf16.msra.mxu0 %v4779_v50  ;;  %v4790_v50 = vld [vmem:[%s6876_s3 + $0x54] ss:$8 sps:$4 sm:$0xff]  }
 0x19a   :  { %v656_v6 = vsel %vm650_vm4, %v4633_v49, %v4634_v47  ;;  %v720_v33 = vsel %vm650_vm4, %v4634_v47, %v4633_v49  ;;  %1606 = vmatprep.subr.bf16.mxu1 %v4787_v43  ;;  %2107 = vmatprep.subr.bf16.mxu0 %v4784_v7  ;;  %v4788_v7 = vld [vmem:[%s6876_s3 + $0x50] ss:$8 sps:$4 sm:$0xff]  }
 0x19b   :  { %v742_v9 = vmax.f32 %v5437_v15, %v720_v33  ;;  %v741_v10 = vmax.f32 %v5435_v13, %v656_v6  ;;  %v4791_v13 = vld [vmem:[%s6876_s3 + $0x60] ss:$8 sps:$4 sm:$0xff]   ;;  %v4799_v6 = vld [vmem:[%s6876_s3 + $0x84] ss:$8 sps:$4 sm:$0xff]  }
 0x19d   :  { %v768_v27 = vpack.c.bf16 %v742_v9, %v740_v8  ;;  %v767_v28 = vpack.c.bf16 %v741_v10, %v739_v35  ;;  %1607 = vmatpush1.bf16.msra.mxu1 %v4785_v56  ;;  %2108 = vmatpush1.bf16.msra.mxu0 %v4782_v11 }
 0x19e   :  { %1608 = vmatprep.subr.bf16.mxu1 %v4790_v50  ;;  %2109 = vmatprep.subr.bf16.mxu0 %v4787_v43  ;;  %v4796_v43 = vld [vmem:[%s6876_s3 + $0x74] ss:$8 sps:$4 sm:$0xff]  }
 0x19f   :  { %v823_v41 = vshll.u32 %v768_v27, 16  ;;  %v815_v0 = vshll.u32 %v767_v28, 16  ;;  %v820_v15 = vshrl.u32 %v768_v27, 16  ;;  %v812_v11 = vshrl.u32 %v767_v28, 16 }
 0x1a1   :  { %1609 = vmatpush1.bf16.msra.mxu1 %v4788_v7  ;;  %2110 = vmatpush1.bf16.msra.mxu0 %v4785_v56  ;;  %v952_v45 = vrot.slane %v823_v41, 1  ;;  %v950_v37 = vrot.slane %v815_v0, 1  ;;  %v4794_v56 = vld [vmem:[%s6876_s3 + $0x70] ss:$8 sps:$4 sm:$0xff]  }
 0x1a2   :  { %1610 = vmatprep.subr.bf16.mxu1 %v4793_v4  ;;  %2111 = vmatprep.subr.bf16.mxu0 %v4790_v50 }
 0x1a3   :  { %v4637_v38 = vpop.permute.xlu0 %4636  ;;  %v5685_v49 = vor.u32 %v952_v45, %v820_v15  ;;  %v5687_v59 = vor.u32 %v950_v37, %v812_v11 }
 0x1a4   :  { %v4639_v44 = vunpack.i.h.bf16 %v4637_v38  ;;  %v4638_v47 = vunpack.i.l.bf16 %v4637_v38 }
 0x1a5   :  { %1611 = vmatpush1.bf16.msra.mxu1 %v4791_v13  ;;  %2112 = vmatpush1.bf16.msra.mxu0 %v4788_v7 }
 0x1a6   :  { %v657_v53 = vsel %vm650_vm4, %v4638_v47, %v4639_v44  ;;  %v721_v32 = vsel %vm650_vm4, %v4639_v44, %v4638_v47  ;;  %1612 = vmatprep.subr.bf16.mxu1 %v4796_v43  ;;  %2113 = vmatprep.subr.bf16.mxu0 %v4793_v4  ;;  %v4797_v4 = vld [vmem:[%s6876_s3 + $0x80] ss:$8 sps:$4 sm:$0xff]   ;;  %v814_v47 = vrot.slane %v812_v11, 3 }
 0x1a7   :  { %v4642_v33 = vpop.permute.xlu1 %4641  ;;  %v744_v50 = vmax.f32 %v5452_v42, %v721_v32  ;;  %v743_v27 = vmax.f32 %v5449_v39, %v657_v53  ;;  %v4802_v39 = vld [vmem:[%s6876_s3 + $0x94] ss:$8 sps:$4 sm:$0xff]   ;;  %v817_v53 = vrot.slane %v815_v0, 4  ;;  %v4803_v11 = vld [vmem:[%s6876_s3 + $0xa0] ss:$8 sps:$4 sm:$0xff]  }
 0x1a8   :  { %v4644_v28 = vunpack.i.h.bf16 %v4642_v33  ;;  %v4643_v7 = vunpack.i.l.bf16 %v4642_v33 }
 0x1a9   :  { %v5699_v45 = vpack.c.bf16 %v744_v50, %v740_v8  ;;  %v5701_v37 = vpack.c.bf16 %v743_v27, %v739_v35  ;;  %1613 = vmatpush1.bf16.msra.mxu1 %v4794_v56  ;;  %2114 = vmatpush1.bf16.msra.mxu0 %v4791_v13  ;;  %v822_v35 = vrot.slane %v820_v15, 3  ;;  %v825_v13 = vrot.slane %v823_v41, 4 }
 0x1aa   :  { %v658_v38 = vsel %vm650_vm4, %v4643_v7, %v4644_v28  ;;  %v722_v44 = vsel %vm650_vm4, %v4644_v28, %v4643_v7  ;;  %1614 = vmatprep.subr.bf16.mxu1 %v4799_v6  ;;  %2115 = vmatprep.subr.bf16.mxu0 %v4796_v43  ;;  %v4800_v7 = vld [vmem:[%s6876_s3 + $0x90] ss:$8 sps:$4 sm:$0xff]   ;;  %v818_v15 = vor.u32 %v817_v53, %v814_v47  ;;  %v992_v47 = vsel %vm974_vm7, %v5685_v49, 0 }
 0x1ab   :  { %1391 = vmatprep.mubr.bf16.mxu1 %v5699_v45  ;;  %v746_v42 = vmax.f32 %v5462_v55, %v722_v44  ;;  %v745_v8 = vmax.f32 %v5457_v52, %v658_v38  ;;  %v4805_v52 = vld [vmem:[%s6876_s3 + $0xa4] ss:$8 sps:$4 sm:$0xff]   ;;  %v4808_v44 = vld [vmem:[%s6876_s3 + $0xb4] ss:$8 sps:$4 sm:$0xff]  }
 0x1ac   :  { %1392 = vmatmul.mubr.bf16.gmra.mrb[4].mxu1 %v5701_v37  ;;  %v5748_v49 = vsel %vm5606_vm10, 0, %v818_v15  ;;  %v989_v15 = vsel %vm974_vm7, %v5687_v59, 0  ;;  %v4809_v59 = vld [vmem:[%s6876_s3 + $0xc0] ss:$8 sps:$4 sm:$0xff]  }
 0x1ad   :  { %v770_v32 = vpack.c.bf16 %v746_v42, %v744_v50  ;;  %v5715_v33 = vpack.c.bf16 %v746_v42, %v742_v9  ;;  %v769_v43 = vpack.c.bf16 %v745_v8, %v743_v27  ;;  %v5717_v28 = vpack.c.bf16 %v745_v8, %v741_v10  ;;  %1615 = vmatpush1.bf16.msra.mxu1 %v4797_v4 }
 0x1ae   :  { %2116 = vmatpush1.bf16.msra.mxu0 %v4794_v56  ;;  %1616 = vmatprep.subr.bf16.mxu1 %v4802_v39  ;;  %v826_v10 = vor.u32 %v825_v13, %v822_v35 }
 0x1af   :  { %v836_v55 = vshrl.u32 %v770_v32, 16  ;;  %v839_v41 = vshll.u32 %v770_v32, 16  ;;  %2070 = vmatprep.mubr.bf16.mxu0 %v5715_v33  ;;  %v828_v9 = vshrl.u32 %v769_v43, 16  ;;  %v831_v0 = vshll.u32 %v769_v43, 16  ;;  %2117 = vmatprep.subr.bf16.mxu0 %v4799_v6 }
 0x1b0   :  { %2071 = vmatmul.mubr.bf16.gmra.mrb[68].mxu0 %v5717_v28 }
 0x1b1   :  { %1617 = vmatpush1.bf16.msra.mxu1 %v4800_v7  ;;  %v838_v56 = vrot.slane %v836_v55, 3  ;;  %v841_v50 = vrot.slane %v839_v41, 4  ;;  %v830_v27 = vrot.slane %v828_v9, 3  ;;  %v833_v38 = vrot.slane %v831_v0, 4 }
 0x1b2   :  { %2118 = vmatpush1.bf16.msra.mxu0 %v4797_v4  ;;  %1618 = vmatprep.subr.bf16.mxu1 %v4805_v52  ;;  %v956_v6 = vrot.slane %v839_v41, 1  ;;  %v954_v42 = vrot.slane %v831_v0, 1  ;;  %v4806_v4 = vld [vmem:[%s6876_s3 + $0xb0] ss:$8 sps:$4 sm:$0xff]   ;;  %v5740_v41 = vsel %vm5606_vm10, 0, %v826_v10 }
 0x1b3   :  { %v4647_v8 = vpop.permute.xlu0 %4646  ;;  %2119 = vmatprep.subr.bf16.mxu0 %v4802_v39  ;;  %v842_v35 = vor.u32 %v841_v50, %v838_v56  ;;  %v834_v13 = vor.u32 %v833_v38, %v830_v27  ;;  %v1032_v56 = vsel %vm5613_vm11, %v992_v47, 0 }
 0x1b4   :  { %v4649_v53 = vunpack.i.h.bf16 %v4647_v8  ;;  %v4648_v32 = vunpack.i.l.bf16 %v4647_v8  ;;  %v957_v43 = vor.u32 %v956_v6, %v836_v55  ;;  %v955_v26 = vor.u32 %v954_v42, %v828_v9  ;;  %v4811_v9 = vld [vmem:[%s6876_s3 + $0xc4] ss:$8 sps:$4 sm:$0xff]  }
 0x1b5   :  { %1619 = vmatpush1.bf16.msra.mxu1 %v4803_v11  ;;  %v5744_v39 = vsel %vm5606_vm10, 0, %v842_v35  ;;  %v5752_v55 = vsel %vm5606_vm10, 0, %v834_v13 }
 0x1b6   :  { %2120 = vmatpush1.bf16.msra.mxu0 %v4800_v7  ;;  %1620 = vmatprep.subr.bf16.mxu1 %v4808_v44  ;;  %v998_v10 = vsel %vm974_vm7, %v957_v43, 0  ;;  %v659_v50 = vsel %vm650_vm4, %v4648_v32, %v4649_v53  ;;  %v723_v7 = vsel %vm650_vm4, %v4649_v53, %v4648_v32  ;;  %v995_v13 = vsel %vm974_vm7, %v955_v26, 0  ;;  %v4814_v26 = vld [vmem:[%s6876_s3 + $0xd4] ss:$8 sps:$4 sm:$0xff]  }
 0x1b7   :  { %v4652_v27 = vpop.permute.xlu1 %4651  ;;  %2121 = vmatprep.subr.bf16.mxu0 %v4805_v52  ;;  %v1034_v6 = vsel %vm5613_vm11, %v998_v10, 0  ;;  %v1031_v52 = vsel %vm5613_vm11, %v989_v15, 0  ;;  %v1033_v47 = vsel %vm5613_vm11, %v995_v13, 0  ;;  %v748_v10 = vmax.f32 %v5477_v19, %v723_v7 }
 0x1b8   :  { %v4654_v42 = vunpack.i.h.bf16 %v4652_v27  ;;  %v4653_v8 = vunpack.i.l.bf16 %v4652_v27  ;;  %v5770_v35 = vcombine.low %v1032_v56, %v1034_v6  ;;  %v5785_v43 = vcombine.low %v1031_v52, %v1033_v47 }
 0x1b9   :  { %1621 = vmatpush1.bf16.msra.mxu1 %v4806_v4  ;;  %v747_v56 = vmax.f32 %v5474_v16, %v659_v50  ;;  %v4817_v16 = vld [vmem:[%s6876_s3 + $0xe4] ss:$8 sps:$4 sm:$0xff]  }
 0x1ba   :  { %v660_v53 = vsel %vm650_vm4, %v4653_v8, %v4654_v42  ;;  %v724_v32 = vsel %vm650_vm4, %v4654_v42, %v4653_v8  ;;  %2122 = vmatpush1.bf16.msra.mxu0 %v4803_v11  ;;  %1622 = vmatprep.subr.bf16.mxu1 %v4811_v9  ;;  %v4812_v11 = vld [vmem:[%s6876_s3 + $0xd0] ss:$8 sps:$4 sm:$0xff]  }
 0x1bb   :  { %v750_v15 = vmax.f32 %v5484_v36, %v724_v32  ;;  %v749_v27 = vmax.f32 %v5482_v31, %v660_v53  ;;  %2123 = vmatprep.subr.bf16.mxu0 %v4808_v44  ;;  %v4815_v36 = vld [vmem:[%s6876_s3 + $0xe0] ss:$8 sps:$4 sm:$0xff]   ;;  %v4818_v53 = vld [vmem:[%s6876_s3 + $0xf0] ss:$8 sps:$4 sm:$0xff]  }
 0x1bd   :  { %v5791_v6 = vpack.c.bf16 %v750_v15, %v748_v10  ;;  %v5793_v42 = vpack.c.bf16 %v749_v27, %v747_v56  ;;  %1623 = vmatpush1.bf16.msra.mxu1 %v4809_v59 }
 0x1be   :  { %2124 = vmatpush1.bf16.msra.mxu0 %v4806_v4  ;;  %1624 = vmatprep.subr.bf16.mxu1 %v4814_v26  ;;  %v4820_v4 = vld [vmem:[%s6876_s3 + $0xf4] ss:$8 sps:$4 sm:$0xff]  }
 0x1bf   :  { %v855_v19 = vshll.u32 %v5791_v6, 16  ;;  %v6885_v31 = vshll.u32 %v5793_v42, 16  ;;  %2125 = vmatprep.subr.bf16.mxu0 %v4811_v9  ;;  %v852_v44 = vshrl.u32 %v5791_v6, 16  ;;  %v6886_v50 = vshrl.u32 %v5793_v42, 16 }
 0x1c0   :  { %v6898_v6 = vcombine.low %v5622_v18, %v5626_v23  ;;  %v4829_v18 = vld [vmem:[%s6876_s3 + $0x224] ss:$8 sps:$4 sm:$0xff]   ;;  %v6903_v30 = vshll.u32 %v5793_v42, 16 }
 0x1c1   :  { %1625 = vmatpush1.bf16.msra.mxu1 %v4812_v11  ;;  %v960_v7 = vrot.slane %v855_v19, 1  ;;  %v958_v9 = vrot.slane %v6885_v31, 1  ;;  %v854_v29 = vrot.slane %v852_v44, 3  ;;  %v857_v20 = vrot.slane %v855_v19, 4 }
 0x1c2   :  { %2126 = vmatpush1.bf16.msra.mxu0 %v4809_v59  ;;  %1626 = vmatprep.subr.bf16.mxu1 %v4817_v16 }
 0x1c3   :  { %v4657_v8 = vpop.permute.xlu0 %4656  ;;  %2127 = vmatprep.subr.bf16.mxu0 %v4814_v26  ;;  %v961_v47 = vor.u32 %v960_v7, %v852_v44  ;;  %v959_v59 = vor.u32 %v958_v9, %v6886_v50  ;;  %v4823_v26 = vld [vmem:[%s6876_s3 + $0x204] ss:$8 sps:$4 sm:$0xff]  }
 0x1c4   :  { %v4659_v13 = vunpack.i.h.bf16 %v4657_v8  ;;  %v4658_v52 = vunpack.i.l.bf16 %v4657_v8 }
 0x1c5   :  { %1627 = vmatpush1.bf16.msra.mxu1 %v4815_v36 }
 0x1c6   :  { %v661_v32 = vsel %vm650_vm4, %v4658_v52, %v4659_v13  ;;  %v725_v25 = vsel %vm650_vm4, %v4659_v13, %v4658_v52  ;;  %2128 = vmatpush1.bf16.msra.mxu0 %v4812_v11  ;;  %1628 = vmatprep.subr.bf16.mxu1 %v4820_v4  ;;  %v1001_v52 = vsel %vm974_vm7, %v959_v59, 0 }
 0x1c7   :  { %v4662_v8 = vpop.permute.xlu1 %4661  ;;  %v752_v7 = vmax.f32 %v5499_v1, %v725_v25  ;;  %v751_v9 = vmax.f32 %v5496_v61, %v661_v32  ;;  %2129 = vmatprep.subr.bf16.mxu0 %v4817_v16 }
 0x1c8   :  { %v4664_v38 = vunpack.i.h.bf16 %v4662_v8  ;;  %v4663_v31 = vunpack.i.l.bf16 %v4662_v8 }
 0x1c9   :  { %v5829_v50 = vpack.c.bf16 %v752_v7, %v748_v10  ;;  %v5831_v0 = vpack.c.bf16 %v751_v9, %v747_v56  ;;  %1629 = vmatpush1.bf16.msra.mxu1 %v4818_v53 }
 0x1ca   :  { %v662_v11 = vsel %vm650_vm4, %v4663_v31, %v4664_v38  ;;  %v726_v13 = vsel %vm650_vm4, %v4664_v38, %v4663_v31  ;;  %2130 = vmatpush1.bf16.msra.mxu0 %v4815_v36  ;;  %1896 = vmatprep.subr.bf16.mxu1 %v4823_v26 }
 0x1cb   :  { %1401 = vmatprep.mubr.bf16.mxu1 %v5829_v50  ;;  %v754_v25 = vmax.f32 %v5506_v17, %v726_v13  ;;  %v753_v61 = vmax.f32 %v5504_v12, %v662_v11  ;;  %2131 = vmatprep.subr.bf16.mxu0 %v4820_v4  ;;  %v1004_v4 = vsel %vm974_vm7, %v961_v47, 0 }
 0x1cc   :  { %1402 = vmatmul.mubr.bf16.gmra.mrb[8].mxu1 %v5831_v0 }
 0x1cd   :  { %v5839_v1 = vpack.c.bf16 %v754_v25, %v752_v7  ;;  %v5841_v10 = vpack.c.bf16 %v754_v25, %v750_v15  ;;  %v5843_v56 = vpack.c.bf16 %v753_v61, %v751_v9  ;;  %v5845_v16 = vpack.c.bf16 %v753_v61, %v749_v27 }
 0x1ce   :  { %2132 = vmatpush1.bf16.msra.mxu0 %v4818_v53  ;;  %v1036_v7 = vsel %vm5613_vm11, %v1004_v4, 0  ;;  %v1035_v9 = vsel %vm5613_vm11, %v1001_v52, 0 }
 0x1cf   :  { %v6891_v38 = vshll.u32 %v5839_v1, 16  ;;  %2080 = vmatprep.mubr.bf16.mxu0 %v5841_v10  ;;  %v6887_v17 = vshll.u32 %v5843_v56, 16  ;;  %2222 = vmatprep.subr.bf16.mxu0 %v4823_v26  ;;  %v868_v12 = vshrl.u32 %v5839_v1, 16  ;;  %v6888_v31 = vshrl.u32 %v5843_v56, 16 }
 0x1d0   :  { %2081 = vmatmul.mubr.bf16.gmra.mrb[72].mxu0 %v5845_v16  ;;  %v6900_v23 = vshrl.u32 %v5843_v56, 16 }
 0x1d1   :  { %v964_v15 = vrot.slane %v6891_v38, 1  ;;  %v962_v27 = vrot.slane %v6887_v17, 1 }
 0x1d3   :  { %v4667_v36 = vpop.permute.xlu0 %4666  ;;  %v965_v26 = vor.u32 %v964_v15, %v868_v12  ;;  %v963_v8 = vor.u32 %v962_v27, %v6888_v31 }
 0x1d4   :  { %v4669_v53 = vunpack.i.h.bf16 %v4667_v36  ;;  %v4668_v32 = vunpack.i.l.bf16 %v4667_v36 }
 0x1d5   :  { %v1010_v59 = vsel %vm974_vm7, %v965_v26, 0  ;;  %v1007_v25 = vsel %vm974_vm7, %v963_v8, 0 }
 0x1d6   :  { %v663_v11 = vsel %vm650_vm4, %v4668_v32, %v4669_v53  ;;  %v727_v47 = vsel %vm650_vm4, %v4669_v53, %v4668_v32  ;;  %v1038_v27 = vsel %vm5613_vm11, %v1010_v59, 0  ;;  %v1037_v36 = vsel %vm5613_vm11, %v1007_v25, 0 }
 0x1d7   :  { %v4672_v13 = vpop.permute.xlu1 %4671  ;;  %v5875_v4 = vcombine.low %v1036_v7, %v1038_v27  ;;  %v5877_v52 = vcombine.low %v1035_v9, %v1037_v36  ;;  %v756_v32 = vmax.f32 %v5521_v51, %v727_v47  ;;  %v755_v26 = vmax.f32 %v5518_v48, %v663_v11 }
 0x1d8   :  { %v4674_v61 = vunpack.i.h.bf16 %v4672_v13  ;;  %v4673_v15 = vunpack.i.l.bf16 %v4672_v13 }
 0x1da   :  { %v664_v17 = vsel %vm650_vm4, %v4673_v15, %v4674_v61  ;;  %v728_v53 = vsel %vm650_vm4, %v4674_v61, %v4673_v15 }
 0x1db   :  { %v758_v8 = vmax.f32 %v5528_v3, %v728_v53  ;;  %v757_v13 = vmax.f32 %v5526_v2, %v664_v17 }
 0x1dd   :  { %v5885_v59 = vpack.c.bf16 %v758_v8, %v756_v32  ;;  %v5887_v31 = vpack.c.bf16 %v757_v13, %v755_v26 }
 0x1df   :  { %v6889_v7 = vshll.u32 %v5885_v59, 16  ;;  %v6890_v9 = vshll.u32 %v5887_v31, 16  ;;  %v6892_v25 = vshrl.u32 %v5885_v59, 16  ;;  %v876_v61 = vshrl.u32 %v5887_v31, 16 }
 0x1e1   :  { %v968_v51 = vrot.slane %v6889_v7, 1  ;;  %v966_v48 = vrot.slane %v6890_v9, 1 }
 0x1e3   :  { %v4677_v3 = vpop.permute.xlu0 %4676  ;;  %v969_v11 = vor.u32 %v968_v51, %v6892_v25  ;;  %v967_v47 = vor.u32 %v966_v48, %v876_v61 }
 0x1e4   :  { %v4679_v2 = vunpack.i.h.bf16 %v4677_v3  ;;  %v4678_v17 = vunpack.i.l.bf16 %v4677_v3 }
 0x1e6   :  { %v665_v15 = vsel %vm650_vm4, %v4678_v17, %v4679_v2  ;;  %v729_v27 = vsel %vm650_vm4, %v4679_v2, %v4678_v17  ;;  %v1013_v17 = vsel %vm974_vm7, %v967_v47, 0  ;;  %v6901_v47 = vshll.u32 %v5843_v56, 16 }
 0x1e7   :  { %v4682_v36 = vpop.permute.xlu1 %4681  ;;  %v760_v53 = vmax.f32 %v5543_v46, %v729_v27  ;;  %v759_v7 = vmax.f32 %v5540_v40, %v665_v15  ;;  %v6899_v15 = vcombine.low %v5740_v41, %v5744_v39  ;;  %v4824_v27 = vld [vmem:[%s6876_s3 + $0x210] ss:$8 sps:$4 sm:$0xff]   ;;  %v6902_v56 = vshrl.u32 %v5793_v42, 16 }
 0x1e8   :  { %v4684_v34 = vunpack.i.h.bf16 %v4682_v36  ;;  %v4683_v9 = vunpack.i.l.bf16 %v4682_v36  ;;  %v858_v36 = vor.u32 %v857_v20, %v854_v29  ;;  %v6905_v42 = vshll.u32 %v5885_v59, 16 }
 0x1e9   :  { %v5905_v38 = vpack.c.bf16 %v760_v53, %v756_v32  ;;  %v5907_v3 = vpack.c.bf16 %v759_v7, %v755_v26  ;;  %v846_v20 = vrot.slane %v6902_v56, 3  ;;  %v4844_v56 = vld [vmem:[%s6876_s3 + $0x274] ss:$8 sps:$4 sm:$0xff]  }
 0x1ea   :  { %v666_v51 = vsel %vm650_vm4, %v4683_v9, %v4684_v34  ;;  %v730_v25 = vsel %vm650_vm4, %v4684_v34, %v4683_v9  ;;  %vm3948_vm4 = vcmask 80896  }
 0x1eb   :  { %1411 = vmatprep.mubr.bf16.mxu1 %v5905_v38  ;;  %v762_v48 = vmax.f32 %v5550_v60, %v730_v25  ;;  %v761_v2 = vmax.f32 %v5548_v58, %v666_v51  ;;  %v4821_v58 = vld [vmem:[%s6876_s3 + $0x200] ss:$8 sps:$4 sm:$0xff]   ;;  %v865_v51 = vrot.slane %v6901_v47, 4  ;;  %v4838_v47 = vld [vmem:[%s6876_s3 + $0x254] ss:$8 sps:$4 sm:$0xff]  }
 0x1ec   :  { %1412 = vmatmul.mubr.bf16.gmra.mrb[12].mxu1 %v5907_v3 }
 0x1ed   :  { %1630 = vmatprep.mubr.bf16.mxu1 %v4077_v21  ;;  %v778_v40 = vpack.c.bf16 %v762_v48, %v760_v53  ;;  %v5918_v46 = vpack.c.bf16 %v762_v48, %v758_v8  ;;  %v5920_v32 = vpack.c.bf16 %v761_v2, %v759_v7  ;;  %v5922_v26 = vpack.c.bf16 %v761_v2, %v757_v13 }
 0x1ee   :  { %v870_v21 = vrot.slane %v868_v12, 3  ;;  %v6897_v8 = vshll.u32 %v5839_v1, 16  ;;  %v1016_v12 = vsel %vm974_vm7, %v969_v11, 0  ;;  %v862_v11 = vrot.slane %v6900_v23, 3  ;;  %v4833_v23 = vld [vmem:[%s6876_s3 + $0x240] ss:$8 sps:$4 sm:$0xff]  }
 0x1ef   :  { %v903_v34 = vshll.u32 %v778_v40, 16  ;;  %2090 = vmatprep.mubr.bf16.mxu0 %v5918_v46  ;;  %v895_v60 = vshll.u32 %v5920_v32, 16  ;;  %v900_v7 = vshrl.u32 %v778_v40, 16  ;;  %v892_v9 = vshrl.u32 %v5920_v32, 16 }
 0x1f0   :  { %2091 = vmatmul.mubr.bf16.gmra.mrb[76].mxu0 %v5922_v26  ;;  %v873_v13 = vrot.slane %v6897_v8, 4  ;;  %v1040_v48 = vsel %vm5613_vm11, %v1016_v12, 0  ;;  %v1039_v40 = vsel %vm5613_vm11, %v1013_v17, 0  ;;  %v866_v12 = vor.u32 %v865_v51, %v862_v11 }
 0x1f1   :  { %2133 = vmatprep.mubr.bf16.mxu0 %v5570_v57  ;;  %v4826_v57 = vld [vmem:[%s6876_s3 + $0x214] ss:$8 sps:$4 sm:$0xff]   ;;  %v972_v25 = vrot.slane %v903_v34, 1  ;;  %v970_v44 = vrot.slane %v895_v60, 1  ;;  %v6907_v32 = vshll.u32 %v5887_v31, 16 }
 0x1f2   :  { %v874_v53 = vor.u32 %v873_v13, %v870_v21  ;;  %v4827_v13 = vld [vmem:[%s6876_s3 + $0x220] ss:$8 sps:$4 sm:$0xff]   ;;  %v4836_v31 = vld [vmem:[%s6876_s3 + $0x250] ss:$8 sps:$4 sm:$0xff]  }
 0x1f3   :  { %v973_v19 = vor.u32 %v972_v25, %v900_v7  ;;  %v971_v1 = vor.u32 %v970_v44, %v892_v9  ;;  %v849_v44 = vrot.slane %v6903_v30, 4  ;;  %v4859_v30 = vld [vmem:[%s6876_s3 + $0x2c4] ss:$8 sps:$4 sm:$0xff]  }
 0x1f4   :  { %1631 = vmatmul.mubr.bf16.vlgmr.msra.gmra.mrb[0].mxu1 %v6898_v6  ;;  %v937_v25 = vsel %vm5606_vm10, 0, %v874_v53  ;;  %v905_v6 = vrot.slane %v903_v34, 4  ;;  %v6906_v34 = vcombine.low %v5748_v49, %v5752_v55  ;;  %v936_v49 = vsel %vm5606_vm10, 0, %v866_v12  ;;  %v4868_v12 = vld [vmem:[%s6876_s3 + $0x2f4] ss:$8 sps:$4 sm:$0xff]  }
 0x1f5   :  { %1897 = vmatpush1.bf16.msra.mxu1 %v4821_v58  ;;  %1640 = vmatprep.mubr.bf16.mxu1 %v6899_v15  ;;  %v1022_v41 = vsel %vm974_vm7, %v973_v19, 0  ;;  %v1019_v39 = vsel %vm974_vm7, %v971_v1, 0  ;;  %v4832_v19 = vld [vmem:[%s6876_s3 + $0x234] ss:$8 sps:$4 sm:$0xff]   ;;  %v6904_v1 = vshrl.u32 %v5885_v59, 16  ;;  %v889_v15 = vrot.slane %v6905_v42, 4 }
 0x1f6   :  { %1898 = vmatprep.subr.bf16.mxu1 %v4826_v57  ;;  %v1042_v2 = vsel %vm5613_vm11, %v1022_v41, 0  ;;  %v1041_v29 = vsel %vm5613_vm11, %v1019_v39, 0  ;;  %v4835_v59 = vld [vmem:[%s6876_s3 + $0x244] ss:$8 sps:$4 sm:$0xff]   ;;  %v894_v53 = vrot.slane %v892_v9, 3  ;;  %v878_v9 = vrot.slane %v876_v61, 3 }
 0x1f7   :  { %v5976_v21 = vcombine.low %v1040_v48, %v1042_v2  ;;  %v5978_v8 = vcombine.low %v1039_v40, %v1041_v29  ;;  %v886_v17 = vrot.slane %v6904_v1, 3  ;;  %v4841_v61 = vld [vmem:[%s6876_s3 + $0x264] ss:$8 sps:$4 sm:$0xff]   ;;  %v4839_v2 = vld [vmem:[%s6876_s3 + $0x260] ss:$8 sps:$4 sm:$0xff]  }
 0x1f8   :  { %2134 = vmatmul.mubr.bf16.vlgmr.msra.gmra.mrb[64].mxu0 %v5572_v62  ;;  %v902_v62 = vrot.slane %v900_v7, 3  ;;  %v4830_v7 = vld [vmem:[%s6876_s3 + $0x230] ss:$8 sps:$4 sm:$0xff]  }
 0x1f9   :  { %1899 = vmatpush1.bf16.msra.mxu1 %v4824_v27  ;;  %2223 = vmatpush1.bf16.msra.mxu0 %v4821_v58  ;;  %v935_v58 = vsel %vm5606_vm10, 0, %v858_v36  ;;  %v890_v55 = vor.u32 %v889_v15, %v886_v17  ;;  %v4866_v1 = vld [vmem:[%s6876_s3 + $0x2f0] ss:$8 sps:$4 sm:$0xff]  }
 0x1fa   :  { %2143 = vmatprep.mubr.bf16.mxu0 %v5699_v45  ;;  %1900 = vmatprep.subr.bf16.mxu1 %v4829_v18  ;;  %v4081_v45 = vcombine.low %v935_v58, %v937_v25  ;;  %v906_v36 = vor.u32 %v905_v6, %v902_v62  ;;  %v4854_v25 = vld [vmem:[%s6876_s3 + $0x2b0] ss:$8 sps:$4 sm:$0xff]   ;;  %v4862_v62 = vld [vmem:[%s6876_s3 + $0x2d4] ss:$8 sps:$4 sm:$0xff]   ;;  %v4863_v58 = vld [vmem:[%s6876_s3 + $0x2e0] ss:$8 sps:$4 sm:$0xff]  }
 0x1fb   :  { %2224 = vmatprep.subr.bf16.mxu0 %v4826_v57  ;;  %v850_v57 = vor.u32 %v849_v44, %v846_v20  ;;  %v939_v51 = vsel %vm5606_vm10, 0, %v890_v55  ;;  %v4853_v20 = vld [vmem:[%s6876_s3 + $0x2a4] ss:$8 sps:$4 sm:$0xff]   ;;  %v4857_v44 = vld [vmem:[%s6876_s3 + $0x2c0] ss:$8 sps:$4 sm:$0xff]  }
 0x1fc   :  { %1641 = vmatmul.mubr.bf16.gmra.mrb[4].mxu1 %v6906_v34  ;;  %v4860_v6 = vld [vmem:[%s6876_s3 + $0x2d0] ss:$8 sps:$4 sm:$0xff]  }
 0x1fd   :  { %1901 = vmatpush1.bf16.msra.mxu1 %v4827_v13  ;;  %2225 = vmatpush1.bf16.msra.mxu0 %v4824_v27  ;;  %v897_v27 = vrot.slane %v895_v60, 4  ;;  %v934_v11 = vsel %vm5606_vm10, 0, %v850_v57  ;;  %v881_v60 = vrot.slane %v6907_v32, 4 }
 0x1fe   :  { %1650 = vmatprep.mubr.bf16.mxu1 %v4081_v45  ;;  %1902 = vmatprep.subr.bf16.mxu1 %v4832_v19 }
 0x1ff   :  { %2226 = vmatprep.subr.bf16.mxu0 %v4829_v18  ;;  %v941_v18 = vsel %vm5606_vm10, 0, %v906_v36  ;;  %v898_v41 = vor.u32 %v897_v27, %v894_v53 }
 0x200   :  { %2144 = vmatmul.mubr.bf16.gmra.mrb[68].mxu0 %v5701_v37  ;;  %v4080_v37 = vcombine.low %v934_v11, %v936_v49  ;;  %v4083_v39 = vcombine.low %v939_v51, %v941_v18  ;;  %v4869_v51 = vld [vmem:[%s6879_s5 + $0xc0] sm:$0xff]  }
 0x201   :  { %1903 = vmatpush1.bf16.msra.mxu1 %v4830_v7  ;;  %2227 = vmatpush1.bf16.msra.mxu0 %v4827_v13  ;;  %v940_v48 = vsel %vm5606_vm10, 0, %v898_v41  ;;  %v4856_v13 = vld [vmem:[%s6876_s3 + $0x2b4] ss:$8 sps:$4 sm:$0xff]   ;;  %v4870_v41 = vld [vmem:[%s6879_s5 + $0x1c0] sm:$0xff]  }
 0x202   :  { %2153 = vmatprep.mubr.bf16.mxu0 %v5829_v50  ;;  %1904 = vmatprep.subr.bf16.mxu1 %v4835_v59  ;;  %v882_v50 = vor.u32 %v881_v60, %v878_v9 }
 0x203   :  { %2228 = vmatprep.subr.bf16.mxu0 %v4832_v19  ;;  %v4865_v19 = vld [vmem:[%s6876_s3 + $0x2e4] ss:$8 sps:$4 sm:$0xff]  }
 0x204   :  { %1651 = vmatmul.mubr.bf16.gmra.mrb[8].mxu1 %v4080_v37  ;;  %v938_v40 = vsel %vm5606_vm10, 0, %v882_v50 }
 0x205   :  { %1905 = vmatpush1.bf16.msra.mxu1 %v4833_v23  ;;  %2229 = vmatpush1.bf16.msra.mxu0 %v4830_v7  ;;  %v4082_v29 = vcombine.low %v938_v40, %v940_v48 }
 0x206   :  { %1660 = vmatprep.mubr.bf16.mxu1 %v4083_v39  ;;  %1906 = vmatprep.subr.bf16.mxu1 %v4838_v47 }
 0x207   :  { %2230 = vmatprep.subr.bf16.mxu0 %v4835_v59 }
 0x208   :  { %2154 = vmatmul.mubr.bf16.gmra.mrb[72].mxu0 %v5831_v0  ;;  %v4842_v0 = vld [vmem:[%s6876_s3 + $0x270] ss:$8 sps:$4 sm:$0xff]  }
 0x209   :  { %1907 = vmatpush1.bf16.msra.mxu1 %v4836_v31  ;;  %2231 = vmatpush1.bf16.msra.mxu0 %v4833_v23 }
 0x20a   :  { %2163 = vmatprep.mubr.bf16.mxu0 %v5905_v38  ;;  %1908 = vmatprep.subr.bf16.mxu1 %v4841_v61  ;;  %v4845_v38 = vld [vmem:[%s6876_s3 + $0x280] ss:$8 sps:$4 sm:$0xff]  }
 0x20b   :  { %2232 = vmatprep.subr.bf16.mxu0 %v4838_v47 }
 0x20c   :  { %1661 = vmatmul.mubr.bf16.gmra.mrb[12].mxu1 %v4082_v29 }
 0x20d   :  { %1909 = vmatpush1.bf16.msra.mxu1 %v4839_v2  ;;  %2233 = vmatpush1.bf16.msra.mxu0 %v4836_v31 }
 0x20e   :  { %1928 = vmatprep.mubr.bf16.mxu1 %v5588_v24  ;;  %1910 = vmatprep.subr.bf16.mxu1 %v4844_v56  ;;  %v4850_v24 = vld [vmem:[%s6876_s3 + $0x294] ss:$8 sps:$4 sm:$0xff]  }
 0x20f   :  { %2234 = vmatprep.subr.bf16.mxu0 %v4841_v61 }
 0x210   :  { %2164 = vmatmul.mubr.bf16.gmra.mrb[76].mxu0 %v5907_v3  ;;  %v4848_v3 = vld [vmem:[%s6876_s3 + $0x290] ss:$8 sps:$4 sm:$0xff]  }
 0x211   :  { %1911 = vmatpush1.bf16.msra.mxu1 %v4842_v0  ;;  %2235 = vmatpush1.bf16.msra.mxu0 %v4839_v2 }
 0x212   :  { %2254 = vmatprep.mubr.bf16.mxu0 %v5652_v5  ;;  %1912 = vmatprep.subr.bf16.mxu1 %v4847_v54  ;;  %v4851_v5 = vld [vmem:[%s6876_s3 + $0x2a0] ss:$8 sps:$4 sm:$0xff]  }
 0x213   :  { %2236 = vmatprep.subr.bf16.mxu0 %v4844_v56 }
 0x215   :  { %1913 = vmatpush1.bf16.msra.mxu1 %v4845_v38  ;;  %2237 = vmatpush1.bf16.msra.mxu0 %v4842_v0  ;;  %v4871_v0 = vld [vmem:[%s6879_s5 + $0x80] sm:$0xff]  }
 0x216   :  { %1914 = vmatprep.subr.bf16.mxu1 %v4850_v24  ;;  %2238 = vmatprep.subr.bf16.mxu0 %v4847_v54  ;;  %v4872_v54 = vld [vmem:[%s6879_s5 + $0x180] sm:$0xff]  }
 0x219   :  { %1915 = vmatpush1.bf16.msra.mxu1 %v4848_v3  ;;  %2239 = vmatpush1.bf16.msra.mxu0 %v4845_v38 }
 0x21a   :  { %1916 = vmatprep.subr.bf16.mxu1 %v4853_v20  ;;  %2240 = vmatprep.subr.bf16.mxu0 %v4850_v24 }
 0x21d   :  { %1917 = vmatpush1.bf16.msra.mxu1 %v4851_v5  ;;  %2241 = vmatpush1.bf16.msra.mxu0 %v4848_v3 }
 0x21e   :  { %1918 = vmatprep.subr.bf16.mxu1 %v4856_v13  ;;  %2242 = vmatprep.subr.bf16.mxu0 %v4853_v20 }
 0x221   :  { %1919 = vmatpush1.bf16.msra.mxu1 %v4854_v25  ;;  %2243 = vmatpush1.bf16.msra.mxu0 %v4851_v5 }
 0x222   :  { %1920 = vmatprep.subr.bf16.mxu1 %v4859_v30  ;;  %2244 = vmatprep.subr.bf16.mxu0 %v4856_v13 }
 0x225   :  { %1921 = vmatpush1.bf16.msra.mxu1 %v4857_v44  ;;  %2245 = vmatpush1.bf16.msra.mxu0 %v4854_v25 }
 0x226   :  { %1922 = vmatprep.subr.bf16.mxu1 %v4862_v62  ;;  %2246 = vmatprep.subr.bf16.mxu0 %v4859_v30 }
 0x229   :  { %1923 = vmatpush1.bf16.msra.mxu1 %v4860_v6  ;;  %2247 = vmatpush1.bf16.msra.mxu0 %v4857_v44 }
 0x22a   :  { %1924 = vmatprep.subr.bf16.mxu1 %v4865_v19  ;;  %2248 = vmatprep.subr.bf16.mxu0 %v4862_v62  ;;  %v4873_v62 = vld [vmem:[%s6879_s5 + $0xc8] sm:$0xff]  }
 0x22d   :  { %1925 = vmatpush1.bf16.msra.mxu1 %v4863_v58  ;;  %2249 = vmatpush1.bf16.msra.mxu0 %v4860_v6  ;;  %v4874_v6 = vld [vmem:[%s6879_s5 + $0x1c8] sm:$0xff]  }
 0x22e   :  { %1926 = vmatprep.subr.bf16.mxu1 %v4868_v12  ;;  %2250 = vmatprep.subr.bf16.mxu0 %v4865_v19 }
 0x231   :  { %1927 = vmatpush1.bf16.msra.mxu1 %v4866_v1  ;;  %2251 = vmatpush1.bf16.msra.mxu0 %v4863_v58 }
 0x232   :  { %2252 = vmatprep.subr.bf16.mxu0 %v4868_v12  ;;  %4357 = vmatprep.subr.bf16.mxu1 %v4869_v51 }
 0x234   :  { %1929 = vmatmul.mubr.bf16.vlgmr.msra.gmra.mrb[0].mxu1 %v5586_v14  ;;  %v1043_v14 = vld [vmem:[%s6878_s4] sm:$0x3] }
 0x235   :  { %1938 = vmatprep.mubr.bf16.mxu1 %v5715_v33  ;;  %2253 = vmatpush1.bf16.msra.mxu0 %v4866_v1 }
 0x236   :  { %4423 = vmatprep.subr.bf16.mxu0 %v4870_v41  ;;  %4358 = vmatpush3.bf16.msra.mxu1 %v4871_v0  ;;  %v4882_v0 = vld [vmem:[%s6879_s5 + $0x1d8] sm:$0xff]  }
 0x237   :  { %4359 = vmatprep.subr.bf16.mxu1 %v4873_v62 }
 0x238   :  { %2255 = vmatmul.mubr.bf16.vlgmr.msra.gmra.mrb[64].mxu0 %v5667_v63  ;;  %v6908_v63 = vsub.s32 0, %v5314_v22 }
 0x239   :  { %2264 = vmatprep.mubr.bf16.mxu0 %v5770_v35  ;;  %4424 = vmatpush3.bf16.msra.mxu0 %v4872_v54 }
 0x23a   :  { %v6119_v33 = vrot.slane %v1043_v14, %v6908_v63  ;;  %4425 = vmatprep.subr.bf16.mxu0 %v4874_v6 }
 0x23c   :  { %1939 = vmatmul.mubr.bf16.gmra.mrb[4].mxu1 %v5717_v28  ;;  %v6909_v28 = vsub.s32 1, %v5314_v22 }
 0x23d   :  { %1948 = vmatprep.mubr.bf16.mxu1 %v5841_v10 }
 0x23e   :  { %v6123_v35 = vrot.slane %v1043_v14, %v6909_v28 }
 0x240   :  { %2265 = vmatmul.mubr.bf16.gmra.mrb[68].mxu0 %v5785_v43 }
 0x241   :  { %2274 = vmatprep.mubr.bf16.mxu0 %v5875_v4 }
 0x244   :  { %1949 = vmatmul.mubr.bf16.gmra.mrb[8].mxu1 %v5845_v16 }
 0x245   :  { %1958 = vmatprep.mubr.bf16.mxu1 %v5918_v46 }
 0x248   :  { %2275 = vmatmul.mubr.bf16.gmra.mrb[72].mxu0 %v5877_v52 }
 0x249   :  { %2284 = vmatprep.mubr.bf16.mxu0 %v5976_v21 }
 0x24c   :  { %1959 = vmatmul.mubr.bf16.gmra.mrb[12].mxu1 %v5922_v26 }
 0x250   :  { %2285 = vmatmul.mubr.bf16.gmra.mrb[76].mxu0 %v5978_v8 }
 0x307   :  { %v1930_v43 = vpop.f32.mrb[0].mxu1 }
 0x308   :  { %v1932_v10 = vpop.f32.mrb[1].mxu1  ;;  %v1996_v4 = vadd.f32 %v6119_v33, %v1930_v43 }
 0x309   :  { %v1934_v16 = vpop.f32.mrb[2].mxu1  ;;  %v1997_v52 = vadd.f32 %v6123_v35, %v1932_v10  ;;  %v4875_v10 = vld [vmem:[%s6879_s5 + $0x88] sm:$0xff]  }
 0x30a   :  { %v1936_v46 = vpop.f32.mrb[3].mxu1  ;;  %v1998_v26 = vadd.f32 %v6119_v33, %v1934_v16  ;;  %v2012_v34 = vmax.f32 %v1996_v4, 0.0  ;;  %v4876_v16 = vld [vmem:[%s6879_s5 + $0x188] sm:$0xff]   ;;  %4360 = vmatpush3.bf16.msra.mxu1 %v4875_v10 }
 0x30b   :  { %v1999_v21 = vadd.f32 %v6123_v35, %v1936_v46  ;;  %v2256_v8 = vpop.f32.mrb[64].mxu0  ;;  %v2013_v45 = vmax.f32 %v1997_v52, 0.0  ;;  %4426 = vmatpush3.bf16.msra.mxu0 %v4876_v16 }
 0x30c   :  { %v2311_v17 = vadd.f32 %v2256_v8, %v6119_v33  ;;  %v2258_v42 = vpop.f32.mrb[65].mxu0  ;;  %v2014_v59 = vmax.f32 %v1998_v26, 0.0 }
 0x30d   :  { %v2312_v22 = vadd.f32 %v2258_v42, %v6123_v35  ;;  %v2260_v15 = vpop.f32.mrb[66].mxu0  ;;  %v2015_v49 = vmax.f32 %v1999_v21, 0.0 }
 0x30e   :  { %v2327_v7 = vmax.f32 %v2311_v17, 0.0  ;;  %v2313_v57 = vadd.f32 %v2260_v15, %v6119_v33  ;;  %v2262_v36 = vpop.f32.mrb[67].mxu0 }
 0x30f   :  { %v2328_v55 = vmax.f32 %v2312_v22, 0.0  ;;  %v2314_v53 = vadd.f32 %v2262_v36, %v6123_v35  ;;  %v1940_v27 = vpop.f32.mrb[4].mxu1  ;;  %v4878_v36 = vld [vmem:[%s6879_s5 + $0x1d0] sm:$0xff]  }
 0x310   :  { %v6133_v23 = vmax.f32 %v2012_v34, %v2327_v7  ;;  %v2329_v11 = vmax.f32 %v2313_v57, 0.0  ;;  %v2000_v18 = vadd.f32 %v6119_v33, %v1940_v27  ;;  %v1942_v9 = vpop.f32.mrb[5].mxu1  ;;  %v4877_v57 = vld [vmem:[%s6879_s5 + $0xd0] sm:$0xff]   ;;  %4427 = vmatprep.subr.bf16.mxu0 %v4878_v36  ;;  %v4888_v36 = vld [vmem:[%s6879_s5 + $0x1a0] sm:$0xff]  }
 0x311   :  { %v6136_v32 = vmax.f32 %v2013_v45, %v2328_v55  ;;  %v2330_v60 = vmax.f32 %v2314_v53, 0.0  ;;  %v2001_v37 = vadd.f32 %v6123_v35, %v1942_v9  ;;  %v1944_v47 = vpop.f32.mrb[6].mxu1  ;;  %4361 = vmatprep.subr.bf16.mxu1 %v4877_v57  ;;  %v4880_v9 = vld [vmem:[%s6879_s5 + $0x190] sm:$0xff]  }
 0x312   :  { %v6145_v39 = vmax.f32 %v2014_v59, %v2329_v11  ;;  %v2016_v31 = vmax.f32 %v2000_v18, 0.0  ;;  %v2002_v50 = vadd.f32 %v6119_v33, %v1944_v47  ;;  %v1946_v61 = vpop.f32.mrb[7].mxu1  ;;  %v4879_v18 = vld [vmem:[%s6879_s5 + $0x90] sm:$0xff]   ;;  %4428 = vmatpush3.bf16.msra.mxu0 %v4880_v9 }
 0x313   :  { %v6148_v48 = vmax.f32 %v2015_v49, %v2330_v60  ;;  %v2017_v2 = vmax.f32 %v2001_v37, 0.0  ;;  %v2003_v40 = vadd.f32 %v6123_v35, %v1946_v61  ;;  %v2266_v29 = vpop.f32.mrb[68].mxu0  ;;  %v4685_v56 = vpack.i.bf16 %v6136_v32, %v6133_v23  ;;  %4362 = vmatpush3.bf16.msra.mxu1 %v4879_v18  ;;  %4429 = vmatprep.subr.bf16.mxu0 %v4882_v0  ;;  %v4892_v18 = vld [vmem:[%s6879_s5 + $0x1a8] sm:$0xff]  }
 0x314   :  { %v2018_v38 = vmax.f32 %v2002_v50, 0.0  ;;  %v2315_v24 = vadd.f32 %v2266_v29, %v6119_v33  ;;  %v2268_v3 = vpop.f32.mrb[69].mxu0 }
 0x315   :  { %v2019_v20 = vmax.f32 %v2003_v40, 0.0  ;;  %v2316_v5 = vadd.f32 %v2268_v3, %v6123_v35  ;;  %v2270_v13 = vpop.f32.mrb[70].mxu0  ;;  %4686 = vrot.lane.b32.xlu0 %v4685_v56, %s4988_s30  ;;  %v4690_v1 = vpack.i.bf16 %v6148_v48, %v6145_v39  ;;  %v4881_v56 = vld [vmem:[%s6879_s5 + $0xd8] sm:$0xff]  }
 0x316   :  { %v2331_v25 = vmax.f32 %v2315_v24, 0.0  ;;  %v2317_v30 = vadd.f32 %v2270_v13, %v6119_v33  ;;  %v2272_v44 = vpop.f32.mrb[71].mxu0  ;;  %4363 = vmatprep.subr.bf16.mxu1 %v4881_v56 }
 0x317   :  { %v2332_v19 = vmax.f32 %v2316_v5, 0.0  ;;  %v2318_v58 = vadd.f32 %v2272_v44, %v6123_v35  ;;  %v1950_v12 = vpop.f32.mrb[8].mxu1  ;;  %v4884_v44 = vld [vmem:[%s6879_s5 + $0x198] sm:$0xff]  }
 0x318   :  { %v6172_v14 = vmax.f32 %v2016_v31, %v2331_v25  ;;  %v2333_v63 = vmax.f32 %v2317_v30, 0.0  ;;  %v2004_v28 = vadd.f32 %v6119_v33, %v1950_v12  ;;  %v1952_v43 = vpop.f32.mrb[9].mxu1  ;;  %v4883_v30 = vld [vmem:[%s6879_s5 + $0x98] sm:$0xff]   ;;  %4430 = vmatpush3.bf16.msra.mxu0 %v4884_v44 }
 0x319   :  { %v6181_v4 = vmax.f32 %v2017_v2, %v2332_v19  ;;  %v2334_v52 = vmax.f32 %v2318_v58, 0.0  ;;  %v2005_v46 = vadd.f32 %v6123_v35, %v1952_v43  ;;  %4691 = vrot.lane.b32.xlu0 %v4690_v1, %s4988_s30  ;;  %v1954_v26 = vpop.f32.mrb[10].mxu1  ;;  %4364 = vmatpush3.bf16.msra.mxu1 %v4883_v30 }
 0x31a   :  { %v6185_v21 = vmax.f32 %v2018_v38, %v2333_v63  ;;  %v2020_v8 = vmax.f32 %v2004_v28, 0.0  ;;  %v2006_v17 = vadd.f32 %v6119_v33, %v1954_v26  ;;  %v1956_v42 = vpop.f32.mrb[11].mxu1  ;;  %v4886_v26 = vld [vmem:[%s6879_s5 + $0x1e0] sm:$0xff]  }
 0x31b   :  { %v6188_v22 = vmax.f32 %v2019_v20, %v2334_v52  ;;  %v2021_v15 = vmax.f32 %v2005_v46, 0.0  ;;  %v2007_v34 = vadd.f32 %v6123_v35, %v1956_v42  ;;  %v2276_v45 = vpop.f32.mrb[72].mxu0  ;;  %v4695_v7 = vpack.i.bf16 %v6181_v4, %v6172_v14  ;;  %v4885_v46 = vld [vmem:[%s6879_s5 + $0xe0] sm:$0xff]   ;;  %4431 = vmatprep.subr.bf16.mxu0 %v4886_v26 }
 0x31c   :  { %v2022_v59 = vmax.f32 %v2006_v17, 0.0  ;;  %v2319_v49 = vadd.f32 %v2276_v45, %v6119_v33  ;;  %v2278_v55 = vpop.f32.mrb[73].mxu0  ;;  %4365 = vmatprep.subr.bf16.mxu1 %v4885_v46  ;;  %v4887_v45 = vld [vmem:[%s6879_s5 + $0xa0] sm:$0xff]   ;;  %4432 = vmatpush3.bf16.msra.mxu0 %v4888_v36 }
 0x31d   :  { %v2023_v53 = vmax.f32 %v2007_v34, 0.0  ;;  %v2320_v27 = vadd.f32 %v2278_v55, %v6123_v35  ;;  %v2280_v11 = vpop.f32.mrb[74].mxu0  ;;  %4696 = vrot.lane.b32.xlu1 %v4695_v7, %s4988_s30  ;;  %v4700_v50 = vpack.i.bf16 %v6188_v22, %v6185_v21  ;;  %4366 = vmatpush3.bf16.msra.mxu1 %v4887_v45  ;;  %v4890_v55 = vld [vmem:[%s6879_s5 + $0x1e8] sm:$0xff]  }
 0x31e   :  { %v2335_v60 = vmax.f32 %v2319_v49, 0.0  ;;  %v2321_v37 = vadd.f32 %v2280_v11, %v6119_v33  ;;  %v2282_v47 = vpop.f32.mrb[75].mxu0  ;;  %v4891_v11 = vld [vmem:[%s6879_s5 + $0xa8] sm:$0xff]   ;;  %4433 = vmatprep.subr.bf16.mxu0 %v4890_v55 }
 0x31f   :  { %v2336_v51 = vmax.f32 %v2320_v27, 0.0  ;;  %v2322_v41 = vadd.f32 %v2282_v47, %v6123_v35  ;;  %v1960_v31 = vpop.f32.mrb[12].mxu1  ;;  %v4895_v47 = vld [vmem:[%s6879_s5 + $0xb0] sm:$0xff]  }
 0x320   :  { %v6212_v61 = vmax.f32 %v2020_v8, %v2335_v60  ;;  %v2337_v2 = vmax.f32 %v2321_v37, 0.0  ;;  %v2008_v40 = vadd.f32 %v6119_v33, %v1960_v31  ;;  %v1962_v29 = vpop.f32.mrb[13].mxu1  ;;  %v4893_v60 = vld [vmem:[%s6879_s5 + $0xf0] sm:$0xff]   ;;  %4434 = vmatpush3.bf16.msra.mxu0 %v4892_v18  ;;  %v4898_v31 = vld [vmem:[%s6879_s5 + $0x1f8] sm:$0xff]  }
 0x321   :  { %v6221_v54 = vmax.f32 %v2021_v15, %v2336_v51  ;;  %v2338_v38 = vmax.f32 %v2322_v41, 0.0  ;;  %v2009_v24 = vadd.f32 %v6123_v35, %v1962_v29  ;;  %4701 = vrot.lane.b32.xlu1 %v4700_v50, %s4988_s30  ;;  %v1964_v3 = vpop.f32.mrb[14].mxu1  ;;  %v4894_v37 = vld [vmem:[%s6879_s5 + $0x1f0] sm:$0xff]   ;;  %v4897_v41 = vld [vmem:[%s6879_s5 + $0xf8] sm:$0xff]   ;;  %v4902_v29 = vld [vmem:[%s6879_s5 + $0x2c0] sm:$0xff]  }
 0x322   :  { %v6225_v20 = vmax.f32 %v2022_v59, %v2337_v2  ;;  %v2024_v5 = vmax.f32 %v2008_v40, 0.0  ;;  %v2010_v13 = vadd.f32 %v6119_v33, %v1964_v3  ;;  %v1966_v25 = vpop.f32.mrb[15].mxu1  ;;  %4435 = vmatprep.subr.bf16.mxu0 %v4894_v37  ;;  %v4896_v51 = vld [vmem:[%s6879_s5 + $0x1b0] sm:$0xff]   ;;  %v4899_v50 = vld [vmem:[%s6879_s5 + $0xb8] sm:$0xff]   ;;  %v4901_v40 = vld [vmem:[%s6879_s5 + $0x40] sm:$0xff]  }
 0x323   :  { %v6234_v62 = vmax.f32 %v2023_v53, %v2338_v38  ;;  %v2025_v6 = vmax.f32 %v2009_v24, 0.0  ;;  %v2011_v19 = vadd.f32 %v6123_v35, %v1966_v25  ;;  %v2286_v58 = vpop.f32.mrb[76].mxu0  ;;  %v4705_v12 = vpack.i.bf16 %v6221_v54, %v6212_v61  ;;  %v4900_v2 = vld [vmem:[%s6879_s5 + $0x1b8] sm:$0xff]  }
 0x324   :  { %v2026_v1 = vmax.f32 %v2010_v13, 0.0  ;;  %v2323_v63 = vadd.f32 %v2286_v58, %v6119_v33  ;;  %v2288_v28 = vpop.f32.mrb[77].mxu0  ;;  %4436 = vmatpush3.bf16.msra.mxu0 %v4896_v51 }
 0x325   :  { %v2027_v43 = vmax.f32 %v2011_v19, 0.0  ;;  %v2324_v10 = vadd.f32 %v2288_v28, %v6123_v35  ;;  %v2290_v16 = vpop.f32.mrb[78].mxu0  ;;  %4706 = vrot.lane.b32.xlu0 %v4705_v12, %s4988_s30  ;;  %v4710_v52 = vpack.i.bf16 %v6234_v62, %v6225_v20  ;;  %4437 = vmatprep.subr.bf16.mxu0 %v4898_v31 }
 0x326   :  { %v2339_v8 = vmax.f32 %v2323_v63, 0.0  ;;  %v2325_v17 = vadd.f32 %v2290_v16, %v6119_v33  ;;  %v2292_v42 = vpop.f32.mrb[79].mxu0 }
 0x327   :  { %v2340_v15 = vmax.f32 %v2324_v10, 0.0  ;;  %v2326_v34 = vadd.f32 %v2292_v42, %v6123_v35  ;;  %4711 = vrot.lane.b32.xlu1 %v4710_v52, %s4988_s30  ;;  %v4889_v35 = vld [vmem:[%s6879_s5 + $0xe8] sm:$0xff]  }
 0x328   :  { %v6256_v7 = vmax.f32 %v2024_v5, %v2339_v8  ;;  %v2341_v57 = vmax.f32 %v2325_v17, 0.0  ;;  %4367 = vmatprep.subr.bf16.mxu1 %v4889_v35  ;;  %4438 = vmatpush3.bf16.msra.mxu0 %v4900_v2 }
 0x329   :  { %v6261_v33 = vmax.f32 %v2025_v6, %v2340_v15  ;;  %v2342_v59 = vmax.f32 %v2326_v34, 0.0  ;;  %4368 = vmatpush3.bf16.msra.mxu1 %v4891_v11  ;;  %4467 = vmatprep.subr.bf16.mxu0 %v4902_v29 }
 0x32a   :  { %v6266_v49 = vmax.f32 %v2026_v1, %v2341_v57  ;;  %4369 = vmatprep.subr.bf16.mxu1 %v4893_v60 }
 0x32b   :  { %v6271_v53 = vmax.f32 %v2027_v43, %v2342_v59  ;;  %v4715_v27 = vpack.i.bf16 %v6261_v33, %v6256_v7 }
 0x32d   :  { %4716 = vrot.lane.b32.xlu0 %v4715_v27, %s4988_s30  ;;  %v4720_v9 = vpack.i.bf16 %v6271_v53, %v6266_v49  ;;  %4370 = vmatpush3.bf16.msra.mxu1 %v4895_v47 }
 0x32e   :  { %4371 = vmatprep.subr.bf16.mxu1 %v4897_v41 }
 0x32f   :  { %4721 = vrot.lane.b32.xlu1 %v4720_v9, %s4988_s30 }
 0x331   :  { %4372 = vmatpush3.bf16.msra.mxu1 %v4899_v50 }
 0x332   :  { %4379 = vmatprep.subr.bf16.mxu1 %v4901_v40 }
 0x387   :  { %v4687_v56 = vpop.permute.xlu0 %4686 }
 0x388   :  { %v4689_v0 = vunpack.i.h.bf16 %v4687_v56  ;;  %v4688_v38 = vunpack.i.l.bf16 %v4687_v56 }
 0x38a   :  { %v2408_v24 = vsel %vm2407_vm12, %v4688_v38, %v4689_v0  ;;  %v2440_v3 = vsel %vm2407_vm12, %v4689_v0, %v4688_v38 }
 0x38b   :  { %v2448_v5 = vmax.f32 %v6133_v23, %v2408_v24  ;;  %v2449_v13 = vmax.f32 %v6136_v32, %v2440_v3  ;;  %v4692_v25 = vpop.permute.xlu0 %4691 }
 0x38c   :  { %v4694_v30 = vunpack.i.h.bf16 %v4692_v25  ;;  %v4693_v44 = vunpack.i.l.bf16 %v4692_v25 }
 0x38d   :  { %v4341_v6 = vpack.c.bf16 %v2448_v5, %v2448_v5  ;;  %v4342_v19 = vpack.c.bf16 %v2449_v13, %v2449_v13 }
 0x38e   :  { %v2409_v58 = vsel %vm2407_vm12, %v4693_v44, %v4694_v30  ;;  %v2441_v12 = vsel %vm2407_vm12, %v4694_v30, %v4693_v44 }
 0x38f   :  { %v6321_v1 = vunpack.c.l.b16 %v4341_v6  ;;  %v6323_v63 = vunpack.c.l.b16 %v4342_v19  ;;  %v2450_v28 = vmax.f32 %v6145_v39, %v2409_v58  ;;  %v2451_v43 = vmax.f32 %v6148_v48, %v2441_v12  ;;  %v4697_v23 = vpop.permute.xlu1 %4696 }
 0x390   :  { %v4699_v10 = vunpack.i.h.bf16 %v4697_v23  ;;  %v4698_v32 = vunpack.i.l.bf16 %v4697_v23 }
 0x391   :  { %v4343_v16 = vpack.c.bf16 %v2450_v28, %v2450_v28  ;;  %v4344_v52 = vpack.c.bf16 %v2451_v43, %v2451_v43  ;;  %v2613_v46 = vrot.slane %v6323_v63, 1  ;;  %v3182_v26 = vrot.slane %v6323_v63, 3 }
 0x392   :  { %v2410_v8 = vsel %vm2407_vm12, %v4698_v32, %v4699_v10  ;;  %v2442_v17 = vsel %vm2407_vm12, %v4699_v10, %v4698_v32  ;;  %v2592_v42 = vrot.slane %v6321_v1, 1  ;;  %v3168_v39 = vrot.slane %v6321_v1, 3 }
 0x393   :  { %v6333_v15 = vunpack.c.l.b16 %v4343_v16  ;;  %v6335_v48 = vunpack.c.l.b16 %v4344_v52  ;;  %v2452_v34 = vmax.f32 %v6172_v14, %v2410_v8  ;;  %v2453_v45 = vmax.f32 %v6181_v4, %v2442_v17  ;;  %v4702_v57 = vpop.permute.xlu1 %4701 }
 0x394   :  { %v4704_v36 = vunpack.i.h.bf16 %v4702_v57  ;;  %v4703_v59 = vunpack.i.l.bf16 %v4702_v57  ;;  %v3584_v35 = vrot.slane %v6323_v63, 5  ;;  %v3570_v55 = vrot.slane %v6321_v1, 5 }
 0x395   :  { %v4345_v27 = vpack.c.bf16 %v2452_v34, %v2452_v34  ;;  %v4346_v11 = vpack.c.bf16 %v2453_v45, %v2453_v45  ;;  %v2614_v18 = vsel %vm2593_vm13, %v6335_v48, %v2613_v46  ;;  %v3183_v9 = vrot.slane %v6335_v48, 2 }
 0x396   :  { %v2411_v14 = vsel %vm2407_vm12, %v4703_v59, %v4704_v36  ;;  %v2443_v4 = vsel %vm2407_vm12, %v4704_v36, %v4703_v59  ;;  %v2594_v60 = vsel %vm2593_vm13, %v6333_v15, %v2592_v42  ;;  %v3169_v37 = vrot.slane %v6333_v15, 2 }
 0x397   :  { %v6349_v47 = vunpack.c.l.b16 %v4345_v27  ;;  %v6351_v51 = vunpack.c.l.b16 %v4346_v11  ;;  %v2454_v41 = vmax.f32 %v6185_v21, %v2411_v14  ;;  %v2455_v31 = vmax.f32 %v6188_v22, %v2443_v4  ;;  %v4707_v50 = vpop.permute.xlu0 %4706 }
 0x398   :  { %v4709_v2 = vunpack.i.h.bf16 %v4707_v50  ;;  %v4708_v40 = vunpack.i.l.bf16 %v4707_v50  ;;  %v3184_v29 = vsel %vm2593_vm13, %v3183_v9, %v3182_v26  ;;  %v6357_v56 = vsel %vm2593_vm13, %v3169_v37, %v3168_v39 }
 0x399   :  { %v4347_v0 = vpack.c.bf16 %v2454_v41, %v2454_v41  ;;  %v4348_v38 = vpack.c.bf16 %v2455_v31, %v2455_v31  ;;  %v4712_v24 = vpop.permute.xlu1 %4711  ;;  %v2615_v3 = vrot.slane %v6351_v51, 7  ;;  %v3185_v5 = vrot.slane %v6351_v51, 1 }
 0x39a   :  { %v2412_v13 = vsel %vm2407_vm12, %v4708_v40, %v4709_v2  ;;  %v2444_v21 = vsel %vm2407_vm12, %v4709_v2, %v4708_v40  ;;  %v4714_v22 = vunpack.i.h.bf16 %v4712_v24  ;;  %v4713_v25 = vunpack.i.l.bf16 %v4712_v24 }
 0x39b   :  { %v6363_v30 = vunpack.c.l.b16 %v4347_v0  ;;  %v6365_v44 = vunpack.c.l.b16 %v4348_v38  ;;  %v2456_v6 = vmax.f32 %v6212_v61, %v2412_v13  ;;  %v2457_v19 = vmax.f32 %v6221_v54, %v2444_v21 }
 0x39c   :  { %v2413_v58 = vsel %vm2407_vm12, %v4713_v25, %v4714_v22  ;;  %v2445_v12 = vsel %vm2407_vm12, %v4714_v22, %v4713_v25  ;;  %v2616_v28 = vsel %vm2596_vm14, %v2615_v3, %v2614_v18  ;;  %v3186_v43 = vsel %vm2596_vm14, %v3185_v5, %v3184_v29 }
 0x39d   :  { %v4349_v23 = vpack.c.bf16 %v2456_v6, %v2456_v6  ;;  %v4350_v10 = vpack.c.bf16 %v2457_v19, %v2457_v19  ;;  %v2458_v32 = vmax.f32 %v6225_v20, %v2413_v58  ;;  %v2459_v16 = vmax.f32 %v6234_v62, %v2445_v12 }
 0x39e   :  { %v2617_v52 = vrot.slane %v6365_v44, 6  ;;  %v3187_v61 = vsel %vm2599_vm15, %v6365_v44, %v3186_v43  ;;  %v2595_v54 = vrot.slane %v6349_v47, 7  ;;  %v2598_v46 = vrot.slane %v6363_v30, 6 }
 0x39f   :  { %v6380_v26 = vunpack.c.l.b16 %v4349_v23  ;;  %v6382_v8 = vunpack.c.l.b16 %v4350_v10  ;;  %v4351_v17 = vpack.c.bf16 %v2458_v32, %v2458_v32  ;;  %v4352_v42 = vpack.c.bf16 %v2459_v16, %v2459_v16  ;;  %v4717_v39 = vpop.permute.xlu0 %4716 }
 0x3a0   :  { %v4719_v34 = vunpack.i.h.bf16 %v4717_v39  ;;  %v4718_v20 = vunpack.i.l.bf16 %v4717_v39  ;;  %v2618_v62 = vsel %vm2599_vm15, %v2617_v52, %v2616_v28  ;;  %v2597_v45 = vsel %vm2596_vm14, %v2595_v54, %v2594_v60 }
 0x3a1   :  { %v6386_v57 = vunpack.c.l.b16 %v4351_v17  ;;  %v6388_v36 = vunpack.c.l.b16 %v4352_v42  ;;  %v4722_v59 = vpop.permute.xlu1 %4721  ;;  %v2619_v27 = vrot.slane %v6382_v8, 5  ;;  %v3188_v11 = vrot.slane %v6382_v8, 7 }
 0x3a2   :  { %v2414_v18 = vsel %vm2407_vm12, %v4718_v20, %v4719_v34  ;;  %v2446_v9 = vsel %vm2407_vm12, %v4719_v34, %v4718_v20  ;;  %v4724_v14 = vunpack.i.h.bf16 %v4722_v59  ;;  %v4723_v4 = vunpack.i.l.bf16 %v4722_v59 }
 0x3a3   :  { %v2460_v37 = vmax.f32 %v6256_v7, %v2414_v18  ;;  %v2461_v60 = vmax.f32 %v6261_v33, %v2446_v9  ;;  %v2620_v41 = vsel %vm2602_vm0, %v2619_v27, %v2618_v62  ;;  %v2621_v31 = vrot.slane %v6388_v36, 4  ;;  %v4903_v9 = vld [vmem:[%s6879_s5] sm:$0xff]  }
 0x3a4   :  { %v2415_v50 = vsel %vm2407_vm12, %v4723_v4, %v4724_v14  ;;  %v2447_v2 = vsel %vm2407_vm12, %v4724_v14, %v4723_v4  ;;  %v3189_v40 = vsel %vm2602_vm0, %v3188_v11, %v3187_v61  ;;  %v3190_v29 = vrot.slane %v6388_v36, 6 }
 0x3a5   :  { %v4353_v0 = vpack.c.bf16 %v2460_v37, %v2460_v37  ;;  %v4354_v38 = vpack.c.bf16 %v2461_v60, %v2461_v60  ;;  %v2462_v24 = vmax.f32 %v6266_v49, %v2415_v50  ;;  %v2463_v7 = vmax.f32 %v6271_v53, %v2447_v2  ;;  %v4904_v2 = vld [vmem:[%s6879_s5 + $0x280] sm:$0xff]  }
 0x3a6   :  { %v2622_v33 = vsel %vm2605_vm1, %v2621_v31, %v2620_v41  ;;  %v3191_v3 = vsel %vm2605_vm1, %v3190_v29, %v3189_v40  ;;  %v2600_v5 = vsel %vm2599_vm15, %v2598_v46, %v2597_v45  ;;  %v2601_v13 = vrot.slane %v6380_v26, 5  ;;  %v4905_v31 = vld [vmem:[%s6879_s5 + $0x48] sm:$0xff]  }
 0x3a7   :  { %v6408_v21 = vunpack.c.l.b16 %v4353_v0  ;;  %v6410_v22 = vunpack.c.l.b16 %v4354_v38  ;;  %v4355_v25 = vpack.c.bf16 %v2462_v24, %v2462_v24  ;;  %v4356_v6 = vpack.c.bf16 %v2463_v7, %v2463_v7 }
 0x3a8   :  { %v2603_v19 = vsel %vm2602_vm0, %v2601_v13, %v2600_v5  ;;  %v2604_v49 = vrot.slane %v6386_v57, 4  ;;  %v3171_v53 = vrot.slane %v6349_v47, 1  ;;  %v3174_v58 = vrot.slane %v6380_v26, 7 }
 0x3a9   :  { %v6416_v12 = vunpack.c.l.b16 %v4355_v25  ;;  %v6418_v28 = vunpack.c.l.b16 %v4356_v6  ;;  %v2623_v43 = vrot.slane %v6410_v22, 3  ;;  %v3192_v23 = vrot.slane %v6410_v22, 5 }
 0x3aa   :  { %v2606_v10 = vsel %vm2605_vm1, %v2604_v49, %v2603_v19  ;;  %v2607_v32 = vrot.slane %v6408_v21, 3  ;;  %v3172_v16 = vsel %vm2596_vm14, %v3171_v53, %v6357_v56  ;;  %v3176_v52 = vrot.slane %v6386_v57, 6  ;;  %v4907_v19 = vld [vmem:[%s6879_s5 + $0x8] sm:$0xff]  }
 0x3ab   :  { %v2624_v61 = vsel %vm2608_vm2, %v2623_v43, %v2622_v33  ;;  %v2625_v54 = vrot.slane %v6418_v28, 2  ;;  %v3193_v46 = vsel %vm2608_vm2, %v3192_v23, %v3191_v3  ;;  %v3194_v17 = vrot.slane %v6418_v28, 4  ;;  %v4906_v3 = vld [vmem:[%s6879_s5 + $0x2c8] sm:$0xff]   ;;  %v4909_v23 = vld [vmem:[%s6879_s5 + $0x50] sm:$0xff]  }
 0x3ac   :  { %v2609_v42 = vsel %vm2608_vm2, %v2607_v32, %v2606_v10  ;;  %v2610_v39 = vrot.slane %v6416_v12, 2  ;;  %v3173_v34 = vsel %vm2599_vm15, %v6363_v30, %v3172_v16  ;;  %v3178_v20 = vrot.slane %v6408_v21, 5  ;;  %v4908_v16 = vld [vmem:[%s6879_s5 + $0x288] sm:$0xff]  }
 0x3ad   :  { %v2626_v56 = vsel %vm2611_vm3, %v2625_v54, %v2624_v61  ;;  %v3195_v62 = vsel %vm2611_vm3, %v3194_v17, %v3193_v46  ;;  %v3175_v45 = vsel %vm2602_vm0, %v3174_v58, %v3173_v34  ;;  %v3180_v59 = vrot.slane %v6416_v12, 4  ;;  %v4910_v17 = vld [vmem:[%s6879_s5 + $0x2d0] sm:$0xff]  }
 0x3ae   :  { %v2628_v27 = vpack.c.b16 %v2626_v56, %v2626_v56  ;;  %v3197_v11 = vpack.c.b16 %v3195_v62, %v3195_v62  ;;  %v2612_v18 = vsel %vm2611_vm3, %v2610_v39, %v2609_v42  ;;  %v3177_v14 = vsel %vm2605_vm1, %v3176_v52, %v3175_v45 }
 0x3af   :  { %v2627_v4 = vpack.c.b16 %v2612_v18, %v2612_v18  ;;  %v3179_v37 = vsel %vm2608_vm2, %v3178_v20, %v3177_v14  ;;  %v2781_v60 = vrot.slane %v6335_v48, 7  ;;  %v2783_v41 = vrot.slane %v6351_v51, 6  ;;  %v4911_v20 = vld [vmem:[%s6879_s5 + $0x10] sm:$0xff]  }
 0x3b0   :  { %2759 = vmatprep.mubr.bf16.mxu1 %v2628_v27  ;;  %3328 = vmatprep.mubr.bf16.mxu0 %v3197_v11  ;;  %v3181_v50 = vsel %vm2611_vm3, %v3180_v59, %v3179_v37  ;;  %v2785_v40 = vrot.slane %v6365_v44, 5  ;;  %v2787_v29 = vrot.slane %v6382_v8, 4  ;;  %v2789_v0 = vrot.slane %v6388_v36, 3  ;;  %v4913_v27 = vld [vmem:[%s6879_s5 + $0x58] sm:$0xff]  }
 0x3b1   :  { %2760 = vmatmul.mubr.bf16.vlgmr.msra.gmra.mrb[16].mxu1 %v2627_v4  ;;  %v3196_v38 = vpack.c.b16 %v3181_v50, %v3181_v50  ;;  %v2782_v24 = vsel %vm2593_vm13, %v2781_v60, %v6323_v63  ;;  %v2791_v7 = vrot.slane %v6410_v22, 2  ;;  %v2793_v33 = vrot.slane %v6418_v28, 1  ;;  %v4912_v4 = vld [vmem:[%s6879_s5 + $0x290] sm:$0xff]  }
 0x3b2   :  { %4380 = vmatpush3.bf16.msra.mxu1 %v4903_v9  ;;  %v2784_v5 = vsel %vm2596_vm14, %v2783_v41, %v2782_v24  ;;  %v3585_v13 = vrot.slane %v6335_v48, 4  ;;  %v3587_v25 = vrot.slane %v6351_v51, 3  ;;  %v3589_v6 = vrot.slane %v6365_v44, 2 }
 0x3b3   :  { %3329 = vmatmul.mubr.bf16.vlgmr.msra.gmra.mrb[80].mxu0 %v3196_v38  ;;  %v2786_v49 = vsel %vm2599_vm15, %v2785_v40, %v2784_v5  ;;  %v3591_v53 = vrot.slane %v6382_v8, 1  ;;  %v3594_v58 = vrot.slane %v6410_v22, 7  ;;  %v3596_v43 = vrot.slane %v6418_v28, 6  ;;  %4381 = vmatprep.subr.bf16.mxu1 %v4905_v31  ;;  %v4914_v31 = vld [vmem:[%s6879_s5 + $0x2d8] sm:$0xff]  }
 0x3b4   :  { %4468 = vmatpush3.bf16.msra.mxu0 %v4904_v2  ;;  %v2788_v10 = vsel %vm2602_vm0, %v2787_v29, %v2786_v49  ;;  %v3586_v32 = vsel %vm2593_vm13, %v3585_v13, %v3584_v35  ;;  %v2767_v52 = vrot.slane %v6333_v15, 7  ;;  %v2769_v61 = vrot.slane %v6349_v47, 6  ;;  %v4918_v49 = vld [vmem:[%s6879_s5 + $0x2e0] sm:$0xff]  }
 0x3b5   :  { %v2790_v54 = vsel %vm2605_vm1, %v2789_v0, %v2788_v10  ;;  %v3588_v46 = vsel %vm2596_vm14, %v3587_v25, %v3586_v32  ;;  %4469 = vmatprep.subr.bf16.mxu0 %v4906_v3  ;;  %v2771_v42 = vrot.slane %v6363_v30, 5  ;;  %v2773_v35 = vrot.slane %v6380_v26, 4  ;;  %v4915_v0 = vld [vmem:[%s6879_s5 + $0x18] sm:$0xff]   ;;  %v4917_v3 = vld [vmem:[%s6879_s5 + $0x60] sm:$0xff]  }
 0x3b6   :  { %v2792_v39 = vsel %vm2608_vm2, %v2791_v7, %v2790_v54  ;;  %v3590_v34 = vsel %vm2599_vm15, %v3589_v6, %v3588_v46  ;;  %4382 = vmatpush3.bf16.msra.mxu1 %v4907_v19  ;;  %v2768_v56 = vsel %vm2593_vm13, %v2767_v52, %v6321_v1  ;;  %v2775_v62 = vrot.slane %v6386_v57, 3  ;;  %v4916_v25 = vld [vmem:[%s6879_s5 + $0x298] sm:$0xff]  }
 0x3b7   :  { %v2794_v45 = vsel %vm2611_vm3, %v2793_v33, %v2792_v39  ;;  %v3592_v59 = vsel %vm2602_vm0, %v3591_v53, %v3590_v34  ;;  %4383 = vmatprep.subr.bf16.mxu1 %v4909_v23  ;;  %v2770_v11 = vsel %vm2596_vm14, %v2769_v61, %v2768_v56  ;;  %v2777_v18 = vrot.slane %v6408_v21, 2  ;;  %v4919_v23 = vld [vmem:[%s6879_s5 + $0x20] sm:$0xff]   ;;  %v4921_v61 = vld [vmem:[%s6879_s5 + $0x68] sm:$0xff]  }
 0x3b8   :  { %v2796_v9 = vpack.c.b16 %v2794_v45, %v2794_v45  ;;  %v3593_v14 = vsel %vm2605_vm1, %v6388_v36, %v3592_v59  ;;  %4470 = vmatpush3.bf16.msra.mxu0 %v4908_v16  ;;  %v2772_v37 = vsel %vm2599_vm15, %v2771_v42, %v2770_v11  ;;  %v2779_v60 = vrot.slane %v6416_v12, 1 }
 0x3b9   :  { %v3595_v41 = vsel %vm2608_vm2, %v3594_v58, %v3593_v14  ;;  %4471 = vmatprep.subr.bf16.mxu0 %v4910_v17  ;;  %v2774_v50 = vsel %vm2602_vm0, %v2773_v35, %v2772_v37  ;;  %v3571_v2 = vrot.slane %v6333_v15, 4  ;;  %v3573_v40 = vrot.slane %v6349_v47, 3  ;;  %v4920_v35 = vld [vmem:[%s6879_s5 + $0x2a0] sm:$0xff]  }
 0x3ba   :  { %2927 = vmatprep.mubr.bf16.mxu1 %v2796_v9  ;;  %v3597_v29 = vsel %vm2611_vm3, %v3596_v43, %v3595_v41  ;;  %4384 = vmatpush3.bf16.msra.mxu1 %v4911_v20  ;;  %v2776_v38 = vsel %vm2605_vm1, %v2775_v62, %v2774_v50  ;;  %v3575_v24 = vrot.slane %v6363_v30, 2  ;;  %v3577_v7 = vrot.slane %v6380_v26, 1  ;;  %v4922_v62 = vld [vmem:[%s6879_s5 + $0x2e8] sm:$0xff]  }
 0x3bb   :  { %v3599_v33 = vpack.c.b16 %v3597_v29, %v3597_v29  ;;  %4385 = vmatprep.subr.bf16.mxu1 %v4913_v27  ;;  %v2778_v5 = vsel %vm2608_vm2, %v2777_v18, %v2776_v38  ;;  %v3572_v13 = vsel %vm2593_vm13, %v3571_v2, %v3570_v55  ;;  %v2981_v55 = vrot.slane %v6323_v63, 2  ;;  %v4923_v18 = vld [vmem:[%s6879_s5 + $0x28] sm:$0xff]  }
 0x3bc   :  { %4472 = vmatpush3.bf16.msra.mxu0 %v4912_v4  ;;  %v6542_v6 = vsel %vm2611_vm3, %v2779_v60, %v2778_v5  ;;  %v3574_v19 = vsel %vm2596_vm14, %v3573_v40, %v3572_v13  ;;  %v2982_v58 = vrot.slane %v6335_v48, 1  ;;  %v2985_v43 = vrot.slane %v6365_v44, 7  ;;  %v4925_v60 = vld [vmem:[%s6879_s5 + $0x70] sm:$0xff]   ;;  %v4924_v40 = vld [vmem:[%s6879_s5 + $0x2a8] sm:$0xff]  }
 0x3bd   :  { %3730 = vmatprep.mubr.bf16.mxu0 %v3599_v33  ;;  %4473 = vmatprep.subr.bf16.mxu0 %v4914_v31  ;;  %v3576_v53 = vsel %vm2599_vm15, %v3575_v24, %v3574_v19  ;;  %v3580_v32 = vrot.slane %v6408_v21, 7  ;;  %v3582_v16 = vrot.slane %v6416_v12, 6  ;;  %v2987_v52 = vrot.slane %v6382_v8, 6 }
 0x3be   :  { %4386 = vmatpush3.bf16.msra.mxu1 %v4915_v0  ;;  %v3578_v10 = vsel %vm2602_vm0, %v3577_v7, %v3576_v53  ;;  %v2795_v54 = vpack.c.b16 %v6542_v6, %v6542_v6  ;;  %v2983_v46 = vsel %vm2593_vm13, %v2982_v58, %v2981_v55  ;;  %v2989_v17 = vrot.slane %v6388_v36, 5  ;;  %v4926_v7 = vld [vmem:[%s6879_s5 + $0x2f0] sm:$0xff]   ;;  %v4929_v58 = vld [vmem:[%s6879_s5 + $0x78] sm:$0xff]  }
 0x3bf   :  { %4387 = vmatprep.subr.bf16.mxu1 %v4917_v3  ;;  %v2991_v42 = vrot.slane %v6410_v22, 4  ;;  %v2984_v39 = vsel %vm2596_vm14, %v6351_v51, %v2983_v46  ;;  %v2967_v34 = vrot.slane %v6321_v1, 2  ;;  %v2968_v20 = vrot.slane %v6333_v15, 1 }
 0x3c0   :  { %4474 = vmatpush3.bf16.msra.mxu0 %v4916_v25  ;;  %v2971_v56 = vrot.slane %v6363_v30, 7  ;;  %v3579_v45 = vsel %vm2605_vm1, %v6386_v57, %v3578_v10  ;;  %v2986_v59 = vsel %vm2599_vm15, %v2985_v43, %v2984_v39  ;;  %v2993_v27 = vrot.slane %v6418_v28, 3  ;;  %v4927_v25 = vld [vmem:[%s6879_s5 + $0x30] sm:$0xff]  }
 0x3c1   :  { %4475 = vmatprep.subr.bf16.mxu0 %v4918_v49  ;;  %v2973_v11 = vrot.slane %v6380_v26, 6  ;;  %v3581_v9 = vsel %vm2608_vm2, %v3580_v32, %v3579_v45  ;;  %v2988_v14 = vsel %vm2602_vm0, %v2987_v52, %v2986_v59  ;;  %v2969_v4 = vsel %vm2593_vm13, %v2968_v20, %v2967_v34 }
 0x3c2   :  { %4388 = vmatpush3.bf16.msra.mxu1 %v4919_v23  ;;  %v2975_v37 = vrot.slane %v6386_v57, 5  ;;  %v2990_v41 = vsel %vm2605_vm1, %v2989_v17, %v2988_v14  ;;  %v2970_v31 = vsel %vm2596_vm14, %v6349_v47, %v2969_v4  ;;  %v2977_v50 = vrot.slane %v6408_v21, 4 }
 0x3c3   :  { %4389 = vmatprep.subr.bf16.mxu1 %v4921_v61  ;;  %v2979_v2 = vrot.slane %v6416_v12, 3  ;;  %v2972_v29 = vsel %vm2599_vm15, %v2971_v56, %v2970_v31  ;;  %v3383_v0 = vrot.slane %v6323_v63, 4  ;;  %v3384_v38 = vrot.slane %v6335_v48, 3  ;;  %v4931_v56 = vld [vmem:[%s6879_s5 + $0x38] sm:$0xff]  }
 0x3c4   :  { %4476 = vmatpush3.bf16.msra.mxu0 %v4920_v35  ;;  %v3386_v24 = vrot.slane %v6351_v51, 2  ;;  %v6609_v33 = vsel %vm2611_vm3, %v3582_v16, %v3581_v9  ;;  %v2992_v3 = vsel %vm2608_vm2, %v2991_v42, %v2990_v41  ;;  %v2974_v5 = vsel %vm2602_vm0, %v2973_v11, %v2972_v29  ;;  %v4928_v16 = vld [vmem:[%s6879_s5 + $0x2b0] sm:$0xff]   ;;  %v4930_v42 = vld [vmem:[%s6879_s5 + $0x2f8] sm:$0xff]   ;;  %v4933_v11 = vld [vmem:[%s6879_s5 + $0x140] sm:$0xff]  }
 0x3c5   :  { %4477 = vmatprep.subr.bf16.mxu0 %v4922_v62  ;;  %v3388_v13 = vrot.slane %v6365_v44, 1  ;;  %v2976_v19 = vsel %vm2605_vm1, %v2975_v37, %v2974_v5  ;;  %v3385_v49 = vsel %vm2593_vm13, %v3384_v38, %v3383_v0  ;;  %v3391_v53 = vrot.slane %v6388_v36, 7  ;;  %v4932_v37 = vld [vmem:[%s6879_s5 + $0x2b8] sm:$0xff]   ;;  %v4934_v29 = vld [vmem:[%s6879_s5 + $0x100] sm:$0xff]  }
 0x3c6   :  { %4390 = vmatpush3.bf16.msra.mxu1 %v4923_v18  ;;  %v3393_v55 = vrot.slane %v6410_v22, 6  ;;  %v2978_v43 = vsel %vm2608_vm2, %v2977_v50, %v2976_v19  ;;  %v3387_v23 = vsel %vm2596_vm14, %v3386_v24, %v3385_v49  ;;  %v3395_v10 = vrot.slane %v6418_v28, 5  ;;  %v4935_v24 = vld [vmem:[%s6879_s5 + $0x148] sm:$0xff]  }
 0x3c7   :  { %4391 = vmatprep.subr.bf16.mxu1 %v4925_v60  ;;  %v3369_v32 = vrot.slane %v6321_v1, 4  ;;  %v6632_v52 = vsel %vm2611_vm3, %v2979_v2, %v2978_v43  ;;  %v3389_v61 = vsel %vm2599_vm15, %v3388_v13, %v3387_v23  ;;  %v3370_v46 = vrot.slane %v6333_v15, 3  ;;  %v4939_v23 = vld [vmem:[%s6879_s5 + $0x158] sm:$0xff]  }
 0x3c8   :  { %4478 = vmatpush3.bf16.msra.mxu0 %v4924_v40  ;;  %v3372_v17 = vrot.slane %v6349_v47, 2  ;;  %v2994_v35 = vsel %vm2611_vm3, %v2993_v27, %v2992_v3  ;;  %v3390_v39 = vsel %vm2602_vm0, %v6382_v8, %v3389_v61  ;;  %v3374_v34 = vrot.slane %v6363_v30, 1  ;;  %v4944_v61 = vld [vmem:[%s6879_s5 + $0x128] sm:$0xff]  }
 0x3c9   :  { %4479 = vmatprep.subr.bf16.mxu0 %v4926_v7  ;;  %v3377_v20 = vrot.slane %v6386_v57, 7  ;;  %v3392_v62 = vsel %vm2605_vm1, %v3391_v53, %v3390_v39  ;;  %v3371_v45 = vsel %vm2593_vm13, %v3370_v46, %v3369_v32  ;;  %v3379_v59 = vrot.slane %v6408_v21, 6  ;;  %v4941_v32 = vld [vmem:[%s6879_s5 + $0x160] sm:$0xff]   ;;  %v4945_v46 = vld [vmem:[%s6879_s5 + $0x170] sm:$0xff]  }
 0x3ca   :  { %4392 = vmatpush3.bf16.msra.mxu1 %v4927_v25  ;;  %v3381_v27 = vrot.slane %v6416_v12, 5  ;;  %v3394_v18 = vsel %vm2608_vm2, %v3393_v55, %v3392_v62  ;;  %v3373_v9 = vsel %vm2596_vm14, %v3372_v17, %v3371_v45  ;;  %v3785_v14 = vrot.slane %v6323_v63, 6  ;;  %v4946_v17 = vld [vmem:[%s6879_s5 + $0x130] sm:$0xff]   ;;  %v4949_v39 = vld [vmem:[%s6879_s5 + $0x240] sm:$0xff]   ;;  %v4952_v45 = vld [vmem:[%s6879_s5 + $0x208] sm:$0xff]  }
 0x3cb   :  { %4393 = vmatprep.subr.bf16.mxu1 %v4929_v58  ;;  %v3786_v4 = vrot.slane %v6335_v48, 5  ;;  %v6663_v60 = vsel %vm2611_vm3, %v3395_v10, %v3394_v18  ;;  %v3375_v41 = vsel %vm2599_vm15, %v3374_v34, %v3373_v9  ;;  %v3788_v31 = vrot.slane %v6351_v51, 4  ;;  %v4950_v34 = vld [vmem:[%s6879_s5 + $0x200] sm:$0xff]  }
 0x3cc   :  { %4480 = vmatpush3.bf16.msra.mxu0 %v4928_v16  ;;  %v3790_v50 = vrot.slane %v6365_v44, 3  ;;  %v2996_v2 = vpack.c.b16 %v2994_v35, %v2994_v35  ;;  %v3376_v63 = vsel %vm2602_vm0, %v6380_v26, %v3375_v41  ;;  %v3792_v40 = vrot.slane %v6382_v8, 2  ;;  %v4943_v16 = vld [vmem:[%s6879_s5 + $0x168] sm:$0xff]   ;;  %v4948_v35 = vld [vmem:[%s6879_s5 + $0x138] sm:$0xff]   ;;  %v4957_v18 = vld [vmem:[%s6879_s5 + $0x260] sm:$0xff]  }
 0x3cd   :  { %4481 = vmatprep.subr.bf16.mxu0 %v4930_v42  ;;  %v3787_v48 = vsel %vm2593_vm13, %v3786_v4, %v3785_v14  ;;  %v3378_v0 = vsel %vm2605_vm1, %v3377_v20, %v3376_v63  ;;  %v3794_v44 = vrot.slane %v6388_v36, 1  ;;  %v3797_v38 = vrot.slane %v6418_v28, 7  ;;  %v4947_v42 = vld [vmem:[%s6879_s5 + $0x178] sm:$0xff]   ;;  %v4958_v9 = vld [vmem:[%s6879_s5 + $0x220] sm:$0xff]   ;;  %v4959_v14 = vld [vmem:[%s6879_s5 + $0x268] sm:$0xff]  }
 0x3ce   :  { %4394 = vmatpush3.bf16.msra.mxu1 %v4931_v56  ;;  %v3789_v51 = vsel %vm2596_vm14, %v3788_v31, %v3787_v48  ;;  %v3380_v8 = vsel %vm2608_vm2, %v3379_v59, %v3378_v0  ;;  %v3771_v3 = vrot.slane %v6321_v1, 6  ;;  %v3772_v5 = vrot.slane %v6333_v15, 5  ;;  %v4951_v56 = vld [vmem:[%s6879_s5 + $0x248] sm:$0xff]   ;;  %v4954_v59 = vld [vmem:[%s6879_s5 + $0x210] sm:$0xff]   ;;  %v4963_v41 = vld [vmem:[%s6879_s5 + $0x278] sm:$0xff]  }
 0x3cf   :  { %4401 = vmatprep.subr.bf16.mxu1 %v4933_v11  ;;  %v3791_v7 = vsel %vm2599_vm15, %v3790_v50, %v3789_v51  ;;  %v6687_v13 = vsel %vm2611_vm3, %v3381_v27, %v3380_v8  ;;  %v3774_v28 = vrot.slane %v6349_v47, 4  ;;  %v3776_v25 = vrot.slane %v6363_v30, 3  ;;  %v4936_v47 = vld [vmem:[%s6879_s5 + $0x108] sm:$0xff]   ;;  %v4955_v27 = vld [vmem:[%s6879_s5 + $0x258] sm:$0xff]   ;;  %v4965_v50 = vld [vmem:[%s6879_s5 + $0x340] sm:$0xff]  }
 0x3d0   :  { %4482 = vmatpush3.bf16.msra.mxu0 %v4932_v37  ;;  %v3793_v36 = vsel %vm2602_vm0, %v3792_v40, %v3791_v7  ;;  %v3598_v19 = vpack.c.b16 %v6609_v33, %v6609_v33  ;;  %v3773_v15 = vsel %vm2593_vm13, %v3772_v5, %v3771_v3  ;;  %v3778_v49 = vrot.slane %v6380_v26, 2  ;;  %v4937_v33 = vld [vmem:[%s6879_s5 + $0x150] sm:$0xff]   ;;  %v4956_v11 = vld [vmem:[%s6879_s5 + $0x218] sm:$0xff]   ;;  %v4960_v4 = vld [vmem:[%s6879_s5 + $0x228] sm:$0xff]  }
 0x3d1   :  { %2928 = vmatmul.mubr.bf16.vlgmr.msra.gmra.mrb[20].mxu1 %v2795_v54  ;;  %v3795_v1 = vsel %vm2605_vm1, %v3794_v44, %v3793_v36  ;;  %v3775_v6 = vsel %vm2596_vm14, %v3774_v28, %v3773_v15  ;;  %v3780_v54 = vrot.slane %v6386_v57, 1  ;;  %v3783_v55 = vrot.slane %v6416_v12, 7  ;;  %v4938_v57 = vld [vmem:[%s6879_s5 + $0x110] sm:$0xff]   ;;  %v4940_v12 = vld [vmem:[%s6879_s5 + $0x118] sm:$0xff]   ;;  %v4967_v48 = vld [vmem:[%s6879_s5 + $0x348] sm:$0xff]  }
 0x3d2   :  { %4402 = vmatpush3.bf16.msra.mxu1 %v4934_v29  ;;  %3127 = vmatprep.mubr.bf16.mxu1 %v2996_v2  ;;  %v3796_v30 = vsel %vm2608_vm2, %v6410_v22, %v3795_v1  ;;  %v3777_v53 = vsel %vm2599_vm15, %v3776_v25, %v3775_v6  ;;  %v2995_v20 = vpack.c.b16 %v6632_v52, %v6632_v52  ;;  %v4953_v52 = vld [vmem:[%s6879_s5 + $0x250] sm:$0xff]   ;;  %v4964_v31 = vld [vmem:[%s6879_s5 + $0x238] sm:$0xff]   ;;  %v4966_v2 = vld [vmem:[%s6879_s5 + $0x300] sm:$0xff]  }
 0x3d3   :  { %3731 = vmatmul.mubr.bf16.vlgmr.msra.gmra.mrb[84].mxu0 %v3598_v19  ;;  %4403 = vmatprep.subr.bf16.mxu1 %v4935_v24  ;;  %v6711_v26 = vsel %vm2611_vm3, %v3797_v38, %v3796_v30  ;;  %v3779_v58 = vsel %vm2602_vm0, %v3778_v49, %v3777_v53  ;;  %v3398_v62 = vpack.c.b16 %v6663_v60, %v6663_v60  ;;  %v4961_v37 = vld [vmem:[%s6879_s5 + $0x270] sm:$0xff]   ;;  %v4968_v29 = vld [vmem:[%s6879_s5 + $0x308] sm:$0xff]   ;;  %v4971_v44 = vld [vmem:[%s6879_s5 + $0x358] sm:$0xff]  }
 0x3d4   :  { %v3781_v22 = vsel %vm2605_vm1, %v3780_v54, %v3779_v58  ;;  %v4962_v60 = vld [vmem:[%s6879_s5 + $0x230] sm:$0xff]   ;;  %v3397_v63 = vpack.c.b16 %v6687_v13, %v6687_v13  ;;  %v3800_v40 = vpack.c.b16 %v6711_v26, %v6711_v26  ;;  %v4972_v38 = vld [vmem:[%s6879_s5 + $0x318] sm:$0xff]   ;;  %v4973_v24 = vld [vmem:[%s6879_s5 + $0x360] sm:$0xff]  }
 0x3d5   :  { %v3782_v43 = vsel %vm2608_vm2, %v6408_v21, %v3781_v22  ;;  %v4942_v21 = vld [vmem:[%s6879_s5 + $0x120] sm:$0xff]   ;;  %v4969_v0 = vld [vmem:[%s6879_s5 + $0x350] sm:$0xff]   ;;  %v4975_v7 = vld [vmem:[%s6879_s5 + $0x368] sm:$0xff]  }
 0x3d6   :  { %4404 = vmatpush3.bf16.msra.mxu1 %v4936_v47  ;;  %v6726_v10 = vsel %vm2611_vm3, %v3783_v55, %v3782_v43  ;;  %v4970_v51 = vld [vmem:[%s6879_s5 + $0x310] sm:$0xff]   ;;  %v4974_v8 = vld [vmem:[%s6879_s5 + $0x320] sm:$0xff]   ;;  %v4976_v3 = vld [vmem:[%s6879_s5 + $0x328] sm:$0xff]  }
 0x3d7   :  { %4405 = vmatprep.subr.bf16.mxu1 %v4937_v33  ;;  %v4977_v5 = vld [vmem:[%s6879_s5 + $0x370] sm:$0xff]   ;;  %v4979_v36 = vld [vmem:[%s6879_s5 + $0x378] sm:$0xff]   ;;  %v3799_v25 = vpack.c.b16 %v6726_v10, %v6726_v10 }
 0x3d8   :  { %v4978_v13 = vld [vmem:[%s6879_s5 + $0x330] sm:$0xff]   ;;  %v4980_v28 = vld [vmem:[%s6879_s5 + $0x338] sm:$0xff]  }
 0x3da   :  { %4406 = vmatpush3.bf16.msra.mxu1 %v4938_v57 }
 0x3db   :  { %4407 = vmatprep.subr.bf16.mxu1 %v4939_v23 }
 0x3de   :  { %4408 = vmatpush3.bf16.msra.mxu1 %v4940_v12 }
 0x3df   :  { %4409 = vmatprep.subr.bf16.mxu1 %v4941_v32 }
 0x3e2   :  { %4410 = vmatpush3.bf16.msra.mxu1 %v4942_v21 }
 0x3e3   :  { %4411 = vmatprep.subr.bf16.mxu1 %v4943_v16 }
 0x3e6   :  { %4412 = vmatpush3.bf16.msra.mxu1 %v4944_v61 }
 0x3e7   :  { %4413 = vmatprep.subr.bf16.mxu1 %v4945_v46 }
 0x3ea   :  { %4414 = vmatpush3.bf16.msra.mxu1 %v4946_v17 }
 0x3eb   :  { %4415 = vmatprep.subr.bf16.mxu1 %v4947_v42 }
 0x3ee   :  { %4416 = vmatpush3.bf16.msra.mxu1 %v4948_v35 }
 0x3ef   :  { %4445 = vmatprep.subr.bf16.mxu1 %v4949_v39 }
 0x3f1   :  { %3128 = vmatmul.mubr.bf16.vlgmr.msra.gmra.mrb[24].mxu1 %v2995_v20 }
 0x3f2   :  { %4446 = vmatpush3.bf16.msra.mxu1 %v4950_v34  ;;  %3529 = vmatprep.mubr.bf16.mxu1 %v3398_v62 }
 0x3f3   :  { %4447 = vmatprep.subr.bf16.mxu1 %v4951_v56 }
 0x3f6   :  { %4448 = vmatpush3.bf16.msra.mxu1 %v4952_v45 }
 0x3f7   :  { %4449 = vmatprep.subr.bf16.mxu1 %v4953_v52 }
 0x3fa   :  { %4450 = vmatpush3.bf16.msra.mxu1 %v4954_v59 }
 0x3fb   :  { %4451 = vmatprep.subr.bf16.mxu1 %v4955_v27 }
 0x3fe   :  { %4452 = vmatpush3.bf16.msra.mxu1 %v4956_v11 }
 0x3ff   :  { %4453 = vmatprep.subr.bf16.mxu1 %v4957_v18 }
 0x402   :  { %4454 = vmatpush3.bf16.msra.mxu1 %v4958_v9 }
 0x403   :  { %4455 = vmatprep.subr.bf16.mxu1 %v4959_v14  ;;  %v4324_v14 = vld [vmem:[%s6880_s6] ss:$0 sm:$0xff] }
 0x406   :  { %4456 = vmatpush3.bf16.msra.mxu1 %v4960_v4 }
 0x407   :  { %4457 = vmatprep.subr.bf16.mxu1 %v4961_v37 }
 0x40a   :  { %4458 = vmatpush3.bf16.msra.mxu1 %v4962_v60 }
 0x40b   :  { %4459 = vmatprep.subr.bf16.mxu1 %v4963_v41 }
 0x40e   :  { %4460 = vmatpush3.bf16.msra.mxu1 %v4964_v31 }
 0x40f   :  { %4489 = vmatprep.subr.bf16.mxu1 %v4965_v50 }
 0x411   :  { %3530 = vmatmul.mubr.bf16.vlgmr.msra.gmra.mrb[28].mxu1 %v3397_v63 }
 0x412   :  { %4490 = vmatpush3.bf16.msra.mxu1 %v4966_v2  ;;  %3931 = vmatprep.mubr.bf16.mxu1 %v3800_v40 }
 0x413   :  { %4491 = vmatprep.subr.bf16.mxu1 %v4967_v48 }
 0x416   :  { %4492 = vmatpush3.bf16.msra.mxu1 %v4968_v29 }
 0x417   :  { %4493 = vmatprep.subr.bf16.mxu1 %v4969_v0 }
 0x41a   :  { %4494 = vmatpush3.bf16.msra.mxu1 %v4970_v51 }
 0x41b   :  { %4495 = vmatprep.subr.bf16.mxu1 %v4971_v44 }
 0x41e   :  { %4496 = vmatpush3.bf16.msra.mxu1 %v4972_v38 }
 0x41f   :  { %4497 = vmatprep.subr.bf16.mxu1 %v4973_v24 }
 0x422   :  { %4498 = vmatpush3.bf16.msra.mxu1 %v4974_v8 }
 0x423   :  { %4499 = vmatprep.subr.bf16.mxu1 %v4975_v7 }
 0x426   :  { %4500 = vmatpush3.bf16.msra.mxu1 %v4976_v3 }
 0x427   :  { %4501 = vmatprep.subr.bf16.mxu1 %v4977_v5 }
 0x42a   :  { %4502 = vmatpush3.bf16.msra.mxu1 %v4978_v13 }
 0x42b   :  { %4503 = vmatprep.subr.bf16.mxu1 %v4979_v36 }
 0x42e   :  { %4504 = vmatpush3.bf16.msra.mxu1 %v4980_v28 }
 0x431   :  { %3932 = vmatmul.mubr.bf16.vlgmr.msra.gmra.mrb[32].mxu1 %v3799_v25 }
 0x484   :  { %v4373_v19 = vpop.f32.mrb[16].mxu1 }
 0x485   :  { %v4374_v1 = vpop.f32.mrb[17].mxu1 }
 0x486   :  { %v4439_v15 = vpop.f32.mrb[80].mxu0  ;;  %v4375_v49 = vadd.f32 %v4374_v1, %v4373_v19  ;;  %v4376_v47 = vpop.f32.mrb[18].mxu1 }
 0x487   :  { %v4440_v30 = vpop.f32.mrb[81].mxu0  ;;  %v4377_v6 = vpop.f32.mrb[19].mxu1 }
 0x488   :  { %v4441_v54 = vadd.f32 %v4440_v30, %v4439_v15  ;;  %v4442_v33 = vpop.f32.mrb[82].mxu0 }
 0x489   :  { %v4443_v26 = vpop.f32.mrb[83].mxu0 }
 0x4a4   :  { %v4395_v53 = vpop.f32.mrb[20].mxu1 }
 0x4a5   :  { %v4396_v55 = vpop.f32.mrb[21].mxu1 }
 0x4a6   :  { %v4483_v58 = vpop.f32.mrb[84].mxu0  ;;  %v4397_v22 = vadd.f32 %v4396_v55, %v4395_v53  ;;  %v4398_v57 = vpop.f32.mrb[22].mxu1 }
 0x4a7   :  { %v4484_v43 = vpop.f32.mrb[85].mxu0  ;;  %v4399_v23 = vpop.f32.mrb[23].mxu1 }
 0x4a8   :  { %v2930_v12 = vadd.f32 %v4397_v22, %v4375_v49  ;;  %v4485_v10 = vadd.f32 %v4484_v43, %v4483_v58  ;;  %v4486_v32 = vpop.f32.mrb[86].mxu0 }
 0x4a9   :  { %v4487_v21 = vpop.f32.mrb[87].mxu0 }
 0x4c4   :  { %v4417_v16 = vpop.f32.mrb[24].mxu1 }
 0x4c5   :  { %v4418_v61 = vpop.f32.mrb[25].mxu1 }
 0x4c6   :  { %v4419_v46 = vadd.f32 %v4418_v61, %v4417_v16  ;;  %v4420_v17 = vpop.f32.mrb[26].mxu1 }
 0x4c7   :  { %v4421_v42 = vpop.f32.mrb[27].mxu1 }
 0x4c8   :  { %v3135_v35 = vadd.f32 %v4419_v46, %v2930_v12 }
 0x4ca   :  { %v3336_v39 = vadd.f32 %v4441_v54, %v3135_v35 }
 0x4e4   :  { %v4461_v34 = vpop.f32.mrb[28].mxu1 }
 0x4e5   :  { %v4462_v20 = vpop.f32.mrb[29].mxu1 }
 0x4e6   :  { %v4463_v56 = vadd.f32 %v4462_v20, %v4461_v34  ;;  %v4464_v62 = vpop.f32.mrb[30].mxu1 }
 0x4e7   :  { %v4465_v45 = vpop.f32.mrb[31].mxu1 }
 0x4e8   :  { %v3537_v52 = vadd.f32 %v4463_v56, %v3336_v39 }
 0x4ea   :  { %v3738_v59 = vadd.f32 %v4485_v10, %v3537_v52 }
 0x504   :  { %v4505_v27 = vpop.f32.mrb[32].mxu1 }
 0x505   :  { %v4506_v11 = vpop.f32.mrb[33].mxu1 }
 0x506   :  { %v4507_v18 = vadd.f32 %v4506_v11, %v4505_v27  ;;  %v4508_v9 = vpop.f32.mrb[34].mxu1 }
 0x507   :  { %v4509_v4 = vpop.f32.mrb[35].mxu1 }
 0x508   :  { %v3939_v37 = vadd.f32 %v4507_v18, %v3738_v59 }
 0x50a   :  { %v3947_v60 = vadd.f32 %v4324_v14, %v3939_v37 }
 0x50c   :  { %v3950_v41 = vsel %vm3948_vm4, %v3947_v60, -inf  ;;  %3949 = vst.msk [vmem:[%s6881_s7] sm:$0xff] %vm3948_vm4, %v3947_v60 }
 0x50d   :  { %3951 = vmax.xlane.f32.xlu0 %v3950_v41 }
 0x59a   :  { %v3952_v31 = vpop.xlane.xlu0 %3951 }
 0x59b   :  { %v3953_v50 = vsub.f32 %v3947_v60, %v3952_v31 }
 0x59d   :  { %v3954_v2 = vmul.f32 1.442695, %v3953_v50 }
 0x59f   :  { %4981 = vpow2.f32 %v3954_v2 }
 0x5a9   :  { %v4982_v63 = vpop.eup %4981 }
 0x5aa   :  { %v3956_v48 = vsel %vm3948_vm4, %v4982_v63, 0.0 }
 0x5ab   :  { %3957 = vadd.xlane.f32.xlu1 %v3956_v48 }
 0x638   :  { %v3958_v40 = vpop.xlane.xlu1 %3957 }
 0x639   :  { %4983 = vrcp.f32 %v3958_v40 }
 0x643   :  { %v4984_v29 = vpop.eup %4983 }
 0x644   :  { %v3960_v0 = vmul.f32 %v4984_v29, %v4982_v63 }
 0x646   :  { %3961 = vst.msk [vmem:[%s6882_s8] sm:$0xff] %vm3948_vm4, %v3960_v0 }

</bundles_post_ra>
